<compile_context>
chip_gen: v5e
topology: v5e:2x2
jax: 0.10.0
libtpu: 0.0.40
codegen_flags: <defaults>
</compile_context>

<pallas_src>
import functools

import jax
import jax.numpy as jnp
from jax import lax
from jax.experimental import pallas as pl
from jax.experimental.pallas import tpu as pltpu

LANE = 128
SUB = 8
TB = 16            # bond tile (sublane tile for bf16 bond blocks); raise to 128/256 for big graphs
NEG_BIG = -1e30    # finite "minus infinity" -> 0 * NEG_BIG stays finite (keep mask math in f32)


def _round_up(x, m):
    return ((x + m - 1) // m) * m


def _pad_to(x, shape):
    return jnp.pad(x, [(0, s - d) for d, s in zip(x.shape, shape)])


def _graph_attention_kernel(
    bi_ref,                                           # SMEM int32 [2*B_pad]: (target, neighbor)
    atom_ref, bond_ref, w_enc_ref, b_enc_ref,
    wa_t_ref, wa_n_ref, b_align_ref,
    w_att_ref, b_att_ref,
    w_ih_ref, w_hh_ref, b_ih_ref, b_hh_ref,
    out_ref,
    tgt_s, nbr_s, mask_s, m_s, l_s, accT_s,
    *, fp,
):
    f32 = jnp.float32
    bf16 = jnp.bfloat16
    t = pl.program_id(0)
    tb = bond_ref.shape[0]
    A_pad, Dp = atom_ref.shape

    @pl.when(t == 0)
    def _init():
        m_s[...] = jnp.full(m_s.shape, NEG_BIG, f32)
        l_s[...] = jnp.zeros(l_s.shape, f32)
        accT_s[...] = jnp.zeros(accT_s.shape, f32)

    # ---- index-based gathers for this bond tile: atom[target], atom[neighbor] ----
    lane_iota = lax.broadcasted_iota(jnp.int32, (1, A_pad), 1)

    def _gather(j, carry):
        k = t * tb + j
        ti = bi_ref[2 * k]          # target atom index  (bond_index[:, 0])
        ni = bi_ref[2 * k + 1]      # neighbor atom index (bond_index[:, 1])
        tgt_s[pl.ds(j, 1), :] = atom_ref[pl.ds(ti, 1), :]
        nbr_s[pl.ds(j, 1), :] = atom_ref[pl.ds(ni, 1), :]
        mask_s[pl.ds(j, 1), :] = (lane_iota == ti).astype(f32)   # one-hot target row
        return carry

    lax.fori_loop(0, tb, _gather, 0)

    # ---- encoder: Linear(bond_dim, fp*fp) (folded eval BN) + ReLU ----  [TB, fp*Dp], bf16 MXU
    enc = jnp.dot(bond_ref[...], w_enc_ref[...], preferred_element_type=f32) + b_enc_ref[...]
    enc = jnp.maximum(enc, 0.0)

    # ---- per-bond mat-vec (VPU): neighbor[b, :] = sum_d nbr_atom[b, d] * enc[b, d*Dp:(d+1)*Dp]
    nbr_atom = nbr_s[...]
    neighbor = jnp.zeros((tb, Dp), f32)
    for d in range(fp):
        neighbor = neighbor + nbr_atom[:, d:d + 1] * enc[:, d * Dp:(d + 1) * Dp]

    # ---- align score (VPU broadcast-mul + lane reduce) + leaky_relu(0.01) ----  [TB, 1]
    tgt_atom = tgt_s[...]
    score = (jnp.sum(tgt_atom * wa_t_ref[...], axis=1, keepdims=True)
             + jnp.sum(neighbor * wa_n_ref[...], axis=1, keepdims=True)
             + b_align_ref[...])
    score = jnp.where(score > 0, score, 0.01 * score)

    # ---- attend: LinearBn(fp, fp), folded eval BN ----  [TB, Dp]
    att = (jnp.dot(neighbor.astype(bf16), w_att_ref[...], preferred_element_type=f32)
           + b_att_ref[...])

    # ---- online segment softmax over bonds grouped by target atom ----
    M = mask_s[...]                                                    # [TB, A_pad] one-hot (f32)
    tile_max = jnp.max(jnp.where(M > 0, score, NEG_BIG), axis=0, keepdims=True)   # [1, A_pad]
    m_old = m_s[...]
    m_new = jnp.maximum(m_old, tile_max)
    alpha = jnp.exp(m_old - m_new)                                     # [1, A_pad] rescale factor
    m_g = jnp.sum(M * m_new, axis=1, keepdims=True)                    # [TB, 1] per-bond gather
    p = jnp.exp(score - m_g)                                           # [TB, 1]
    l_s[...] = alpha * l_s[...] + jnp.sum(M * p, axis=0, keepdims=True)
    # scatter-add, feature-major: contrib_T[e, a] = sum_b (p*att)[b, e] * M[b, a]
    contrib_T = lax.dot_general(p * att, M,
                                dimension_numbers=(((0,), (0,)), ((), ())),
                                preferred_element_type=f32)            # [Dp, A_pad]
    accT_s[...] = alpha * accT_s[...] + contrib_T
    m_s[...] = m_new

    # ---- finalize on the last bond tile: normalize, ELU, GRUCell(context, atom) ----
    @pl.when(t == pl.num_programs(0) - 1)
    def _finalize():
        inv_l = pl.reciprocal(l_s[...] + 1e-8, approx=True)            # [1, A_pad]
        ctxT = accT_s[...] * inv_l                                     # [Dp, A_pad]
        ctxT = jnp.where(ctxT > 0, ctxT, jnp.exp(jnp.minimum(ctxT, 0.0)) - 1.0)   # ELU
        atom = atom_ref[...]                                           # [A_pad, Dp]
        gi = lax.dot_general(ctxT, w_ih_ref[...],
                             dimension_numbers=(((0,), (0,)), ((), ())),
                             preferred_element_type=f32) + b_ih_ref[...]   # [A_pad, 3*Dp]
        gh = jnp.dot(atom.astype(bf16), w_hh_ref[...],
                     preferred_element_type=f32) + b_hh_ref[...]           # [A_pad, 3*Dp]
        r = jax.nn.sigmoid(gi[:, 0:Dp] + gh[:, 0:Dp])
        z = jax.nn.sigmoid(gi[:, Dp:2 * Dp] + gh[:, Dp:2 * Dp])
        n = jnp.tanh(gi[:, 2 * Dp:3 * Dp] + r * gh[:, 2 * Dp:3 * Dp])
        out_ref[...] = (1.0 - z) * n + z * atom


@jax.jit
def graph_attention(atom, bond_index, bond, params):
    """One graphAttention step.  atom [A, fp] f32, bond_index [B, 2] int32 (col0=target,
    col1=neighbor), bond [B, bond_dim].  Returns updated atom [A, fp] f32."""
    A, fp = atom.shape
    B, bond_dim = bond.shape
    Dp = _round_up(fp, LANE)
    BDp = _round_up(bond_dim, LANE)
    A_pad = _round_up(A + 1, SUB)        # +1 dummy atom row that padded bonds scatter into
    B_pad = _round_up(B, TB)
    n_tiles = B_pad // TB

    atom_p = _pad_to(atom.astype(jnp.float32), (A_pad, Dp))
    bond_p = _pad_to(bond.astype(jnp.float32), (B_pad, BDp)).astype(jnp.bfloat16)
    bi = jnp.full((B_pad, 2), 0, jnp.int32).at[:, 0].set(A)       # padded bonds -> dummy atom A
    bi = bi.at[:B, :].set(bond_index.astype(jnp.int32)).reshape(-1)

    # ---- pad parameters to lane-dense layouts; heavy NN-matmul operands in bf16 ----
    w_enc = _pad_to(params["w_enc"].reshape(bond_dim, fp, fp), (BDp, fp, Dp))
    w_enc = w_enc.reshape(BDp, fp * Dp).astype(jnp.bfloat16)
    b_enc = _pad_to(params["b_enc"].reshape(fp, fp), (fp, Dp)).reshape(1, fp * Dp)
    wa = params["w_align"]
    wa_t = _pad_to(wa[:fp, 0].reshape(1, fp), (1, Dp))
    wa_n = _pad_to(wa[fp:, 0].reshape(1, fp), (1, Dp))
    b_align = params["b_align"].reshape(1, 1)
    w_att = _pad_to(params["w_att"], (Dp, Dp)).astype(jnp.bfloat16)
    b_att = _pad_to(params["b_att"].reshape(1, fp), (1, Dp))
    w_ih = _pad_to(params["w_ih"].reshape(fp, 3, fp), (Dp, 3, Dp)).reshape(Dp, 3 * Dp)   # f32 (TN)
    w_hh = _pad_to(params["w_hh"].reshape(fp, 3, fp), (Dp, 3, Dp)).reshape(Dp, 3 * Dp)
    w_hh = w_hh.astype(jnp.bfloat16)
    b_ih = _pad_to(params["b_ih"].reshape(3, fp), (3, Dp)).reshape(1, 3 * Dp)
    b_hh = _pad_to(params["b_hh"].reshape(3, fp), (3, Dp)).reshape(1, 3 * Dp)

    def full(shape):
        return pl.BlockSpec(shape, lambda t, bi_ref: (0, 0))

    grid_spec = pltpu.PrefetchScalarGridSpec(
        num_scalar_prefetch=1,
        grid=(n_tiles,),
        in_specs=[
            full((A_pad, Dp)),                                     # atom (resident every step)
            pl.BlockSpec((TB, BDp), lambda t, bi_ref: (t, 0)),     # bond tile
            full((BDp, fp * Dp)), full((1, fp * Dp)),              # w_enc, b_enc
            full((1, Dp)), full((1, Dp)), full((1, 1)),            # wa_t, wa_n, b_align
            full((Dp, Dp)), full((1, Dp)),                         # w_att, b_att
            full((Dp, 3 * Dp)), full((Dp, 3 * Dp)),                # w_ih, w_hh
            full((1, 3 * Dp)), full((1, 3 * Dp)),                  # b_ih, b_hh
        ],
        out_specs=pl.BlockSpec((A_pad, Dp), lambda t, bi_ref: (0, 0)),
        scratch_shapes=[
            pltpu.VMEM((TB, Dp), jnp.float32),      # gathered target atoms
            pltpu.VMEM((TB, Dp), jnp.float32),      # gathered neighbor atoms
            pltpu.VMEM((TB, A_pad), jnp.float32),   # per-tile one-hot target mask
            pltpu.VMEM((1, A_pad), jnp.float32),    # running segment max
            pltpu.VMEM((1, A_pad), jnp.float32),    # running segment sum
            pltpu.VMEM((Dp, A_pad), jnp.float32),   # running context accumulator (feature-major)
        ],
    )

    out = pl.pallas_call(
        functools.partial(_graph_attention_kernel, fp=fp),
        out_shape=jax.ShapeDtypeStruct((A_pad, Dp), jnp.float32),
        grid_spec=grid_spec,
        compiler_params=pltpu.CompilerParams(
            dimension_semantics=("arbitrary",),      # bond axis carries the online-softmax state
            vmem_limit_bytes=48 * 1024 * 1024,       # headroom for larger bond tiles (v5e/v6e)
        ),
    )(bi, atom_p, bond_p, w_enc, b_enc, wa_t, wa_n, b_align,
      w_att, b_att, w_ih, w_hh, b_ih, b_hh)

    return out[:A, :fp]


def fold_bn(w, b, gamma, beta, mean, var, eps=1e-6):
    # LinearBn uses BatchNorm1d(eps=1e-06); eval-mode running stats folded into the linear.
    scale = gamma / jnp.sqrt(var + eps)
    return w * scale[None, :], (b - mean) * scale + beta


def init_params(key, bond_dim, fp):
    ks = jax.random.split(key, 18)

    def U(k, shape, fan_in):
        bnd = 1.0 / jnp.sqrt(jnp.float32(fan_in))
        return jax.random.uniform(k, shape, jnp.float32, -bnd, bnd)

    # encoder = LinearBn(bond_dim, fp*fp) (+ ReLU applied in-kernel)
    w_enc = U(ks[0], (bond_dim, fp * fp), bond_dim)
    b_enc = U(ks[1], (fp * fp,), bond_dim)
    g = 1.0 + 0.1 * jax.random.normal(ks[2], (fp * fp,), jnp.float32)
    bt = 0.1 * jax.random.normal(ks[3], (fp * fp,), jnp.float32)
    mu = 0.1 * jax.random.normal(ks[4], (fp * fp,), jnp.float32)
    vr = jnp.abs(1.0 + 0.1 * jax.random.normal(ks[5], (fp * fp,), jnp.float32))
    w_enc, b_enc = fold_bn(w_enc, b_enc, g, bt, mu, vr)

    # align = Linear(2*fp, 1)
    w_align = U(ks[6], (2 * fp, 1), 2 * fp)
    b_align = U(ks[7], (1,), 2 * fp)

    # attend = LinearBn(fp, fp)
    w_att = U(ks[8], (fp, fp), fp)
    b_att = U(ks[9], (fp,), fp)
    g = 1.0 + 0.1 * jax.random.normal(ks[10], (fp,), jnp.float32)
    bt = 0.1 * jax.random.normal(ks[11], (fp,), jnp.float32)
    mu = 0.1 * jax.random.normal(ks[12], (fp,), jnp.float32)
    vr = jnp.abs(1.0 + 0.1 * jax.random.normal(ks[13], (fp,), jnp.float32))
    w_att, b_att = fold_bn(w_att, b_att, g, bt, mu, vr)

    # GRUCell(fp, fp): torch weight_ih/hh are [3*fp, fp]; stored transposed as [fp, 3*fp]
    w_ih = U(ks[14], (fp, 3 * fp), fp)
    w_hh = U(ks[15], (fp, 3 * fp), fp)
    b_ih = U(ks[16], (3 * fp,), fp)
    b_hh = U(ks[17], (3 * fp,), fp)

    return dict(w_enc=w_enc, b_enc=b_enc, w_align=w_align, b_align=b_align,
                w_att=w_att, b_att=b_att, w_ih=w_ih, w_hh=w_hh, b_ih=b_ih, b_hh=b_hh)


if __name__ == "__main__":
    key = jax.random.PRNGKey(0)
    num_atom, num_bond, fp_dim, bond_dim, K = 8, 32, 32, 10, 3

    k_atom, k_bond, k_idx, k_param = jax.random.split(key, 4)
    atom = jax.random.normal(k_atom, (num_atom, fp_dim), jnp.float32)
    bond = jax.random.normal(k_bond, (num_bond, bond_dim), jnp.float32)
    bond_index = jax.random.randint(k_idx, (num_bond, 2), 0, num_atom, dtype=jnp.int32)

    layer_params = [init_params(k, bond_dim, fp_dim) for k in jax.random.split(k_param, K)]

    # Fingerprint_viz.propagate: K graphAttention message-passing steps
    x = atom
    for k in range(K):
        x = graph_attention(x, bond_index, bond, layer_params[k])
    x = jax.block_until_ready(x)

    assert x.shape == (num_atom, fp_dim)
    assert bool(jnp.all(jnp.isfinite(x)))
    print("KERNEL_OK")
</pallas_src>

<mosaic_0001>
module attributes {stable_mosaic.version = 11 : i64} {
  func.func @_graph_attention_kernel(%arg0: i32, %arg1: memref<64xi32, #tpu.memory_space<smem>>, %arg2: memref<16x128xf32, #tpu.memory_space<vmem>>, %arg3: memref<16x128xbf16, #tpu.memory_space<vmem>>, %arg4: memref<128x4096xbf16, #tpu.memory_space<vmem>>, %arg5: memref<1x4096xf32, #tpu.memory_space<vmem>>, %arg6: memref<1x128xf32, #tpu.memory_space<vmem>>, %arg7: memref<1x128xf32, #tpu.memory_space<vmem>>, %arg8: memref<1x1xf32, #tpu.memory_space<vmem>>, %arg9: memref<128x128xbf16, #tpu.memory_space<vmem>>, %arg10: memref<1x128xf32, #tpu.memory_space<vmem>>, %arg11: memref<128x384xf32, #tpu.memory_space<vmem>>, %arg12: memref<128x384xbf16, #tpu.memory_space<vmem>>, %arg13: memref<1x384xf32, #tpu.memory_space<vmem>>, %arg14: memref<1x384xf32, #tpu.memory_space<vmem>>, %arg15: memref<16x128xf32, #tpu.memory_space<vmem>>, %arg16: memref<16x128xf32, #tpu.memory_space<vmem>>, %arg17: memref<16x128xf32, #tpu.memory_space<vmem>>, %arg18: memref<16x16xf32, #tpu.memory_space<vmem>>, %arg19: memref<1x16xf32, #tpu.memory_space<vmem>>, %arg20: memref<1x16xf32, #tpu.memory_space<vmem>>, %arg21: memref<128x16xf32, #tpu.memory_space<vmem>>) attributes {dimension_semantics = [#tpu.dimension_semantics<arbitrary>], iteration_bounds = array<i64: 2>, scalar_prefetch = 1 : i64, scratch_operands = 6 : i64, tpu.core_type = #tpu.core_type<tc>, window_params = [{pipeline_mode = #tpu.pipeline_mode<synchronous>, transform_indices = @transform_0, window_bounds = array<i64: 16, 128>}, {transform_indices = @transform_1, window_bounds = array<i64: 16, 128>}, {pipeline_mode = #tpu.pipeline_mode<synchronous>, transform_indices = @transform_2, window_bounds = array<i64: 128, 4096>}, {pipeline_mode = #tpu.pipeline_mode<synchronous>, transform_indices = @transform_3, window_bounds = array<i64: 1, 4096>}, {pipeline_mode = #tpu.pipeline_mode<synchronous>, transform_indices = @transform_4, window_bounds = array<i64: 1, 128>}, {pipeline_mode = #tpu.pipeline_mode<synchronous>, transform_indices = @transform_5, window_bounds = array<i64: 1, 128>}, {pipeline_mode = #tpu.pipeline_mode<synchronous>, transform_indices = @transform_6, window_bounds = array<i64: 1, 1>}, {pipeline_mode = #tpu.pipeline_mode<synchronous>, transform_indices = @transform_7, window_bounds = array<i64: 128, 128>}, {pipeline_mode = #tpu.pipeline_mode<synchronous>, transform_indices = @transform_8, window_bounds = array<i64: 1, 128>}, {pipeline_mode = #tpu.pipeline_mode<synchronous>, transform_indices = @transform_9, window_bounds = array<i64: 128, 384>}, {pipeline_mode = #tpu.pipeline_mode<synchronous>, transform_indices = @transform_10, window_bounds = array<i64: 128, 384>}, {pipeline_mode = #tpu.pipeline_mode<synchronous>, transform_indices = @transform_11, window_bounds = array<i64: 1, 384>}, {pipeline_mode = #tpu.pipeline_mode<synchronous>, transform_indices = @transform_12, window_bounds = array<i64: 1, 384>}, {pipeline_mode = #tpu.pipeline_mode<synchronous>, transform_indices = @transform_13, window_bounds = array<i64: 16, 128>}]} {
    %c0_i32 = arith.constant 0 : i32
    %0 = arith.cmpi eq, %arg0, %c0_i32 : i32
    %1 = arith.extui %0 : i1 to i32
    %c0_i32_0 = arith.constant 0 : i32
    %2 = arith.cmpi ne, %1, %c0_i32_0 : i32
    scf.if %2 {
      %cst_51 = arith.constant -1.000000e+30 : f32
      %240 = vector.broadcast %cst_51 : f32 to vector<1x16xf32>
      %c0_52 = arith.constant 0 : index
      %c0_53 = arith.constant 0 : index
      %241 = vector.load %arg19[%c0_52, %c0_53] : memref<1x16xf32, #tpu.memory_space<vmem>>, vector<1x16xf32>
      tpu.vector_store %arg19[%c0_52, %c0_53], %240 {strides = array<i32>} : memref<1x16xf32, #tpu.memory_space<vmem>>, vector<1x16xf32>,
      %cst_54 = arith.constant 0.000000e+00 : f32
      %242 = vector.broadcast %cst_54 : f32 to vector<1x16xf32>
      %c0_55 = arith.constant 0 : index
      %c0_56 = arith.constant 0 : index
      %243 = vector.load %arg20[%c0_55, %c0_56] : memref<1x16xf32, #tpu.memory_space<vmem>>, vector<1x16xf32>
      tpu.vector_store %arg20[%c0_55, %c0_56], %242 {strides = array<i32>} : memref<1x16xf32, #tpu.memory_space<vmem>>, vector<1x16xf32>,
      %cst_57 = arith.constant 0.000000e+00 : f32
      %244 = vector.broadcast %cst_57 : f32 to vector<128x16xf32>
      %c0_58 = arith.constant 0 : index
      %c0_59 = arith.constant 0 : index
      %245 = vector.load %arg21[%c0_58, %c0_59] : memref<128x16xf32, #tpu.memory_space<vmem>>, vector<128x16xf32>
      tpu.vector_store %arg21[%c0_58, %c0_59], %244 {strides = array<i32>} : memref<128x16xf32, #tpu.memory_space<vmem>>, vector<128x16xf32>,
    } else {
    }
    %3 = tpu.iota {dimensions = array<i32: 1>} : vector<1x16xi32>
    %c0_i32_1 = arith.constant 0 : i32
    %c16_i32 = arith.constant 16 : i32
    %4 = arith.addi %c0_i32_1, %c16_i32 : i32
    %c1_i32 = arith.constant 1 : i32
    scf.for %arg22 = %c0_i32_1 to %4 step %c1_i32  : i32 {
      %c16_i32_51 = arith.constant 16 : i32
      %240 = arith.muli %arg0, %c16_i32_51 : i32
      %241 = arith.addi %240, %arg22 : i32
      %c2_i32 = arith.constant 2 : i32
      %242 = arith.muli %c2_i32, %241 : i32
      %243 = arith.index_cast %242 : i32 to index
      %244 = memref.load %arg1[%243] : memref<64xi32, #tpu.memory_space<smem>>
      %c2_i32_52 = arith.constant 2 : i32
      %245 = arith.muli %c2_i32_52, %241 : i32
      %c1_i32_53 = arith.constant 1 : i32
      %246 = arith.addi %245, %c1_i32_53 : i32
      %247 = arith.index_cast %246 : i32 to index
      %248 = memref.load %arg1[%247] : memref<64xi32, #tpu.memory_space<smem>>
      %249 = arith.index_cast %244 : i32 to index
      %c0_54 = arith.constant 0 : index
      %250 = vector.load %arg2[%249, %c0_54] : memref<16x128xf32, #tpu.memory_space<vmem>>, vector<1x128xf32>
      %251 = arith.index_cast %arg22 : i32 to index
      %c0_55 = arith.constant 0 : index
      %252 = vector.load %arg16[%251, %c0_55] : memref<16x128xf32, #tpu.memory_space<vmem>>, vector<1x128xf32>
      tpu.vector_store %arg16[%251, %c0_55], %250 {strides = array<i32>} : memref<16x128xf32, #tpu.memory_space<vmem>>, vector<1x128xf32>,
      %253 = arith.index_cast %248 : i32 to index
      %c0_56 = arith.constant 0 : index
      %254 = vector.load %arg2[%253, %c0_56] : memref<16x128xf32, #tpu.memory_space<vmem>>, vector<1x128xf32>
      %255 = arith.index_cast %arg22 : i32 to index
      %c0_57 = arith.constant 0 : index
      %256 = vector.load %arg17[%255, %c0_57] : memref<16x128xf32, #tpu.memory_space<vmem>>, vector<1x128xf32>
      tpu.vector_store %arg17[%255, %c0_57], %254 {strides = array<i32>} : memref<16x128xf32, #tpu.memory_space<vmem>>, vector<1x128xf32>,
      %257 = vector.broadcast %244 : i32 to vector<1x16xi32>
      %258 = arith.cmpi eq, %3, %257 : vector<1x16xi32>
      %259 = arith.extui %258 : vector<1x16xi1> to vector<1x16xi32>
      %260 = arith.sitofp %259 : vector<1x16xi32> to vector<1x16xf32>
      %261 = arith.index_cast %arg22 : i32 to index
      %c0_58 = arith.constant 0 : index
      %262 = vector.load %arg18[%261, %c0_58] : memref<16x16xf32, #tpu.memory_space<vmem>>, vector<1x16xf32>
      tpu.vector_store %arg18[%261, %c0_58], %260 {strides = array<i32>} : memref<16x16xf32, #tpu.memory_space<vmem>>, vector<1x16xf32>,
    }
    %c16_i32_2 = arith.constant 16 : i32
    %c0 = arith.constant 0 : index
    %c0_3 = arith.constant 0 : index
    %5 = vector.load %arg3[%c0, %c0_3] : memref<16x128xbf16, #tpu.memory_space<vmem>>, vector<16x128xbf16>
    %c0_4 = arith.constant 0 : index
    %c0_5 = arith.constant 0 : index
    %6 = vector.load %arg4[%c0_4, %c0_5] : memref<128x4096xbf16, #tpu.memory_space<vmem>>, vector<128x4096xbf16>
    %cst = arith.constant dense<0.000000e+00> : vector<16x4096xf32>
    %7 = tpu.matmul %5, %6, %cst {dimension_numbers = #tpu.dot_dimension_numbers<[1], [0], [0], [1], [0, 0, 1, 1], [], []>} : vector<16x128xbf16>, vector<128x4096xbf16>, vector<16x4096xf32> -> vector<16x4096xf32>
    %c0_6 = arith.constant 0 : index
    %c0_7 = arith.constant 0 : index
    %8 = vector.load %arg5[%c0_6, %c0_7] : memref<1x4096xf32, #tpu.memory_space<vmem>>, vector<1x4096xf32>
    %9 = vector.broadcast %8 : vector<1x4096xf32> to vector<16x4096xf32>
    %10 = arith.addf %7, %9 : vector<16x4096xf32>
    %cst_8 = arith.constant 0.000000e+00 : f32
    %11 = vector.broadcast %cst_8 : f32 to vector<16x4096xf32>
    %12 = arith.maximumf %10, %11 : vector<16x4096xf32>
    %c0_9 = arith.constant 0 : index
    %c0_10 = arith.constant 0 : index
    %13 = vector.load %arg17[%c0_9, %c0_10] : memref<16x128xf32, #tpu.memory_space<vmem>>, vector<16x128xf32>
    %cst_11 = arith.constant 0.000000e+00 : f32
    %14 = vector.broadcast %cst_11 : f32 to vector<16x128xf32>
    %15 = vector.extract_strided_slice %13 {offsets = [0, 0], sizes = [16, 1], strides = [1, 1]} : vector<16x128xf32> to vector<16x1xf32>
    %16 = vector.extract_strided_slice %12 {offsets = [0, 0], sizes = [16, 128], strides = [1, 1]} : vector<16x4096xf32> to vector<16x128xf32>
    %17 = vector.broadcast %15 : vector<16x1xf32> to vector<16x128xf32>
    %18 = arith.mulf %17, %16 : vector<16x128xf32>
    %19 = arith.addf %14, %18 : vector<16x128xf32>
    %20 = vector.extract_strided_slice %13 {offsets = [0, 1], sizes = [16, 1], strides = [1, 1]} : vector<16x128xf32> to vector<16x1xf32>
    %21 = vector.extract_strided_slice %12 {offsets = [0, 128], sizes = [16, 128], strides = [1, 1]} : vector<16x4096xf32> to vector<16x128xf32>
    %22 = vector.broadcast %20 : vector<16x1xf32> to vector<16x128xf32>
    %23 = arith.mulf %22, %21 : vector<16x128xf32>
    %24 = arith.addf %19, %23 : vector<16x128xf32>
    %25 = vector.extract_strided_slice %13 {offsets = [0, 2], sizes = [16, 1], strides = [1, 1]} : vector<16x128xf32> to vector<16x1xf32>
    %26 = vector.extract_strided_slice %12 {offsets = [0, 256], sizes = [16, 128], strides = [1, 1]} : vector<16x4096xf32> to vector<16x128xf32>
    %27 = vector.broadcast %25 : vector<16x1xf32> to vector<16x128xf32>
    %28 = arith.mulf %27, %26 : vector<16x128xf32>
    %29 = arith.addf %24, %28 : vector<16x128xf32>
    %30 = vector.extract_strided_slice %13 {offsets = [0, 3], sizes = [16, 1], strides = [1, 1]} : vector<16x128xf32> to vector<16x1xf32>
    %31 = vector.extract_strided_slice %12 {offsets = [0, 384], sizes = [16, 128], strides = [1, 1]} : vector<16x4096xf32> to vector<16x128xf32>
    %32 = vector.broadcast %30 : vector<16x1xf32> to vector<16x128xf32>
    %33 = arith.mulf %32, %31 : vector<16x128xf32>
    %34 = arith.addf %29, %33 : vector<16x128xf32>
    %35 = vector.extract_strided_slice %13 {offsets = [0, 4], sizes = [16, 1], strides = [1, 1]} : vector<16x128xf32> to vector<16x1xf32>
    %36 = vector.extract_strided_slice %12 {offsets = [0, 512], sizes = [16, 128], strides = [1, 1]} : vector<16x4096xf32> to vector<16x128xf32>
    %37 = vector.broadcast %35 : vector<16x1xf32> to vector<16x128xf32>
    %38 = arith.mulf %37, %36 : vector<16x128xf32>
    %39 = arith.addf %34, %38 : vector<16x128xf32>
    %40 = vector.extract_strided_slice %13 {offsets = [0, 5], sizes = [16, 1], strides = [1, 1]} : vector<16x128xf32> to vector<16x1xf32>
    %41 = vector.extract_strided_slice %12 {offsets = [0, 640], sizes = [16, 128], strides = [1, 1]} : vector<16x4096xf32> to vector<16x128xf32>
    %42 = vector.broadcast %40 : vector<16x1xf32> to vector<16x128xf32>
    %43 = arith.mulf %42, %41 : vector<16x128xf32>
    %44 = arith.addf %39, %43 : vector<16x128xf32>
    %45 = vector.extract_strided_slice %13 {offsets = [0, 6], sizes = [16, 1], strides = [1, 1]} : vector<16x128xf32> to vector<16x1xf32>
    %46 = vector.extract_strided_slice %12 {offsets = [0, 768], sizes = [16, 128], strides = [1, 1]} : vector<16x4096xf32> to vector<16x128xf32>
    %47 = vector.broadcast %45 : vector<16x1xf32> to vector<16x128xf32>
    %48 = arith.mulf %47, %46 : vector<16x128xf32>
    %49 = arith.addf %44, %48 : vector<16x128xf32>
    %50 = vector.extract_strided_slice %13 {offsets = [0, 7], sizes = [16, 1], strides = [1, 1]} : vector<16x128xf32> to vector<16x1xf32>
    %51 = vector.extract_strided_slice %12 {offsets = [0, 896], sizes = [16, 128], strides = [1, 1]} : vector<16x4096xf32> to vector<16x128xf32>
    %52 = vector.broadcast %50 : vector<16x1xf32> to vector<16x128xf32>
    %53 = arith.mulf %52, %51 : vector<16x128xf32>
    %54 = arith.addf %49, %53 : vector<16x128xf32>
    %55 = vector.extract_strided_slice %13 {offsets = [0, 8], sizes = [16, 1], strides = [1, 1]} : vector<16x128xf32> to vector<16x1xf32>
    %56 = vector.extract_strided_slice %12 {offsets = [0, 1024], sizes = [16, 128], strides = [1, 1]} : vector<16x4096xf32> to vector<16x128xf32>
    %57 = vector.broadcast %55 : vector<16x1xf32> to vector<16x128xf32>
    %58 = arith.mulf %57, %56 : vector<16x128xf32>
    %59 = arith.addf %54, %58 : vector<16x128xf32>
    %60 = vector.extract_strided_slice %13 {offsets = [0, 9], sizes = [16, 1], strides = [1, 1]} : vector<16x128xf32> to vector<16x1xf32>
    %61 = vector.extract_strided_slice %12 {offsets = [0, 1152], sizes = [16, 128], strides = [1, 1]} : vector<16x4096xf32> to vector<16x128xf32>
    %62 = vector.broadcast %60 : vector<16x1xf32> to vector<16x128xf32>
    %63 = arith.mulf %62, %61 : vector<16x128xf32>
    %64 = arith.addf %59, %63 : vector<16x128xf32>
    %65 = vector.extract_strided_slice %13 {offsets = [0, 10], sizes = [16, 1], strides = [1, 1]} : vector<16x128xf32> to vector<16x1xf32>
    %66 = vector.extract_strided_slice %12 {offsets = [0, 1280], sizes = [16, 128], strides = [1, 1]} : vector<16x4096xf32> to vector<16x128xf32>
    %67 = vector.broadcast %65 : vector<16x1xf32> to vector<16x128xf32>
    %68 = arith.mulf %67, %66 : vector<16x128xf32>
    %69 = arith.addf %64, %68 : vector<16x128xf32>
    %70 = vector.extract_strided_slice %13 {offsets = [0, 11], sizes = [16, 1], strides = [1, 1]} : vector<16x128xf32> to vector<16x1xf32>
    %71 = vector.extract_strided_slice %12 {offsets = [0, 1408], sizes = [16, 128], strides = [1, 1]} : vector<16x4096xf32> to vector<16x128xf32>
    %72 = vector.broadcast %70 : vector<16x1xf32> to vector<16x128xf32>
    %73 = arith.mulf %72, %71 : vector<16x128xf32>
    %74 = arith.addf %69, %73 : vector<16x128xf32>
    %75 = vector.extract_strided_slice %13 {offsets = [0, 12], sizes = [16, 1], strides = [1, 1]} : vector<16x128xf32> to vector<16x1xf32>
    %76 = vector.extract_strided_slice %12 {offsets = [0, 1536], sizes = [16, 128], strides = [1, 1]} : vector<16x4096xf32> to vector<16x128xf32>
    %77 = vector.broadcast %75 : vector<16x1xf32> to vector<16x128xf32>
    %78 = arith.mulf %77, %76 : vector<16x128xf32>
    %79 = arith.addf %74, %78 : vector<16x128xf32>
    %80 = vector.extract_strided_slice %13 {offsets = [0, 13], sizes = [16, 1], strides = [1, 1]} : vector<16x128xf32> to vector<16x1xf32>
    %81 = vector.extract_strided_slice %12 {offsets = [0, 1664], sizes = [16, 128], strides = [1, 1]} : vector<16x4096xf32> to vector<16x128xf32>
    %82 = vector.broadcast %80 : vector<16x1xf32> to vector<16x128xf32>
    %83 = arith.mulf %82, %81 : vector<16x128xf32>
    %84 = arith.addf %79, %83 : vector<16x128xf32>
    %85 = vector.extract_strided_slice %13 {offsets = [0, 14], sizes = [16, 1], strides = [1, 1]} : vector<16x128xf32> to vector<16x1xf32>
    %86 = vector.extract_strided_slice %12 {offsets = [0, 1792], sizes = [16, 128], strides = [1, 1]} : vector<16x4096xf32> to vector<16x128xf32>
    %87 = vector.broadcast %85 : vector<16x1xf32> to vector<16x128xf32>
    %88 = arith.mulf %87, %86 : vector<16x128xf32>
    %89 = arith.addf %84, %88 : vector<16x128xf32>
    %90 = vector.extract_strided_slice %13 {offsets = [0, 15], sizes = [16, 1], strides = [1, 1]} : vector<16x128xf32> to vector<16x1xf32>
    %91 = vector.extract_strided_slice %12 {offsets = [0, 1920], sizes = [16, 128], strides = [1, 1]} : vector<16x4096xf32> to vector<16x128xf32>
    %92 = vector.broadcast %90 : vector<16x1xf32> to vector<16x128xf32>
    %93 = arith.mulf %92, %91 : vector<16x128xf32>
    %94 = arith.addf %89, %93 : vector<16x128xf32>
    %95 = vector.extract_strided_slice %13 {offsets = [0, 16], sizes = [16, 1], strides = [1, 1]} : vector<16x128xf32> to vector<16x1xf32>
    %96 = vector.extract_strided_slice %12 {offsets = [0, 2048], sizes = [16, 128], strides = [1, 1]} : vector<16x4096xf32> to vector<16x128xf32>
    %97 = vector.broadcast %95 : vector<16x1xf32> to vector<16x128xf32>
    %98 = arith.mulf %97, %96 : vector<16x128xf32>
    %99 = arith.addf %94, %98 : vector<16x128xf32>
    %100 = vector.extract_strided_slice %13 {offsets = [0, 17], sizes = [16, 1], strides = [1, 1]} : vector<16x128xf32> to vector<16x1xf32>
    %101 = vector.extract_strided_slice %12 {offsets = [0, 2176], sizes = [16, 128], strides = [1, 1]} : vector<16x4096xf32> to vector<16x128xf32>
    %102 = vector.broadcast %100 : vector<16x1xf32> to vector<16x128xf32>
    %103 = arith.mulf %102, %101 : vector<16x128xf32>
    %104 = arith.addf %99, %103 : vector<16x128xf32>
    %105 = vector.extract_strided_slice %13 {offsets = [0, 18], sizes = [16, 1], strides = [1, 1]} : vector<16x128xf32> to vector<16x1xf32>
    %106 = vector.extract_strided_slice %12 {offsets = [0, 2304], sizes = [16, 128], strides = [1, 1]} : vector<16x4096xf32> to vector<16x128xf32>
    %107 = vector.broadcast %105 : vector<16x1xf32> to vector<16x128xf32>
    %108 = arith.mulf %107, %106 : vector<16x128xf32>
    %109 = arith.addf %104, %108 : vector<16x128xf32>
    %110 = vector.extract_strided_slice %13 {offsets = [0, 19], sizes = [16, 1], strides = [1, 1]} : vector<16x128xf32> to vector<16x1xf32>
    %111 = vector.extract_strided_slice %12 {offsets = [0, 2432], sizes = [16, 128], strides = [1, 1]} : vector<16x4096xf32> to vector<16x128xf32>
    %112 = vector.broadcast %110 : vector<16x1xf32> to vector<16x128xf32>
    %113 = arith.mulf %112, %111 : vector<16x128xf32>
    %114 = arith.addf %109, %113 : vector<16x128xf32>
    %115 = vector.extract_strided_slice %13 {offsets = [0, 20], sizes = [16, 1], strides = [1, 1]} : vector<16x128xf32> to vector<16x1xf32>
    %116 = vector.extract_strided_slice %12 {offsets = [0, 2560], sizes = [16, 128], strides = [1, 1]} : vector<16x4096xf32> to vector<16x128xf32>
    %117 = vector.broadcast %115 : vector<16x1xf32> to vector<16x128xf32>
    %118 = arith.mulf %117, %116 : vector<16x128xf32>
    %119 = arith.addf %114, %118 : vector<16x128xf32>
    %120 = vector.extract_strided_slice %13 {offsets = [0, 21], sizes = [16, 1], strides = [1, 1]} : vector<16x128xf32> to vector<16x1xf32>
    %121 = vector.extract_strided_slice %12 {offsets = [0, 2688], sizes = [16, 128], strides = [1, 1]} : vector<16x4096xf32> to vector<16x128xf32>
    %122 = vector.broadcast %120 : vector<16x1xf32> to vector<16x128xf32>
    %123 = arith.mulf %122, %121 : vector<16x128xf32>
    %124 = arith.addf %119, %123 : vector<16x128xf32>
    %125 = vector.extract_strided_slice %13 {offsets = [0, 22], sizes = [16, 1], strides = [1, 1]} : vector<16x128xf32> to vector<16x1xf32>
    %126 = vector.extract_strided_slice %12 {offsets = [0, 2816], sizes = [16, 128], strides = [1, 1]} : vector<16x4096xf32> to vector<16x128xf32>
    %127 = vector.broadcast %125 : vector<16x1xf32> to vector<16x128xf32>
    %128 = arith.mulf %127, %126 : vector<16x128xf32>
    %129 = arith.addf %124, %128 : vector<16x128xf32>
    %130 = vector.extract_strided_slice %13 {offsets = [0, 23], sizes = [16, 1], strides = [1, 1]} : vector<16x128xf32> to vector<16x1xf32>
    %131 = vector.extract_strided_slice %12 {offsets = [0, 2944], sizes = [16, 128], strides = [1, 1]} : vector<16x4096xf32> to vector<16x128xf32>
    %132 = vector.broadcast %130 : vector<16x1xf32> to vector<16x128xf32>
    %133 = arith.mulf %132, %131 : vector<16x128xf32>
    %134 = arith.addf %129, %133 : vector<16x128xf32>
    %135 = vector.extract_strided_slice %13 {offsets = [0, 24], sizes = [16, 1], strides = [1, 1]} : vector<16x128xf32> to vector<16x1xf32>
    %136 = vector.extract_strided_slice %12 {offsets = [0, 3072], sizes = [16, 128], strides = [1, 1]} : vector<16x4096xf32> to vector<16x128xf32>
    %137 = vector.broadcast %135 : vector<16x1xf32> to vector<16x128xf32>
    %138 = arith.mulf %137, %136 : vector<16x128xf32>
    %139 = arith.addf %134, %138 : vector<16x128xf32>
    %140 = vector.extract_strided_slice %13 {offsets = [0, 25], sizes = [16, 1], strides = [1, 1]} : vector<16x128xf32> to vector<16x1xf32>
    %141 = vector.extract_strided_slice %12 {offsets = [0, 3200], sizes = [16, 128], strides = [1, 1]} : vector<16x4096xf32> to vector<16x128xf32>
    %142 = vector.broadcast %140 : vector<16x1xf32> to vector<16x128xf32>
    %143 = arith.mulf %142, %141 : vector<16x128xf32>
    %144 = arith.addf %139, %143 : vector<16x128xf32>
    %145 = vector.extract_strided_slice %13 {offsets = [0, 26], sizes = [16, 1], strides = [1, 1]} : vector<16x128xf32> to vector<16x1xf32>
    %146 = vector.extract_strided_slice %12 {offsets = [0, 3328], sizes = [16, 128], strides = [1, 1]} : vector<16x4096xf32> to vector<16x128xf32>
    %147 = vector.broadcast %145 : vector<16x1xf32> to vector<16x128xf32>
    %148 = arith.mulf %147, %146 : vector<16x128xf32>
    %149 = arith.addf %144, %148 : vector<16x128xf32>
    %150 = vector.extract_strided_slice %13 {offsets = [0, 27], sizes = [16, 1], strides = [1, 1]} : vector<16x128xf32> to vector<16x1xf32>
    %151 = vector.extract_strided_slice %12 {offsets = [0, 3456], sizes = [16, 128], strides = [1, 1]} : vector<16x4096xf32> to vector<16x128xf32>
    %152 = vector.broadcast %150 : vector<16x1xf32> to vector<16x128xf32>
    %153 = arith.mulf %152, %151 : vector<16x128xf32>
    %154 = arith.addf %149, %153 : vector<16x128xf32>
    %155 = vector.extract_strided_slice %13 {offsets = [0, 28], sizes = [16, 1], strides = [1, 1]} : vector<16x128xf32> to vector<16x1xf32>
    %156 = vector.extract_strided_slice %12 {offsets = [0, 3584], sizes = [16, 128], strides = [1, 1]} : vector<16x4096xf32> to vector<16x128xf32>
    %157 = vector.broadcast %155 : vector<16x1xf32> to vector<16x128xf32>
    %158 = arith.mulf %157, %156 : vector<16x128xf32>
    %159 = arith.addf %154, %158 : vector<16x128xf32>
    %160 = vector.extract_strided_slice %13 {offsets = [0, 29], sizes = [16, 1], strides = [1, 1]} : vector<16x128xf32> to vector<16x1xf32>
    %161 = vector.extract_strided_slice %12 {offsets = [0, 3712], sizes = [16, 128], strides = [1, 1]} : vector<16x4096xf32> to vector<16x128xf32>
    %162 = vector.broadcast %160 : vector<16x1xf32> to vector<16x128xf32>
    %163 = arith.mulf %162, %161 : vector<16x128xf32>
    %164 = arith.addf %159, %163 : vector<16x128xf32>
    %165 = vector.extract_strided_slice %13 {offsets = [0, 30], sizes = [16, 1], strides = [1, 1]} : vector<16x128xf32> to vector<16x1xf32>
    %166 = vector.extract_strided_slice %12 {offsets = [0, 3840], sizes = [16, 128], strides = [1, 1]} : vector<16x4096xf32> to vector<16x128xf32>
    %167 = vector.broadcast %165 : vector<16x1xf32> to vector<16x128xf32>
    %168 = arith.mulf %167, %166 : vector<16x128xf32>
    %169 = arith.addf %164, %168 : vector<16x128xf32>
    %170 = vector.extract_strided_slice %13 {offsets = [0, 31], sizes = [16, 1], strides = [1, 1]} : vector<16x128xf32> to vector<16x1xf32>
    %171 = vector.extract_strided_slice %12 {offsets = [0, 3968], sizes = [16, 128], strides = [1, 1]} : vector<16x4096xf32> to vector<16x128xf32>
    %172 = vector.broadcast %170 : vector<16x1xf32> to vector<16x128xf32>
    %173 = arith.mulf %172, %171 : vector<16x128xf32>
    %174 = arith.addf %169, %173 : vector<16x128xf32>
    %c0_12 = arith.constant 0 : index
    %c0_13 = arith.constant 0 : index
    %175 = vector.load %arg16[%c0_12, %c0_13] : memref<16x128xf32, #tpu.memory_space<vmem>>, vector<16x128xf32>
    %c0_14 = arith.constant 0 : index
    %c0_15 = arith.constant 0 : index
    %176 = vector.load %arg6[%c0_14, %c0_15] : memref<1x128xf32, #tpu.memory_space<vmem>>, vector<1x128xf32>
    %177 = vector.broadcast %176 : vector<1x128xf32> to vector<16x128xf32>
    %178 = arith.mulf %175, %177 : vector<16x128xf32>
    %cst_16 = arith.constant dense<0.000000e+00> : vector<16xf32>
    %179 = vector.multi_reduction <add>, %178, %cst_16 [1] : vector<16x128xf32> to vector<16xf32>
    %180 = vector.shape_cast %179 : vector<16xf32> to vector<16x1xf32>
    %c0_17 = arith.constant 0 : index
    %c0_18 = arith.constant 0 : index
    %181 = vector.load %arg7[%c0_17, %c0_18] : memref<1x128xf32, #tpu.memory_space<vmem>>, vector<1x128xf32>
    %182 = vector.broadcast %181 : vector<1x128xf32> to vector<16x128xf32>
    %183 = arith.mulf %174, %182 : vector<16x128xf32>
    %cst_19 = arith.constant dense<0.000000e+00> : vector<16xf32>
    %184 = vector.multi_reduction <add>, %183, %cst_19 [1] : vector<16x128xf32> to vector<16xf32>
    %185 = vector.shape_cast %184 : vector<16xf32> to vector<16x1xf32>
    %186 = arith.addf %180, %185 : vector<16x1xf32>
    %c0_20 = arith.constant 0 : index
    %c0_21 = arith.constant 0 : index
    %187 = vector.load %arg8[%c0_20, %c0_21] : memref<1x1xf32, #tpu.memory_space<vmem>>, vector<1x1xf32>
    %188 = vector.broadcast %187 : vector<1x1xf32> to vector<16x1xf32>
    %189 = arith.addf %186, %188 : vector<16x1xf32>
    %cst_22 = arith.constant 0.000000e+00 : f32
    %190 = vector.broadcast %cst_22 : f32 to vector<16x1xf32>
    %191 = arith.cmpf ogt, %189, %190 : vector<16x1xf32>
    %cst_23 = arith.constant 0.00999999977 : f32
    %192 = vector.broadcast %cst_23 : f32 to vector<16x1xf32>
    %193 = arith.mulf %192, %189 : vector<16x1xf32>
    %194 = arith.select %191, %189, %193 : vector<16x1xi1>, vector<16x1xf32>
    %195 = arith.truncf %174 : vector<16x128xf32> to vector<16x128xbf16>
    %c0_24 = arith.constant 0 : index
    %c0_25 = arith.constant 0 : index
    %196 = vector.load %arg9[%c0_24, %c0_25] : memref<128x128xbf16, #tpu.memory_space<vmem>>, vector<128x128xbf16>
    %cst_26 = arith.constant dense<0.000000e+00> : vector<16x128xf32>
    %197 = tpu.matmul %195, %196, %cst_26 {dimension_numbers = #tpu.dot_dimension_numbers<[1], [0], [0], [1], [0, 0, 1, 1], [], []>} : vector<16x128xbf16>, vector<128x128xbf16>, vector<16x128xf32> -> vector<16x128xf32>
    %c0_27 = arith.constant 0 : index
    %c0_28 = arith.constant 0 : index
    %198 = vector.load %arg10[%c0_27, %c0_28] : memref<1x128xf32, #tpu.memory_space<vmem>>, vector<1x128xf32>
    %199 = vector.broadcast %198 : vector<1x128xf32> to vector<16x128xf32>
    %200 = arith.addf %197, %199 : vector<16x128xf32>
    %c0_29 = arith.constant 0 : index
    %c0_30 = arith.constant 0 : index
    %201 = vector.load %arg18[%c0_29, %c0_30] : memref<16x16xf32, #tpu.memory_space<vmem>>, vector<16x16xf32>
    %cst_31 = arith.constant 0.000000e+00 : f32
    %202 = vector.broadcast %cst_31 : f32 to vector<16x16xf32>
    %203 = arith.cmpf ogt, %201, %202 : vector<16x16xf32>
    %cst_32 = arith.constant -1.000000e+30 : f32
    %204 = vector.shape_cast %194 : vector<16x1xf32> to vector<16x1xf32>
    %205 = vector.broadcast %204 : vector<16x1xf32> to vector<16x16xf32>
    %206 = vector.broadcast %cst_32 : f32 to vector<16x16xf32>
    %207 = arith.select %203, %205, %206 : vector<16x16xi1>, vector<16x16xf32>
    %cst_33 = arith.constant dense<0xFF800000> : vector<16xf32>
    %208 = vector.multi_reduction <maximumf>, %207, %cst_33 [0] : vector<16x16xf32> to vector<16xf32>
    %209 = vector.shape_cast %208 : vector<16xf32> to vector<1x16xf32>
    %c0_34 = arith.constant 0 : index
    %c0_35 = arith.constant 0 : index
    %210 = vector.load %arg19[%c0_34, %c0_35] : memref<1x16xf32, #tpu.memory_space<vmem>>, vector<1x16xf32>
    %211 = arith.maximumf %210, %209 : vector<1x16xf32>
    %212 = arith.subf %210, %211 : vector<1x16xf32>
    %213 = math.exp %212 : vector<1x16xf32>
    %214 = vector.broadcast %211 : vector<1x16xf32> to vector<16x16xf32>
    %215 = arith.mulf %201, %214 : vector<16x16xf32>
    %cst_36 = arith.constant dense<0.000000e+00> : vector<16xf32>
    %216 = vector.multi_reduction <add>, %215, %cst_36 [1] : vector<16x16xf32> to vector<16xf32>
    %217 = vector.shape_cast %216 : vector<16xf32> to vector<16x1xf32>
    %218 = arith.subf %194, %217 : vector<16x1xf32>
    %219 = math.exp %218 : vector<16x1xf32>
    %c0_37 = arith.constant 0 : index
    %c0_38 = arith.constant 0 : index
    %220 = vector.load %arg20[%c0_37, %c0_38] : memref<1x16xf32, #tpu.memory_space<vmem>>, vector<1x16xf32>
    %221 = arith.mulf %213, %220 : vector<1x16xf32>
    %222 = vector.broadcast %219 : vector<16x1xf32> to vector<16x16xf32>
    %223 = arith.mulf %201, %222 : vector<16x16xf32>
    %cst_39 = arith.constant dense<0.000000e+00> : vector<16xf32>
    %224 = vector.multi_reduction <add>, %223, %cst_39 [0] : vector<16x16xf32> to vector<16xf32>
    %225 = vector.shape_cast %224 : vector<16xf32> to vector<1x16xf32>
    %226 = arith.addf %221, %225 : vector<1x16xf32>
    %c0_40 = arith.constant 0 : index
    %c0_41 = arith.constant 0 : index
    %227 = vector.load %arg20[%c0_40, %c0_41] : memref<1x16xf32, #tpu.memory_space<vmem>>, vector<1x16xf32>
    tpu.vector_store %arg20[%c0_40, %c0_41], %226 {strides = array<i32>} : memref<1x16xf32, #tpu.memory_space<vmem>>, vector<1x16xf32>,
    %228 = vector.broadcast %219 : vector<16x1xf32> to vector<16x128xf32>
    %229 = arith.mulf %228, %200 : vector<16x128xf32>
    %cst_42 = arith.constant dense<0.000000e+00> : vector<128x16xf32>
    %230 = tpu.matmul %229, %201, %cst_42 {dimension_numbers = #tpu.dot_dimension_numbers<[0], [0], [1], [1], [0, 1, 1, 1], [], []>} : vector<16x128xf32>, vector<16x16xf32>, vector<128x16xf32> -> vector<128x16xf32>
    %c0_43 = arith.constant 0 : index
    %c0_44 = arith.constant 0 : index
    %231 = vector.load %arg21[%c0_43, %c0_44] : memref<128x16xf32, #tpu.memory_space<vmem>>, vector<128x16xf32>
    %232 = vector.broadcast %213 : vector<1x16xf32> to vector<128x16xf32>
    %233 = arith.mulf %232, %231 : vector<128x16xf32>
    %234 = arith.addf %233, %230 : vector<128x16xf32>
    %c0_45 = arith.constant 0 : index
    %c0_46 = arith.constant 0 : index
    %235 = vector.load %arg21[%c0_45, %c0_46] : memref<128x16xf32, #tpu.memory_space<vmem>>, vector<128x16xf32>
    tpu.vector_store %arg21[%c0_45, %c0_46], %234 {strides = array<i32>} : memref<128x16xf32, #tpu.memory_space<vmem>>, vector<128x16xf32>,
    %c0_47 = arith.constant 0 : index
    %c0_48 = arith.constant 0 : index
    %236 = vector.load %arg19[%c0_47, %c0_48] : memref<1x16xf32, #tpu.memory_space<vmem>>, vector<1x16xf32>
    tpu.vector_store %arg19[%c0_47, %c0_48], %211 {strides = array<i32>} : memref<1x16xf32, #tpu.memory_space<vmem>>, vector<1x16xf32>,
    %c1_i32_49 = arith.constant 1 : i32
    %237 = arith.cmpi eq, %arg0, %c1_i32_49 : i32
    %238 = arith.extui %237 : i1 to i32
    %c0_i32_50 = arith.constant 0 : i32
    %239 = arith.cmpi ne, %238, %c0_i32_50 : i32
    scf.if %239 {
      %c0_51 = arith.constant 0 : index
      %c0_52 = arith.constant 0 : index
      %240 = vector.load %arg20[%c0_51, %c0_52] : memref<1x16xf32, #tpu.memory_space<vmem>>, vector<1x16xf32>
      %cst_53 = arith.constant 9.99999993E-9 : f32
      %241 = vector.broadcast %cst_53 : f32 to vector<1x16xf32>
      %242 = arith.addf %240, %241 : vector<1x16xf32>
      %243 = tpu.reciprocal %242 {approx = true} : vector<1x16xf32> -> vector<1x16xf32>
      %c0_54 = arith.constant 0 : index
      %c0_55 = arith.constant 0 : index
      %244 = vector.load %arg21[%c0_54, %c0_55] : memref<128x16xf32, #tpu.memory_space<vmem>>, vector<128x16xf32>
      %245 = vector.broadcast %243 : vector<1x16xf32> to vector<128x16xf32>
      %246 = arith.mulf %244, %245 : vector<128x16xf32>
      %cst_56 = arith.constant 0.000000e+00 : f32
      %247 = vector.broadcast %cst_56 : f32 to vector<128x16xf32>
      %248 = arith.cmpf ogt, %246, %247 : vector<128x16xf32>
      %cst_57 = arith.constant 0.000000e+00 : f32
      %249 = vector.broadcast %cst_57 : f32 to vector<128x16xf32>
      %250 = arith.minimumf %246, %249 : vector<128x16xf32>
      %251 = math.exp %250 : vector<128x16xf32>
      %cst_58 = arith.constant 1.000000e+00 : f32
      %252 = vector.broadcast %cst_58 : f32 to vector<128x16xf32>
      %253 = arith.subf %251, %252 : vector<128x16xf32>
      %254 = arith.select %248, %246, %253 : vector<128x16xi1>, vector<128x16xf32>
      %c0_59 = arith.constant 0 : index
      %c0_60 = arith.constant 0 : index
      %255 = vector.load %arg2[%c0_59, %c0_60] : memref<16x128xf32, #tpu.memory_space<vmem>>, vector<16x128xf32>
      %c0_61 = arith.constant 0 : index
      %c0_62 = arith.constant 0 : index
      %256 = vector.load %arg11[%c0_61, %c0_62] : memref<128x384xf32, #tpu.memory_space<vmem>>, vector<128x384xf32>
      %cst_63 = arith.constant dense<0.000000e+00> : vector<16x384xf32>
      %257 = tpu.matmul %254, %256, %cst_63 {dimension_numbers = #tpu.dot_dimension_numbers<[0], [0], [1], [1], [0, 1, 1, 1], [], []>} : vector<128x16xf32>, vector<128x384xf32>, vector<16x384xf32> -> vector<16x384xf32>
      %c0_64 = arith.constant 0 : index
      %c0_65 = arith.constant 0 : index
      %258 = vector.load %arg13[%c0_64, %c0_65] : memref<1x384xf32, #tpu.memory_space<vmem>>, vector<1x384xf32>
      %259 = vector.broadcast %258 : vector<1x384xf32> to vector<16x384xf32>
      %260 = arith.addf %257, %259 : vector<16x384xf32>
      %261 = arith.truncf %255 : vector<16x128xf32> to vector<16x128xbf16>
      %c0_66 = arith.constant 0 : index
      %c0_67 = arith.constant 0 : index
      %262 = vector.load %arg12[%c0_66, %c0_67] : memref<128x384xbf16, #tpu.memory_space<vmem>>, vector<128x384xbf16>
      %cst_68 = arith.constant dense<0.000000e+00> : vector<16x384xf32>
      %263 = tpu.matmul %261, %262, %cst_68 {dimension_numbers = #tpu.dot_dimension_numbers<[1], [0], [0], [1], [0, 0, 1, 1], [], []>} : vector<16x128xbf16>, vector<128x384xbf16>, vector<16x384xf32> -> vector<16x384xf32>
      %c0_69 = arith.constant 0 : index
      %c0_70 = arith.constant 0 : index
      %264 = vector.load %arg14[%c0_69, %c0_70] : memref<1x384xf32, #tpu.memory_space<vmem>>, vector<1x384xf32>
      %265 = vector.broadcast %264 : vector<1x384xf32> to vector<16x384xf32>
      %266 = arith.addf %263, %265 : vector<16x384xf32>
      %267 = vector.extract_strided_slice %260 {offsets = [0, 0], sizes = [16, 128], strides = [1, 1]} : vector<16x384xf32> to vector<16x128xf32>
      %268 = vector.extract_strided_slice %266 {offsets = [0, 0], sizes = [16, 128], strides = [1, 1]} : vector<16x384xf32> to vector<16x128xf32>
      %269 = arith.addf %267, %268 : vector<16x128xf32>
      %270 = arith.negf %269 : vector<16x128xf32>
      %271 = math.exp %270 : vector<16x128xf32>
      %cst_71 = arith.constant 1.000000e+00 : f32
      %272 = vector.broadcast %cst_71 : f32 to vector<16x128xf32>
      %273 = arith.addf %272, %271 : vector<16x128xf32>
      %274 = arith.divf %272, %273 : vector<16x128xf32>
      %275 = vector.extract_strided_slice %260 {offsets = [0, 128], sizes = [16, 128], strides = [1, 1]} : vector<16x384xf32> to vector<16x128xf32>
      %276 = vector.extract_strided_slice %266 {offsets = [0, 128], sizes = [16, 128], strides = [1, 1]} : vector<16x384xf32> to vector<16x128xf32>
      %277 = arith.addf %275, %276 : vector<16x128xf32>
      %278 = arith.negf %277 : vector<16x128xf32>
      %279 = math.exp %278 : vector<16x128xf32>
      %cst_72 = arith.constant 1.000000e+00 : f32
      %280 = vector.broadcast %cst_72 : f32 to vector<16x128xf32>
      %281 = arith.addf %280, %279 : vector<16x128xf32>
      %282 = arith.divf %280, %281 : vector<16x128xf32>
      %283 = vector.extract_strided_slice %260 {offsets = [0, 256], sizes = [16, 128], strides = [1, 1]} : vector<16x384xf32> to vector<16x128xf32>
      %284 = vector.extract_strided_slice %266 {offsets = [0, 256], sizes = [16, 128], strides = [1, 1]} : vector<16x384xf32> to vector<16x128xf32>
      %285 = arith.mulf %274, %284 : vector<16x128xf32>
      %286 = arith.addf %283, %285 : vector<16x128xf32>
      %287 = math.tanh %286 : vector<16x128xf32>
      %cst_73 = arith.constant 1.000000e+00 : f32
      %288 = vector.broadcast %cst_73 : f32 to vector<16x128xf32>
      %289 = arith.subf %288, %282 : vector<16x128xf32>
      %290 = arith.mulf %289, %287 : vector<16x128xf32>
      %291 = arith.mulf %282, %255 : vector<16x128xf32>
      %292 = arith.addf %290, %291 : vector<16x128xf32>
      %c0_74 = arith.constant 0 : index
      %c0_75 = arith.constant 0 : index
      %293 = vector.load %arg15[%c0_74, %c0_75] : memref<16x128xf32, #tpu.memory_space<vmem>>, vector<16x128xf32>
      tpu.vector_store %arg15[%c0_74, %c0_75], %292 {strides = array<i32>} : memref<16x128xf32, #tpu.memory_space<vmem>>, vector<16x128xf32>,
    } else {
    }
    return
  }
  func.func @transform_0(%arg0: i32, %arg1: memref<64xi32, #tpu.memory_space<smem>>) -> (i32, i32) {
    %c0_i32 = arith.constant 0 : i32
    %c0_i32_0 = arith.constant 0 : i32
    %c0_i32_1 = arith.constant 0 : i32
    return %c0_i32, %c0_i32_0 : i32, i32
  }
  func.func @transform_1(%arg0: i32, %arg1: memref<64xi32, #tpu.memory_space<smem>>) -> (i32, i32) {
    %c0_i32 = arith.constant 0 : i32
    %c0_i32_0 = arith.constant 0 : i32
    return %arg0, %c0_i32 : i32, i32
  }
  func.func @transform_2(%arg0: i32, %arg1: memref<64xi32, #tpu.memory_space<smem>>) -> (i32, i32) {
    %c0_i32 = arith.constant 0 : i32
    %c0_i32_0 = arith.constant 0 : i32
    %c0_i32_1 = arith.constant 0 : i32
    return %c0_i32, %c0_i32_0 : i32, i32
  }
  func.func @transform_3(%arg0: i32, %arg1: memref<64xi32, #tpu.memory_space<smem>>) -> (i32, i32) {
    %c0_i32 = arith.constant 0 : i32
    %c0_i32_0 = arith.constant 0 : i32
    %c0_i32_1 = arith.constant 0 : i32
    return %c0_i32, %c0_i32_0 : i32, i32
  }
  func.func @transform_4(%arg0: i32, %arg1: memref<64xi32, #tpu.memory_space<smem>>) -> (i32, i32) {
    %c0_i32 = arith.constant 0 : i32
    %c0_i32_0 = arith.constant 0 : i32
    %c0_i32_1 = arith.constant 0 : i32
    return %c0_i32, %c0_i32_0 : i32, i32
  }
  func.func @transform_5(%arg0: i32, %arg1: memref<64xi32, #tpu.memory_space<smem>>) -> (i32, i32) {
    %c0_i32 = arith.constant 0 : i32
    %c0_i32_0 = arith.constant 0 : i32
    %c0_i32_1 = arith.constant 0 : i32
    return %c0_i32, %c0_i32_0 : i32, i32
  }
  func.func @transform_6(%arg0: i32, %arg1: memref<64xi32, #tpu.memory_space<smem>>) -> (i32, i32) {
    %c0_i32 = arith.constant 0 : i32
    %c0_i32_0 = arith.constant 0 : i32
    %c0_i32_1 = arith.constant 0 : i32
    return %c0_i32, %c0_i32_0 : i32, i32
  }
  func.func @transform_7(%arg0: i32, %arg1: memref<64xi32, #tpu.memory_space<smem>>) -> (i32, i32) {
    %c0_i32 = arith.constant 0 : i32
    %c0_i32_0 = arith.constant 0 : i32
    %c0_i32_1 = arith.constant 0 : i32
    return %c0_i32, %c0_i32_0 : i32, i32
  }
  func.func @transform_8(%arg0: i32, %arg1: memref<64xi32, #tpu.memory_space<smem>>) -> (i32, i32) {
    %c0_i32 = arith.constant 0 : i32
    %c0_i32_0 = arith.constant 0 : i32
    %c0_i32_1 = arith.constant 0 : i32
    return %c0_i32, %c0_i32_0 : i32, i32
  }
  func.func @transform_9(%arg0: i32, %arg1: memref<64xi32, #tpu.memory_space<smem>>) -> (i32, i32) {
    %c0_i32 = arith.constant 0 : i32
    %c0_i32_0 = arith.constant 0 : i32
    %c0_i32_1 = arith.constant 0 : i32
    return %c0_i32, %c0_i32_0 : i32, i32
  }
  func.func @transform_10(%arg0: i32, %arg1: memref<64xi32, #tpu.memory_space<smem>>) -> (i32, i32) {
    %c0_i32 = arith.constant 0 : i32
    %c0_i32_0 = arith.constant 0 : i32
    %c0_i32_1 = arith.constant 0 : i32
    return %c0_i32, %c0_i32_0 : i32, i32
  }
  func.func @transform_11(%arg0: i32, %arg1: memref<64xi32, #tpu.memory_space<smem>>) -> (i32, i32) {
    %c0_i32 = arith.constant 0 : i32
    %c0_i32_0 = arith.constant 0 : i32
    %c0_i32_1 = arith.constant 0 : i32
    return %c0_i32, %c0_i32_0 : i32, i32
  }
  func.func @transform_12(%arg0: i32, %arg1: memref<64xi32, #tpu.memory_space<smem>>) -> (i32, i32) {
    %c0_i32 = arith.constant 0 : i32
    %c0_i32_0 = arith.constant 0 : i32
    %c0_i32_1 = arith.constant 0 : i32
    return %c0_i32, %c0_i32_0 : i32, i32
  }
  func.func @transform_13(%arg0: i32, %arg1: memref<64xi32, #tpu.memory_space<smem>>) -> (i32, i32) {
    %c0_i32 = arith.constant 0 : i32
    %c0_i32_0 = arith.constant 0 : i32
    %c0_i32_1 = arith.constant 0 : i32
    return %c0_i32, %c0_i32_0 : i32, i32
  }
}

</mosaic_0001>

<bundles_post_ra>
// kernel: graph_attention.1
= control target key start
LH: loop header
LB: loop body
LE: loop exit
PB: predicated region body
PF: predicated region fallthrough
CT: control target
= control target key end

     0   :  { %s5778_s18 = smov [#allocation9]   ;;  %s8330_s0 = inlined_call_operand.vmem [shape: s32[64], index: 0, kind: input, shape index: {}]   ;;  %s8331_s1 = inlined_call_operand.vmem [shape: f32[16,128], index: 1, kind: input, shape index: {}]   ;;  %s8332_s2 = inlined_call_operand.vmem [shape: bf16[32,128], index: 2, kind: input, shape index: {}]   ;;  %s8333_s3 = inlined_call_operand.vmem [shape: bf16[128,4096], index: 3, kind: input, shape index: {}]   ;;  %s8334_s4 = inlined_call_operand.vmem [shape: f32[1,4096], index: 4, kind: input, shape index: {}]   ;;  %s8335_s5 = inlined_call_operand.vmem [shape: f32[1,128], index: 5, kind: input, shape index: {}]   ;;  %s8336_s6 = inlined_call_operand.vmem [shape: f32[1,128], index: 6, kind: input, shape index: {}]   ;;  %s8337_s8 = inlined_call_operand.vmem [shape: bf16[128,128], index: 8, kind: input, shape index: {}]   ;;  %s8338_s9 = inlined_call_operand.vmem [shape: f32[1,128], index: 9, kind: input, shape index: {}]   ;;  %s8339_s10 = inlined_call_operand.vmem [shape: f32[128,384], index: 10, kind: input, shape index: {}]   ;;  %s8340_s11 = inlined_call_operand.vmem [shape: bf16[128,384], index: 11, kind: input, shape index: {}]   ;;  %s8341_s12 = inlined_call_operand.vmem [shape: f32[1,384], index: 12, kind: input, shape index: {}]   ;;  %s8342_s13 = inlined_call_operand.vmem [shape: f32[1,384], index: 13, kind: input, shape index: {}]   ;;  %s8343_s14 = inlined_call_operand.vmem [shape: f32[16,128], index: 14, kind: output, shape index: {}]   ;;  %s8344_s7 = inlined_call_operand.<no memory space> [shape: f32[1,1], index: 7, kind: input, shape index: {}]  }
   0x1   :  { %s20_s15 = sshll.u32 %s8330_s0, 4  ;;  %v24_v0 = vstv %s8344_s7  ;;  %s21_s15 = int_to_ptr.vmem [resolvable:$true] %s20_s15 }
   0x2   :  { %25 = vst [vmem:[#allocation10] sm:$0x1] %v24_v0  ;;  %23 = dma.vmem_to_smem %s21_s15, 16, %s5778_s18, [#allocation8] }
   0x3   :  { %5768 = dma.done.wait [#allocation8], 16 }
   0x4   :  { %5769 = vsyncadd [#allocation8], 4294967280 }
   0x5   :  { %28 = sfence }
   0x6   :  { %s5895_s19 = smov 0  }
   0x7 LB: > { %s5901_s0 = sadd.s32 4294967295, %s5772_s19   ;;  %p4061_p0 = scmp.ge.s32.totalorder %s5772_s19, 1  ;;  %s5772_s19 = sphi %s5895_s19, %s34_s19  }
   0x8   : > { %p394_p1 = scmp.lt.s32.totalorder %s5772_s19, 3 }
   0xa   : > { %p395_p2 = pnand %p4061_p0, %p394_p1 }
   0xb   : > { %s4062_s7 = sshll.u32 (!%p395_p2), %s5901_s0, 1  ;;  %p4064_p4 = scmp.ne.s32.totalorder (!%p395_p2), %s5901_s0, 0 }
   0xc   : > { %398 = sbr.rel (%p395_p2) target bundleno = 1750 (0x6d6), region = 72  ;;  %p434_p3 = scmp.lt.s32.totalorder (!%p395_p2), %s4062_s7, 3 }
  0x11   : > { %s8346_s7 = smov (!%p434_p3, %s4062_s7), 3  ;;  %442 = sbr.rel (%p4064_p4) target bundleno = 41 (0x29), region = 76 }
  0x12   : > { %s4063_s20 = sshll.u32 %s8346_s7, 2 }
  0x13   : > { %s5909_s23 = scalar_lea.vmem %s8332_s2, %s4063_s20 }
  0x16   : > { %vm443_vm0 = vcmask 122880   ;;  %vm446_vm1 = vcmask 130048   ;;  %v5779_v1 = vmov -1e+30   ;;  %v5780_v2 = vmov 0.0  }
  0x17   : > { %444 = vst.msk [vmem:[#allocation5] sm:$0x1] %vm443_vm0, %v5779_v1 }
  0x18   : > { %445 = vst.msk [vmem:[#allocation6] sm:$0x1] %vm443_vm0, %v5780_v2 }
  0x19   : > { %447 = vst.msk [vmem:[#allocation7] sm:$0xff] %vm446_vm1, %v5780_v2 }
  0x1a   : > { %448 = vst.msk [vmem:[#allocation7 + $0x8] sm:$0xff] %vm446_vm1, %v5780_v2 }
  0x1b   : > { %449 = vst.msk [vmem:[#allocation7 + $0x10] sm:$0xff] %vm446_vm1, %v5780_v2 }
  0x1c   : > { %450 = vst.msk [vmem:[#allocation7 + $0x18] sm:$0xff] %vm446_vm1, %v5780_v2 }
  0x1d   : > { %451 = vst.msk [vmem:[#allocation7 + $0x20] sm:$0xff] %vm446_vm1, %v5780_v2 }
  0x1e   : > { %452 = vst.msk [vmem:[#allocation7 + $0x28] sm:$0xff] %vm446_vm1, %v5780_v2 }
  0x1f   : > { %453 = vst.msk [vmem:[#allocation7 + $0x30] sm:$0xff] %vm446_vm1, %v5780_v2 }
  0x20   : > { %454 = vst.msk [vmem:[#allocation7 + $0x38] sm:$0xff] %vm446_vm1, %v5780_v2 }
  0x21   : > { %455 = vst.msk [vmem:[#allocation7 + $0x40] sm:$0xff] %vm446_vm1, %v5780_v2 }
  0x22   : > { %456 = vst.msk [vmem:[#allocation7 + $0x48] sm:$0xff] %vm446_vm1, %v5780_v2 }
  0x23   : > { %457 = vst.msk [vmem:[#allocation7 + $0x50] sm:$0xff] %vm446_vm1, %v5780_v2 }
  0x24   : > { %458 = vst.msk [vmem:[#allocation7 + $0x58] sm:$0xff] %vm446_vm1, %v5780_v2 }
  0x25   : > { %459 = vst.msk [vmem:[#allocation7 + $0x60] sm:$0xff] %vm446_vm1, %v5780_v2 }
  0x26   : > { %460 = vst.msk [vmem:[#allocation7 + $0x68] sm:$0xff] %vm446_vm1, %v5780_v2 }
  0x27   : > { %461 = vst.msk [vmem:[#allocation7 + $0x70] sm:$0xff] %vm446_vm1, %v5780_v2 }
  0x28   : > { %462 = vst.msk [vmem:[#allocation7 + $0x78] sm:$0xff] %vm446_vm1, %v5780_v2 }
  0x29 PF: > { %v463_v3 = vlaneseq  ;;  %s5928_s24 = smov 0  }
  0x2b   : > { %v464_v4 = vand.u32 127, %v463_v3 }
  0x2c LB: >> { %s4065_s25 = sshll.u32 %s5901_s0, 4  ;;  %vm490_vm3 = vcmask 122880   ;;  %s479_s21 = scalar_lea.vmem [#allocation2], %s5776_s24  ;;  %v5781_v8 = vmov 0.0   ;;  %s5776_s24 = sphi %s5928_s24, %s470_s24  }
  0x2d   : >> { %s472_s26 = sadd.s32 %s5776_s24, %s4065_s25  ;;  %s483_s22 = scalar_lea.vmem [#allocation3], %s5776_s24 }
  0x2e   : >> { %s4066_s27 = sshll.u32 %s472_s26, 1  ;;  %s489_s25 = scalar_lea.vmem [#allocation4], %s5776_s24 }
  0x2f   : >> { %s474_s28 = sld [smem:[#allocation9 + %s4066_s27]]  ;;  %s475_s29 = sadd.s32 1, %s4066_s27 }
  0x30   : >> { %s476_s30 = sld [smem:[#allocation9 + %s475_s29]]  ;;  %s470_s24 = sadd.s32 1, %s5776_s24  }
  0x31   : >> { %p467_p5 = scmp.ge.s32.totalorder %s470_s24, 16  }
  0x32   : > { %v4970_v10 = vld [vmem:[%s8333_s3 + $0x700] sm:$0xf] (%p467_p5)  ;;  %v5488_v12 = vld [vmem:[%s8333_s3 + $0x704] sm:$0xf] (%p467_p5)  ;;  %v4978_v15 = vld [vmem:[%s8333_s3 + $0x708] sm:$0xf] (%p467_p5) }
  0x33   : > { %v5504_v11 = vld [vmem:[%s8333_s3 + $0x77c] sm:$0xf0] (%p467_p5)  ;;  %v4972_v14 = vld [vmem:[%s8333_s3 + $0x780] sm:$0xf0] (%p467_p5)  ;;  %v5505_v16 = vld [vmem:[%s8333_s3 + $0x784] sm:$0xf0] (%p467_p5) }
  0x34   : > { %v4971_v13 = vor.u32 (%p467_p5), %v5504_v11, %v4970_v10  ;;  %v4975_v17 = vor.u32 (%p467_p5), %v5488_v12, %v4972_v14  ;;  %v4979_v18 = vor.u32 (%p467_p5), %v5505_v16, %v4978_v15  ;;  %v5489_v19 = vld [vmem:[%s8333_s3 + $0x70c] sm:$0xf] (%p467_p5)  ;;  %v4842_v21 = vld [vmem:[%s8333_s3 + $0x600] sm:$0xf] (%p467_p5)  ;;  %v5456_v24 = vld [vmem:[%s8333_s3 + $0x604] sm:$0xf] (%p467_p5) }
  0x35   : >> { %s477_s17 = scalar_lea.vmem %s8331_s1, %s474_s28  ;;  %v485_v5 = vstv %s474_s28  ;;  %469 = sbr.rel (!%p467_p5) target bundleno = 44 (0x2c), region = 118  ;;  %v4980_v20 = vld [vmem:[%s8333_s3 + $0x788] sm:$0xf0] (%p467_p5)  ;;  %v5472_v23 = vld [vmem:[%s8333_s3 + $0x67c] sm:$0xf0] (%p467_p5)  ;;  %vm3143_vm8 = vcmask (%p467_p5), 130048  }
  0x36   : >> { %v478_v6 = vld [vmem:[%s477_s17] sm:$0x1]  ;;  %s481_s20 = scalar_lea.vmem %s8331_s1, %s476_s30  ;;  %vm486_vm2 = vcmp.eq.s32.totalorder %v464_v4, %v485_v5  ;;  %2108 = vmatpush.bf16.msra.mxu0 (%p467_p5), %v4971_v13  ;;  %v4983_v22 = vor.u32 (%p467_p5), %v5489_v19, %v4980_v20  ;;  %v4844_v25 = vld [vmem:[%s8333_s3 + $0x680] sm:$0xf0] (%p467_p5)  ;;  %2122 = vmatpush.bf16.msra.mxu1 (%p467_p5), %v4975_v17  ;;  %v4843_v26 = vor.u32 (%p467_p5), %v5472_v23, %v4842_v21  ;;  %v4850_v28 = vld [vmem:[%s8333_s3 + $0x608] sm:$0xf] (%p467_p5) }
  0x37   : >> { %480 = vst [vmem:[%s479_s21] sm:$0x1] %v478_v6  ;;  %v482_v7 = vld [vmem:[%s481_s20] sm:$0x1]  ;;  %v4067_v9 = vsel %vm486_vm2, 1.0, %v5781_v8  ;;  %2136 = vmatpush.bf16.msra.mxu2 (%p467_p5), %v4979_v18  ;;  %v4847_v27 = vor.u32 (%p467_p5), %v5456_v24, %v4844_v25  ;;  %v5473_v29 = vld [vmem:[%s8333_s3 + $0x684] sm:$0xf0] (%p467_p5) }
  0x38   : >> { %484 = vst [vmem:[%s483_s22] sm:$0x1] %v482_v7  ;;  %v5457_v30 = vld [vmem:[%s8333_s3 + $0x60c] sm:$0xf] (%p467_p5)  ;;  %2150 = vmatpush.bf16.msra.mxu3 (%p467_p5), %v4983_v22  ;;  %v4851_v31 = vor.u32 (%p467_p5), %v5473_v29, %v4850_v28  ;;  %v4714_v33 = vld [vmem:[%s8333_s3 + $0x500] sm:$0xf] (%p467_p5)  ;;  %p5144_p6 = scmp.ne.s32.totalorder (%p467_p5), %s5901_s0, 1 }
  0x39   : >> { %491 = vst.msk [vmem:[%s489_s25] sm:$0x1] %vm490_vm3, %v4067_v9  ;;  %v4852_v32 = vld [vmem:[%s8333_s3 + $0x688] sm:$0xf0] (%p467_p5)  ;;  %v5440_v34 = vld [vmem:[%s8333_s3 + $0x57c] sm:$0xf0] (%p467_p5) }
  0x3a   : > { %v4855_v35 = vor.u32 %v5457_v30, %v4852_v32  ;;  %v5424_v36 = vld [vmem:[%s8333_s3 + $0x504] sm:$0xf]  ;;  %v4722_v38 = vld [vmem:[%s8333_s3 + $0x508] sm:$0xf]  ;;  %2109 = vmatpush.bf16.msra.mxu0 %v4843_v26  ;;  %v4715_v39 = vor.u32 %v5440_v34, %v4714_v33  ;;  %v5425_v41 = vld [vmem:[%s8333_s3 + $0x50c] sm:$0xf]  ;;  %2123 = vmatpush.bf16.msra.mxu1 %v4847_v27 }
  0x3b   : > { %v4716_v37 = vld [vmem:[%s8333_s3 + $0x580] sm:$0xf0]  ;;  %v5441_v40 = vld [vmem:[%s8333_s3 + $0x584] sm:$0xf0]  ;;  %v4724_v42 = vld [vmem:[%s8333_s3 + $0x588] sm:$0xf0]  ;;  %2137 = vmatpush.bf16.msra.mxu2 %v4851_v31 }
  0x3c   : > { %v4719_v43 = vor.u32 %v5424_v36, %v4716_v37  ;;  %v4723_v44 = vor.u32 %v5441_v40, %v4722_v38  ;;  %v4586_v45 = vld [vmem:[%s8333_s3 + $0x400] sm:$0xf]  ;;  %v5392_v47 = vld [vmem:[%s8333_s3 + $0x404] sm:$0xf]  ;;  %2151 = vmatpush.bf16.msra.mxu3 %v4855_v35  ;;  %v4727_v48 = vor.u32 %v5425_v41, %v4724_v42  ;;  %v4594_v50 = vld [vmem:[%s8333_s3 + $0x408] sm:$0xf] }
  0x3d   : > { %v5408_v46 = vld [vmem:[%s8333_s3 + $0x47c] sm:$0xf0]  ;;  %v4588_v49 = vld [vmem:[%s8333_s3 + $0x480] sm:$0xf0]  ;;  %v5409_v51 = vld [vmem:[%s8333_s3 + $0x484] sm:$0xf0] }
  0x3e   : > { %v5393_v52 = vld [vmem:[%s8333_s3 + $0x40c] sm:$0xf]  ;;  %2110 = vmatpush.bf16.msra.mxu0 %v4715_v39  ;;  %v4587_v54 = vor.u32 %v5408_v46, %v4586_v45  ;;  %2124 = vmatpush.bf16.msra.mxu1 %v4719_v43  ;;  %v4591_v55 = vor.u32 %v5392_v47, %v4588_v49  ;;  %v4595_v56 = vor.u32 %v5409_v51, %v4594_v50  ;;  %v4458_v57 = vld [vmem:[%s8333_s3 + $0x300] sm:$0xf]  ;;  %v5360_v59 = vld [vmem:[%s8333_s3 + $0x304] sm:$0xf] }
  0x3f   : > { %v4596_v53 = vld [vmem:[%s8333_s3 + $0x488] sm:$0xf0]  ;;  %2138 = vmatpush.bf16.msra.mxu2 %v4723_v44  ;;  %v5376_v58 = vld [vmem:[%s8333_s3 + $0x37c] sm:$0xf0]  ;;  %v4460_v61 = vld [vmem:[%s8333_s3 + $0x380] sm:$0xf0] }
  0x40   : > { %2152 = vmatpush.bf16.msra.mxu3 %v4727_v48  ;;  %v4599_v60 = vor.u32 %v5393_v52, %v4596_v53  ;;  %v4466_v62 = vld [vmem:[%s8333_s3 + $0x308] sm:$0xf]  ;;  %v5361_v0 = vld [vmem:[%s8333_s3 + $0x30c] sm:$0xf]  ;;  %v4459_v2 = vor.u32 %v5376_v58, %v4458_v57  ;;  %v4463_v3 = vor.u32 %v5360_v59, %v4460_v61  ;;  %v4330_v5 = vld [vmem:[%s8333_s3 + $0x200] sm:$0xf] }
  0x41   : > { %v5377_v63 = vld [vmem:[%s8333_s3 + $0x384] sm:$0xf0]  ;;  %v4468_v1 = vld [vmem:[%s8333_s3 + $0x388] sm:$0xf0]  ;;  %v5344_v6 = vld [vmem:[%s8333_s3 + $0x27c] sm:$0xf0] }
  0x42   : > { %2111 = vmatpush.bf16.msra.mxu0 %v4587_v54  ;;  %2125 = vmatpush.bf16.msra.mxu1 %v4591_v55  ;;  %v4467_v4 = vor.u32 %v5377_v63, %v4466_v62  ;;  %v5328_v7 = vld [vmem:[%s8333_s3 + $0x204] sm:$0xf]  ;;  %v4471_v8 = vor.u32 %v5361_v0, %v4468_v1  ;;  %v4338_v10 = vld [vmem:[%s8333_s3 + $0x208] sm:$0xf]  ;;  %v5329_v12 = vld [vmem:[%s8333_s3 + $0x20c] sm:$0xf]  ;;  %v4331_v14 = vor.u32 %v5344_v6, %v4330_v5 }
  0x43   : > { %2139 = vmatpush.bf16.msra.mxu2 %v4595_v56  ;;  %v4332_v9 = vld [vmem:[%s8333_s3 + $0x280] sm:$0xf0]  ;;  %v5345_v11 = vld [vmem:[%s8333_s3 + $0x284] sm:$0xf0]  ;;  %v4340_v13 = vld [vmem:[%s8333_s3 + $0x288] sm:$0xf0] }
  0x44   : > { %2153 = vmatpush.bf16.msra.mxu3 %v4599_v60  ;;  %v4335_v15 = vor.u32 %v5328_v7, %v4332_v9  ;;  %v4339_v16 = vor.u32 %v5345_v11, %v4338_v10  ;;  %v4202_v17 = vld [vmem:[%s8333_s3 + $0x100] sm:$0xf]  ;;  %v5296_v19 = vld [vmem:[%s8333_s3 + $0x104] sm:$0xf]  ;;  %v4343_v20 = vor.u32 %v5329_v12, %v4340_v13  ;;  %v4210_v22 = vld [vmem:[%s8333_s3 + $0x108] sm:$0xf] }
  0x45   : > { %v5312_v18 = vld [vmem:[%s8333_s3 + $0x17c] sm:$0xf0]  ;;  %v4204_v21 = vld [vmem:[%s8333_s3 + $0x180] sm:$0xf0]  ;;  %v5313_v23 = vld [vmem:[%s8333_s3 + $0x184] sm:$0xf0] }
  0x46   : > { %2112 = vmatpush.bf16.msra.mxu0 %v4459_v2  ;;  %2126 = vmatpush.bf16.msra.mxu1 %v4463_v3  ;;  %v5297_v24 = vld [vmem:[%s8333_s3 + $0x10c] sm:$0xf]  ;;  %v4074_v26 = vld [vmem:[%s8333_s3] sm:$0xf]  ;;  %v4203_v27 = vor.u32 %v5312_v18, %v4202_v17  ;;  %v5264_v29 = vld [vmem:[%s8333_s3 + $0x4] sm:$0xf]  ;;  %v4207_v31 = vor.u32 %v5296_v19, %v4204_v21  ;;  %v4211_v32 = vor.u32 %v5313_v23, %v4210_v22 }
  0x47   : > { %2140 = vmatpush.bf16.msra.mxu2 %v4467_v4  ;;  %v4212_v25 = vld [vmem:[%s8333_s3 + $0x188] sm:$0xf0]  ;;  %v5280_v28 = vld [vmem:[%s8333_s3 + $0x7c] sm:$0xf0]  ;;  %v4076_v30 = vld [vmem:[%s8333_s3 + $0x80] sm:$0xf0] }
  0x48   : > { %2154 = vmatpush.bf16.msra.mxu3 %v4471_v8  ;;  %v4082_v33 = vld [vmem:[%s8333_s3 + $0x8] sm:$0xf]  ;;  %v4215_v35 = vor.u32 %v5297_v24, %v4212_v25  ;;  %v5265_v36 = vld [vmem:[%s8333_s3 + $0xc] sm:$0xf]  ;;  %v4986_v38 = vld [vmem:[%s8333_s3 + $0x710] sm:$0xf]  ;;  %v4075_v43 = vor.u32 %v5280_v28, %v4074_v26  ;;  %v4079_v47 = vor.u32 %v5264_v29, %v4076_v30 }
  0x49   : > { %v5281_v34 = vld [vmem:[%s8333_s3 + $0x84] sm:$0xf0]  ;;  %v4084_v37 = vld [vmem:[%s8333_s3 + $0x88] sm:$0xf0]  ;;  %v5782_v39 = vmov 1   ;;  %v6151_v46 = vld [vmem:[#allocation3] sm:$0xff] }
  0x4a   : > { %2113 = vmatpush.bf16.msra.mxu0 %v4331_v14  ;;  %2127 = vmatpush.bf16.msra.mxu1 %v4335_v15  ;;  %v5506_v40 = vld [vmem:[%s8333_s3 + $0x78c] sm:$0xf0]  ;;  %v5490_v41 = vld [vmem:[%s8333_s3 + $0x714] sm:$0xf]  ;;  %v4994_v44 = vld [vmem:[%s8333_s3 + $0x718] sm:$0xf]  ;;  %v4083_v48 = vor.u32 %v5281_v34, %v4082_v33  ;;  %v4087_v51 = vor.u32 %v5265_v36, %v4084_v37 }
  0x4b   : > { %2141 = vmatpush.bf16.msra.mxu2 %v4339_v16  ;;  %5615 = vset.pattern.permute.xlu1 %v5782_v39  ;;  %v4988_v42 = vld [vmem:[%s8333_s3 + $0x790] sm:$0xf0]  ;;  %v5507_v45 = vld [vmem:[%s8333_s3 + $0x794] sm:$0xf0]  ;;  %v5491_v49 = vld [vmem:[%s8333_s3 + $0x71c] sm:$0xf]  ;;  %v4987_v52 = vor.u32 %v5506_v40, %v4986_v38 }
  0x4c   : > { %2155 = vmatpush.bf16.msra.mxu3 %v4343_v20  ;;  %v4996_v50 = vld [vmem:[%s8333_s3 + $0x798] sm:$0xf0]  ;;  %v6160_v53 = vld [vmem:[%s5909_s23] sm:$0xff]  ;;  %2637 = vperm.xlu1 %5615, %v6151_v46   ;;  %v4991_v54 = vor.u32 %v5490_v41, %v4988_v42  ;;  %v4995_v55 = vor.u32 %v5507_v45, %v4994_v44  ;;  %v4858_v56 = vld [vmem:[%s8333_s3 + $0x610] sm:$0xf]  ;;  %v5783_v59 = vmov 0  }
  0x4d   : > { %v5474_v57 = vld [vmem:[%s8333_s3 + $0x68c] sm:$0xf0]  ;;  %v5458_v58 = vld [vmem:[%s8333_s3 + $0x614] sm:$0xf]  ;;  %5614 = vset.pattern.permute.xlu0 %v5783_v59  ;;  %v4999_v60 = vor.u32 %v5491_v49, %v4996_v50  ;;  %v4866_v62 = vld [vmem:[%s8333_s3 + $0x618] sm:$0xf] }
  0x4e   : > { %2114 = vmatpush.bf16.msra.mxu0 %v4203_v27  ;;  %2128 = vmatpush.bf16.msra.mxu1 %v4207_v31  ;;  %v4860_v61 = vld [vmem:[%s8333_s3 + $0x690] sm:$0xf0]  ;;  %v5475_v63 = vld [vmem:[%s8333_s3 + $0x694] sm:$0xf0]  ;;  %v5459_v0 = vld [vmem:[%s8333_s3 + $0x61c] sm:$0xf]  ;;  %v4859_v2 = vor.u32 %v5474_v57, %v4858_v56 }
  0x4f   : > { %2142 = vmatpush.bf16.msra.mxu2 %v4211_v32  ;;  %2624 = vperm.xlu0 %5614, %v6151_v46   ;;  %v4868_v1 = vld [vmem:[%s8333_s3 + $0x698] sm:$0xf0]  ;;  %v4863_v3 = vor.u32 %v5458_v58, %v4860_v61  ;;  %v4867_v4 = vor.u32 %v5475_v63, %v4866_v62  ;;  %v4730_v5 = vld [vmem:[%s8333_s3 + $0x510] sm:$0xf]  ;;  %v5426_v7 = vld [vmem:[%s8333_s3 + $0x514] sm:$0xf] }
  0x50   : > { %2156 = vmatpush.bf16.msra.mxu3 %v4215_v35  ;;  %v5442_v6 = vld [vmem:[%s8333_s3 + $0x58c] sm:$0xf0]  ;;  %v4871_v8 = vor.u32 %v5459_v0, %v4868_v1  ;;  %v4732_v9 = vld [vmem:[%s8333_s3 + $0x590] sm:$0xf0]  ;;  %v4738_v10 = vld [vmem:[%s8333_s3 + $0x518] sm:$0xf] }
  0x51   : > { %v5443_v11 = vld [vmem:[%s8333_s3 + $0x594] sm:$0xf0]  ;;  %v5427_v12 = vld [vmem:[%s8333_s3 + $0x51c] sm:$0xf]  ;;  %v4731_v15 = vor.u32 %v5442_v6, %v4730_v5  ;;  %v4735_v16 = vor.u32 %v5426_v7, %v4732_v9  ;;  %v4602_v18 = vld [vmem:[%s8333_s3 + $0x410] sm:$0xf] }
  0x52   : > { %2115 = vmatpush.bf16.msra.mxu0 %v4075_v43  ;;  %2129 = vmatpush.bf16.msra.mxu1 %v4079_v47  ;;  %v4740_v13 = vld [vmem:[%s8333_s3 + $0x598] sm:$0xf0]  ;;  %v4739_v17 = vor.u32 %v5443_v11, %v4738_v10  ;;  %v5410_v19 = vld [vmem:[%s8333_s3 + $0x48c] sm:$0xf0]  ;;  %v5394_v20 = vld [vmem:[%s8333_s3 + $0x414] sm:$0xf] }
  0x53   : > { %2143 = vmatpush.bf16.msra.mxu2 %v4083_v48  ;;  %v6216_v14 = vld [vmem:[#allocation3 + $0x8] sm:$0xff]  ;;  %v4743_v21 = vor.u32 %v5427_v12, %v4740_v13  ;;  %v4604_v22 = vld [vmem:[%s8333_s3 + $0x490] sm:$0xf0]  ;;  %v4603_v27 = vor.u32 %v5410_v19, %v4602_v18  ;;  %v4474_v30 = vld [vmem:[%s8333_s3 + $0x310] sm:$0xf]  ;;  %v5784_v50 = vmov 3  }
  0x54   : > { %2157 = vmatpush.bf16.msra.mxu3 %v4087_v51  ;;  %v4610_v23 = vld [vmem:[%s8333_s3 + $0x418] sm:$0xf]  ;;  %2641 = vperm.xlu1 %5615, %v6216_v14   ;;  %v5395_v25 = vld [vmem:[%s8333_s3 + $0x41c] sm:$0xf]  ;;  %v4607_v28 = vor.u32 %v5394_v20, %v4604_v22  ;;  %v5378_v31 = vld [vmem:[%s8333_s3 + $0x38c] sm:$0xf0] }
  0x55   : > { %2116 = vmatmul.bf16.vlgmr.msra.gmra.mxu0 %v6160_v53  ;;  %2130 = vmatmul.bf16.vlgmr.msra.gmra.mxu1 %v6160_v53  ;;  %v5411_v24 = vld [vmem:[%s8333_s3 + $0x494] sm:$0xf0]  ;;  %v4612_v26 = vld [vmem:[%s8333_s3 + $0x498] sm:$0xf0]  ;;  %v5362_v32 = vld [vmem:[%s8333_s3 + $0x314] sm:$0xf]  ;;  %v4475_v39 = vor.u32 %v5378_v31, %v4474_v30 }
  0x56   : > { %2164 = vmatpush.bf16.msrb.mxu0 %v4987_v52  ;;  %2178 = vmatpush.bf16.msrb.mxu1 %v4991_v54  ;;  %v4611_v29 = vor.u32 %v5411_v24, %v4610_v23  ;;  %v4615_v33 = vor.u32 %v5395_v25, %v4612_v26  ;;  %v4476_v34 = vld [vmem:[%s8333_s3 + $0x390] sm:$0xf0]  ;;  %v4482_v35 = vld [vmem:[%s8333_s3 + $0x318] sm:$0xf]  ;;  %v5363_v37 = vld [vmem:[%s8333_s3 + $0x31c] sm:$0xf] }
  0x57   : > { %2192 = vmatpush.bf16.msrb.mxu2 %v4995_v55  ;;  %2158 = vmatmul.bf16.vlgmr.msra.gmra.mxu3 %v6160_v53  ;;  %v5379_v36 = vld [vmem:[%s8333_s3 + $0x394] sm:$0xf0]  ;;  %v4484_v38 = vld [vmem:[%s8333_s3 + $0x398] sm:$0xf0]  ;;  %v4479_v40 = vor.u32 %v5362_v32, %v4476_v34  ;;  %v4346_v42 = vld [vmem:[%s8333_s3 + $0x210] sm:$0xf] }
  0x58   : > { %2206 = vmatpush.bf16.msrb.mxu3 %v4999_v60  ;;  %2144 = vmatmul.bf16.vlgmr.msra.gmra.mxu2 %v6160_v53  ;;  %v4483_v41 = vor.u32 %v5379_v36, %v4482_v35  ;;  %v5346_v43 = vld [vmem:[%s8333_s3 + $0x28c] sm:$0xf0]  ;;  %v5330_v44 = vld [vmem:[%s8333_s3 + $0x214] sm:$0xf]  ;;  %v4487_v45 = vor.u32 %v5363_v37, %v4484_v38  ;;  %v4354_v48 = vld [vmem:[%s8333_s3 + $0x218] sm:$0xf] }
  0x59   : > { %2629 = vperm.xlu0 %5614, %v6216_v14   ;;  %v4348_v47 = vld [vmem:[%s8333_s3 + $0x290] sm:$0xf0]  ;;  %v5347_v49 = vld [vmem:[%s8333_s3 + $0x294] sm:$0xf0]  ;;  %v5331_v51 = vld [vmem:[%s8333_s3 + $0x21c] sm:$0xf]  ;;  %v4347_v54 = vor.u32 %v5346_v43, %v4346_v42 }
  0x5a   : > { %2165 = vmatpush.bf16.msrb.mxu0 %v4859_v2  ;;  %2179 = vmatpush.bf16.msrb.mxu1 %v4863_v3  ;;  %v4356_v52 = vld [vmem:[%s8333_s3 + $0x298] sm:$0xf0]  ;;  %v4351_v55 = vor.u32 %v5330_v44, %v4348_v47  ;;  %v4355_v56 = vor.u32 %v5347_v49, %v4354_v48  ;;  %v4218_v57 = vld [vmem:[%s8333_s3 + $0x110] sm:$0xf]  ;;  %v5298_v60 = vld [vmem:[%s8333_s3 + $0x114] sm:$0xf] }
  0x5b   : > { %2193 = vmatpush.bf16.msrb.mxu2 %v4867_v4  ;;  %v5314_v58 = vld [vmem:[%s8333_s3 + $0x18c] sm:$0xf0]  ;;  %v4359_v61 = vor.u32 %v5331_v51, %v4356_v52  ;;  %v4220_v62 = vld [vmem:[%s8333_s3 + $0x190] sm:$0xf0]  ;;  %v4226_v63 = vld [vmem:[%s8333_s3 + $0x118] sm:$0xf] }
  0x5c   : > { %2207 = vmatpush.bf16.msrb.mxu3 %v4871_v8  ;;  %5618 = vset.pattern.permute.xlu1 %v5784_v50  ;;  %v5315_v0 = vld [vmem:[%s8333_s3 + $0x194] sm:$0xf0]  ;;  %v5785_v1 = vmov 2   ;;  %v5299_v2 = vld [vmem:[%s8333_s3 + $0x11c] sm:$0xf]  ;;  %v4219_v4 = vor.u32 %v5314_v58, %v4218_v57  ;;  %v4223_v7 = vor.u32 %v5298_v60, %v4220_v62  ;;  %v5786_v20 = vmov 4  }
  0x5d   : > { %2665 = vperm.xlu1 %5618, %v6216_v14   ;;  %5616 = vset.pattern.permute.xlu2 %v5785_v1  ;;  %v4228_v3 = vld [vmem:[%s8333_s3 + $0x198] sm:$0xf0]  ;;  %v4090_v5 = vld [vmem:[%s8333_s3 + $0x10] sm:$0xf]  ;;  %v4227_v8 = vor.u32 %v5315_v0, %v4226_v63  ;;  %v5266_v9 = vld [vmem:[%s8333_s3 + $0x14] sm:$0xf] }
  0x5e   : > { %2166 = vmatpush.bf16.msrb.mxu0 %v4731_v15  ;;  %2180 = vmatpush.bf16.msrb.mxu1 %v4735_v16  ;;  %v5282_v6 = vld [vmem:[%s8333_s3 + $0x8c] sm:$0xf0]  ;;  %v4092_v10 = vld [vmem:[%s8333_s3 + $0x90] sm:$0xf0]  ;;  %v4098_v11 = vld [vmem:[%s8333_s3 + $0x18] sm:$0xf]  ;;  %v4231_v12 = vor.u32 %v5299_v2, %v4228_v3 }
  0x5f   : > { %2194 = vmatpush.bf16.msrb.mxu2 %v4739_v17  ;;  %2649 = vperm.xlu2 %5616, %v6151_v46   ;;  %v5283_v13 = vld [vmem:[%s8333_s3 + $0x94] sm:$0xf0]  ;;  %v5267_v15 = vld [vmem:[%s8333_s3 + $0x1c] sm:$0xf]  ;;  %v5002_v17 = vld [vmem:[%s8333_s3 + $0x720] sm:$0xf]  ;;  %v4095_v25 = vor.u32 %v5266_v9, %v4092_v10 }
  0x60   : > { %2208 = vmatpush.bf16.msrb.mxu3 %v4743_v21  ;;  %v4100_v16 = vld [vmem:[%s8333_s3 + $0x98] sm:$0xf0]  ;;  %v5508_v18 = vld [vmem:[%s8333_s3 + $0x79c] sm:$0xf0]  ;;  %v5492_v19 = vld [vmem:[%s8333_s3 + $0x724] sm:$0xf]  ;;  %v4091_v21 = vor.u32 %v5282_v6, %v4090_v5  ;;  %v4099_v26 = vor.u32 %v5283_v13, %v4098_v11 }
  0x61   : > { %5617 = vset.pattern.permute.xlu0 %v5784_v50  ;;  %v5004_v22 = vld [vmem:[%s8333_s3 + $0x7a0] sm:$0xf0]  ;;  %v5010_v23 = vld [vmem:[%s8333_s3 + $0x728] sm:$0xf]  ;;  %v5003_v30 = vor.u32 %v5508_v18, %v5002_v17  ;;  %v5476_v34 = vld [vmem:[%s8333_s3 + $0x69c] sm:$0xf0] }
  0x62   : > { %2167 = vmatpush.bf16.msrb.mxu0 %v4603_v27  ;;  %2181 = vmatpush.bf16.msrb.mxu1 %v4607_v28  ;;  %v5509_v24 = vld [vmem:[%s8333_s3 + $0x7a4] sm:$0xf0]  ;;  %v5493_v27 = vld [vmem:[%s8333_s3 + $0x72c] sm:$0xf]  ;;  %v5007_v31 = vor.u32 %v5492_v19, %v5004_v22  ;;  %v5460_v35 = vld [vmem:[%s8333_s3 + $0x624] sm:$0xf] }
  0x63   : > { %2195 = vmatpush.bf16.msrb.mxu2 %v4611_v29  ;;  %2661 = vperm.xlu0 %5617, %v6151_v46   ;;  %v5012_v28 = vld [vmem:[%s8333_s3 + $0x7a8] sm:$0xf0]  ;;  %v4103_v29 = vor.u32 %v5267_v15, %v4100_v16  ;;  %v5011_v32 = vor.u32 %v5509_v24, %v5010_v23  ;;  %v4876_v37 = vld [vmem:[%s8333_s3 + $0x6a0] sm:$0xf0]  ;;  %v4882_v38 = vld [vmem:[%s8333_s3 + $0x628] sm:$0xf] }
  0x64   : > { %2209 = vmatpush.bf16.msrb.mxu3 %v4615_v33  ;;  %v4874_v33 = vld [vmem:[%s8333_s3 + $0x620] sm:$0xf]  ;;  %v5015_v36 = vor.u32 %v5493_v27, %v5012_v28  ;;  %v4879_v43 = vor.u32 %v5460_v35, %v4876_v37  ;;  %v5428_v48 = vld [vmem:[%s8333_s3 + $0x524] sm:$0xf]  ;;  %v4754_v51 = vld [vmem:[%s8333_s3 + $0x528] sm:$0xf] }
  0x65   : > { %5620 = vset.pattern.permute.xlu1 %v5786_v20  ;;  %v4875_v42 = vor.u32 %v5476_v34, %v4874_v33  ;;  %v5444_v47 = vld [vmem:[%s8333_s3 + $0x59c] sm:$0xf0]  ;;  %v4748_v50 = vld [vmem:[%s8333_s3 + $0x5a0] sm:$0xf0]  ;;  %v5445_v52 = vld [vmem:[%s8333_s3 + $0x5a4] sm:$0xf0] }
  0x66   : > { %2168 = vmatpush.bf16.msrb.mxu0 %v4475_v39  ;;  %2182 = vmatpush.bf16.msrb.mxu1 %v4479_v40  ;;  %v5477_v39 = vld [vmem:[%s8333_s3 + $0x6a4] sm:$0xf0]  ;;  %v5461_v40 = vld [vmem:[%s8333_s3 + $0x62c] sm:$0xf]  ;;  %v4751_v57 = vor.u32 %v5428_v48, %v4748_v50  ;;  %v4755_v58 = vor.u32 %v5445_v52, %v4754_v51  ;;  %v4618_v60 = vld [vmem:[%s8333_s3 + $0x420] sm:$0xf] }
  0x67   : > { %2196 = vmatpush.bf16.msrb.mxu2 %v4483_v41  ;;  %2677 = vperm.xlu1 %5620, %v6216_v14   ;;  %v4884_v41 = vld [vmem:[%s8333_s3 + $0x6a8] sm:$0xf0]  ;;  %v4883_v44 = vor.u32 %v5477_v39, %v4882_v38  ;;  %v5396_v62 = vld [vmem:[%s8333_s3 + $0x424] sm:$0xf]  ;;  %v4626_v1 = vld [vmem:[%s8333_s3 + $0x428] sm:$0xf] }
  0x68   : > { %2210 = vmatpush.bf16.msrb.mxu3 %v4487_v45  ;;  %2653 = vperm.xlu2 %5616, %v6216_v14   ;;  %v4746_v45 = vld [vmem:[%s8333_s3 + $0x520] sm:$0xf]  ;;  %v4887_v49 = vor.u32 %v5461_v40, %v4884_v41  ;;  %v4620_v0 = vld [vmem:[%s8333_s3 + $0x4a0] sm:$0xf0]  ;;  %v5413_v2 = vld [vmem:[%s8333_s3 + $0x4a4] sm:$0xf0] }
  0x69   : > { %v5787_v3 = vmov 6   ;;  %v4628_v5 = vld [vmem:[%s8333_s3 + $0x4a8] sm:$0xf0]  ;;  %v4490_v9 = vld [vmem:[%s8333_s3 + $0x320] sm:$0xf]  ;;  %v5788_v17 = vmov 5  }
  0x6a   : > { %2169 = vmatpush.bf16.msrb.mxu0 %v4347_v54  ;;  %2183 = vmatpush.bf16.msrb.mxu1 %v4351_v55  ;;  %v5429_v54 = vld [vmem:[%s8333_s3 + $0x52c] sm:$0xf]  ;;  %v5380_v10 = vld [vmem:[%s8333_s3 + $0x39c] sm:$0xf0]  ;;  %v5364_v11 = vld [vmem:[%s8333_s3 + $0x324] sm:$0xf] }
  0x6b   : > { %2197 = vmatpush.bf16.msrb.mxu2 %v4355_v56  ;;  %v4756_v55 = vld [vmem:[%s8333_s3 + $0x5a8] sm:$0xf0]  ;;  %v4747_v56 = vor.u32 %v5444_v47, %v4746_v45  ;;  %v4492_v13 = vld [vmem:[%s8333_s3 + $0x3a0] sm:$0xf0]  ;;  %v4498_v15 = vld [vmem:[%s8333_s3 + $0x328] sm:$0xf]  ;;  %5622 = vset.pattern.permute.xlu0 %v5788_v17 }
  0x6c   : > { %2211 = vmatpush.bf16.msrb.mxu3 %v4359_v61  ;;  %v5412_v61 = vld [vmem:[%s8333_s3 + $0x49c] sm:$0xf0]  ;;  %v4759_v63 = vor.u32 %v5429_v54, %v4756_v55  ;;  %v5381_v16 = vld [vmem:[%s8333_s3 + $0x3a4] sm:$0xf0]  ;;  %v5365_v18 = vld [vmem:[%s8333_s3 + $0x32c] sm:$0xf]  ;;  %2689 = vperm.xlu0 %5622, %v6216_v14  }
  0x6d   : > { %v4619_v6 = vor.u32 %v5412_v61, %v4618_v60  ;;  %v4500_v19 = vld [vmem:[%s8333_s3 + $0x3a8] sm:$0xf0]  ;;  %v4499_v22 = vor.u32 %v5381_v16, %v4498_v15  ;;  %v4362_v23 = vld [vmem:[%s8333_s3 + $0x220] sm:$0xf]  ;;  %v4364_v27 = vld [vmem:[%s8333_s3 + $0x2a0] sm:$0xf0] }
  0x6e   : > { %2170 = vmatpush.bf16.msrb.mxu0 %v4219_v4  ;;  %2184 = vmatpush.bf16.msrb.mxu1 %v4223_v7  ;;  %v5397_v4 = vld [vmem:[%s8333_s3 + $0x42c] sm:$0xf]  ;;  %v4623_v7 = vor.u32 %v5396_v62, %v4620_v0  ;;  %v5348_v24 = vld [vmem:[%s8333_s3 + $0x29c] sm:$0xf0]  ;;  %v4370_v28 = vld [vmem:[%s8333_s3 + $0x228] sm:$0xf] }
  0x6f   : > { %2198 = vmatpush.bf16.msrb.mxu2 %v4227_v8  ;;  %5623 = vset.pattern.permute.xlu1 %v5787_v3  ;;  %v4627_v8 = vor.u32 %v5413_v2, %v4626_v1  ;;  %v4363_v33 = vor.u32 %v5348_v24, %v4362_v23  ;;  %v4234_v34 = vld [vmem:[%s8333_s3 + $0x120] sm:$0xf]  ;;  %v4236_v39 = vld [vmem:[%s8333_s3 + $0x1a0] sm:$0xf0]  ;;  %v4242_v40 = vld [vmem:[%s8333_s3 + $0x128] sm:$0xf] }
  0x70   : > { %2212 = vmatpush.bf16.msrb.mxu3 %v4231_v12  ;;  %2697 = vperm.xlu1 %5623, %v6151_v46   ;;  %v4631_v12 = vor.u32 %v5397_v4, %v4628_v5  ;;  %v5316_v35 = vld [vmem:[%s8333_s3 + $0x19c] sm:$0xf0]  ;;  %v5317_v41 = vld [vmem:[%s8333_s3 + $0x1a4] sm:$0xf0]  ;;  %v5790_v48 = vmov 8  }
  0x71   : > { %5619 = vset.pattern.permute.xlu2 %v5786_v20  ;;  %v4491_v20 = vor.u32 %v5380_v10, %v4490_v9  ;;  %v4106_v45 = vld [vmem:[%s8333_s3 + $0x20] sm:$0xf]  ;;  %v5268_v50 = vld [vmem:[%s8333_s3 + $0x24] sm:$0xf]  ;;  %v4114_v52 = vld [vmem:[%s8333_s3 + $0x28] sm:$0xf]  ;;  %v4243_v55 = vor.u32 %v5317_v41, %v4242_v40 }
  0x72   : > { %2171 = vmatpush.bf16.msrb.mxu0 %v4091_v21  ;;  %2185 = vmatpush.bf16.msrb.mxu1 %v4095_v25  ;;  %v4495_v21 = vor.u32 %v5364_v11, %v4492_v13  ;;  %v5332_v25 = vld [vmem:[%s8333_s3 + $0x224] sm:$0xf]  ;;  %v5284_v47 = vld [vmem:[%s8333_s3 + $0x9c] sm:$0xf0]  ;;  %v5018_v61 = vld [vmem:[%s8333_s3 + $0x730] sm:$0xf] }
  0x73   : > { %2199 = vmatpush.bf16.msrb.mxu2 %v4099_v26  ;;  %2673 = vperm.xlu2 %5619, %v6151_v46   ;;  %v4503_v26 = vor.u32 %v5365_v18, %v4500_v19  ;;  %v4367_v37 = vor.u32 %v5332_v25, %v4364_v27  ;;  %v4108_v51 = vld [vmem:[%s8333_s3 + $0xa0] sm:$0xf0]  ;;  %v5510_v62 = vld [vmem:[%s8333_s3 + $0x7ac] sm:$0xf0]  ;;  %v4107_v0 = vor.u32 %v5284_v47, %v4106_v45  ;;  %v5020_v1 = vld [vmem:[%s8333_s3 + $0x7b0] sm:$0xf0] }
  0x74   : > { %2213 = vmatpush.bf16.msrb.mxu3 %v4103_v29  ;;  %v5349_v29 = vld [vmem:[%s8333_s3 + $0x2a4] sm:$0xf0]  ;;  %5627 = vset.pattern.permute.xlu0 %v5790_v48  ;;  %v5026_v2 = vld [vmem:[%s8333_s3 + $0x738] sm:$0xf]  ;;  %v4111_v5 = vor.u32 %v5268_v50, %v4108_v51  ;;  %v5019_v10 = vor.u32 %v5510_v62, %v5018_v61  ;;  %v4890_v13 = vld [vmem:[%s8333_s3 + $0x630] sm:$0xf] }
  0x75   : > { %2172 = vmatmul.bf16.vlgmr.msrb.gmra.mxu0 %v6160_v53  ;;  %2186 = vmatmul.bf16.vlgmr.msrb.gmra.mxu1 %v6160_v53  ;;  %v4371_v38 = vor.u32 %v5349_v29, %v4370_v28  ;;  %v5511_v4 = vld [vmem:[%s8333_s3 + $0x7b4] sm:$0xf0]  ;;  %v5478_v15 = vld [vmem:[%s8333_s3 + $0x6ac] sm:$0xf0]  ;;  %v5462_v16 = vld [vmem:[%s8333_s3 + $0x634] sm:$0xf] }
  0x76   : > { %2220 = vmatpush.bf16.msra.mxu0 %v5003_v30  ;;  %2234 = vmatpush.bf16.msra.mxu1 %v5007_v31  ;;  %v5333_v30 = vld [vmem:[%s8333_s3 + $0x22c] sm:$0xf]  ;;  %v4892_v18 = vld [vmem:[%s8333_s3 + $0x6b0] sm:$0xf0]  ;;  %v4898_v19 = vld [vmem:[%s8333_s3 + $0x638] sm:$0xf] }
  0x77   : > { %2248 = vmatpush.bf16.msra.mxu2 %v5011_v32  ;;  %2214 = vmatmul.bf16.vlgmr.msrb.gmra.mxu3 %v6160_v53  ;;  %v4372_v31 = vld [vmem:[%s8333_s3 + $0x2a8] sm:$0xf0]  ;;  %v5789_v32 = vmov 7   ;;  %v4895_v23 = vor.u32 %v5462_v16, %v4892_v18  ;;  %v4762_v25 = vld [vmem:[%s8333_s3 + $0x530] sm:$0xf]  ;;  %v5791_v45 = vmov 9  }
  0x78   : > { %2262 = vmatpush.bf16.msra.mxu3 %v5015_v36  ;;  %2200 = vmatmul.bf16.vlgmr.msrb.gmra.mxu2 %v6160_v53  ;;  %v5300_v36 = vld [vmem:[%s8333_s3 + $0x124] sm:$0xf]  ;;  %v5430_v27 = vld [vmem:[%s8333_s3 + $0x534] sm:$0xf]  ;;  %v5399_v47 = vld [vmem:[%s8333_s3 + $0x43c] sm:$0xf] }
  0x79   : > { %5625 = vset.pattern.permute.xlu1 %v5789_v32  ;;  %2721 = vperm.xlu0 %5627, %v6151_v46   ;;  %v4239_v54 = vor.u32 %v5300_v36, %v4236_v39  ;;  %v4764_v29 = vld [vmem:[%s8333_s3 + $0x5b0] sm:$0xf0]  ;;  %v5414_v39 = vld [vmem:[%s8333_s3 + $0x4ac] sm:$0xf0]  ;;  %v5367_v61 = vld [vmem:[%s8333_s3 + $0x33c] sm:$0xf] }
  0x7a   : > { %2221 = vmatpush.bf16.msra.mxu0 %v4875_v42  ;;  %2235 = vmatpush.bf16.msra.mxu1 %v4879_v43  ;;  %v4375_v42 = vor.u32 %v5333_v30, %v4372_v31  ;;  %v5301_v43 = vld [vmem:[%s8333_s3 + $0x12c] sm:$0xf]  ;;  %v4770_v30 = vld [vmem:[%s8333_s3 + $0x538] sm:$0xf]  ;;  %v4767_v36 = vor.u32 %v5430_v27, %v4764_v29  ;;  %v5398_v40 = vld [vmem:[%s8333_s3 + $0x434] sm:$0xf] }
  0x7b   : > { %2249 = vmatpush.bf16.msra.mxu2 %v4883_v44  ;;  %2709 = vperm.xlu1 %5625, %v6151_v46   ;;  %v4244_v44 = vld [vmem:[%s8333_s3 + $0x1a8] sm:$0xf0]  ;;  %v5447_v31 = vld [vmem:[%s8333_s3 + $0x5b4] sm:$0xf0]  ;;  %v4516_v62 = vld [vmem:[%s8333_s3 + $0x3b8] sm:$0xf0] }
  0x7c   : > { %2263 = vmatpush.bf16.msra.mxu3 %v4887_v49  ;;  %5621 = vset.pattern.permute.xlu2 %v5788_v17  ;;  %v4235_v49 = vor.u32 %v5316_v35, %v4234_v34  ;;  %v4247_v60 = vor.u32 %v5301_v43, %v4244_v44  ;;  %v4772_v34 = vld [vmem:[%s8333_s3 + $0x5b8] sm:$0xf0]  ;;  %v4642_v43 = vld [vmem:[%s8333_s3 + $0x438] sm:$0xf]  ;;  %v5318_v18 = vld [vmem:[%s8333_s3 + $0x1ac] sm:$0xf0] }
  0x7d   : > { %2685 = vperm.xlu2 %5621, %v6151_v46   ;;  %v5415_v44 = vld [vmem:[%s8333_s3 + $0x4b4] sm:$0xf0]  ;;  %v4122_v27 = vld [vmem:[%s8333_s3 + $0x30] sm:$0xf]  ;;  %v5270_v29 = vld [vmem:[%s8333_s3 + $0x34] sm:$0xf] }
  0x7e   : > { %2222 = vmatpush.bf16.msra.mxu0 %v4747_v56  ;;  %2236 = vmatpush.bf16.msra.mxu1 %v4751_v57  ;;  %v5285_v56 = vld [vmem:[%s8333_s3 + $0xa4] sm:$0xf0]  ;;  %v5269_v57 = vld [vmem:[%s8333_s3 + $0x2c] sm:$0xf]  ;;  %v4643_v51 = vor.u32 %v5415_v44, %v4642_v43  ;;  %v5036_v43 = vld [vmem:[%s8333_s3 + $0x7c0] sm:$0xf0] }
  0x7f   : > { %2250 = vmatpush.bf16.msra.mxu2 %v4755_v58  ;;  %v4116_v58 = vld [vmem:[%s8333_s3 + $0xa8] sm:$0xf0]  ;;  %v5042_v44 = vld [vmem:[%s8333_s3 + $0x748] sm:$0xf] }
  0x80   : > { %2264 = vmatpush.bf16.msra.mxu3 %v4759_v63  ;;  %v5494_v63 = vld [vmem:[%s8333_s3 + $0x734] sm:$0xf]  ;;  %v4119_v9 = vor.u32 %v5269_v57, %v4116_v58  ;;  %v4514_v57 = vld [vmem:[%s8333_s3 + $0x338] sm:$0xf] }
  0x81   : > { %v5023_v11 = vor.u32 %v5494_v63, %v5020_v1  ;;  %v5383_v58 = vld [vmem:[%s8333_s3 + $0x3b4] sm:$0xf0] }
  0x82   : > { %2223 = vmatpush.bf16.msra.mxu0 %v4619_v6  ;;  %2237 = vmatpush.bf16.msra.mxu1 %v4623_v7  ;;  %v4115_v6 = vor.u32 %v5285_v56, %v4114_v52  ;;  %v5495_v7 = vld [vmem:[%s8333_s3 + $0x73c] sm:$0xf]  ;;  %v4506_v52 = vld [vmem:[%s8333_s3 + $0x330] sm:$0xf]  ;;  %v4508_v56 = vld [vmem:[%s8333_s3 + $0x3b0] sm:$0xf0]  ;;  %v4515_v1 = vor.u32 %v5383_v58, %v4514_v57 }
  0x83   : > { %2251 = vmatpush.bf16.msra.mxu2 %v4627_v8  ;;  %5628 = vset.pattern.permute.xlu1 %v5790_v48  ;;  %v5028_v8 = vld [vmem:[%s8333_s3 + $0x7b8] sm:$0xf0]  ;;  %v5480_v57 = vld [vmem:[%s8333_s3 + $0x6bc] sm:$0xf0]  ;;  %v5464_v58 = vld [vmem:[%s8333_s3 + $0x644] sm:$0xf] }
  0x84   : > { %2265 = vmatpush.bf16.msra.mxu3 %v4631_v12  ;;  %2725 = vperm.xlu1 %5628, %v6216_v14   ;;  %v5027_v12 = vor.u32 %v5511_v4, %v5026_v2  ;;  %v5031_v17 = vor.u32 %v5495_v7, %v5028_v8  ;;  %v4644_v48 = vld [vmem:[%s8333_s3 + $0x4b8] sm:$0xf0]  ;;  %v4378_v2 = vld [vmem:[%s8333_s3 + $0x230] sm:$0xf]  ;;  %v4380_v7 = vld [vmem:[%s8333_s3 + $0x2b0] sm:$0xf0] }
  0x85   : > { %5624 = vset.pattern.permute.xlu2 %v5787_v3  ;;  %v5463_v3 = vld [vmem:[%s8333_s3 + $0x63c] sm:$0xf]  ;;  %v5350_v4 = vld [vmem:[%s8333_s3 + $0x2ac] sm:$0xf0]  ;;  %v4386_v8 = vld [vmem:[%s8333_s3 + $0x238] sm:$0xf] }
  0x86   : > { %2224 = vmatpush.bf16.msra.mxu0 %v4491_v20  ;;  %2238 = vmatpush.bf16.msra.mxu1 %v4495_v21  ;;  %v5479_v20 = vld [vmem:[%s8333_s3 + $0x6b4] sm:$0xf0]  ;;  %v4900_v21 = vld [vmem:[%s8333_s3 + $0x6b8] sm:$0xf0] }
  0x87   : > { %2252 = vmatpush.bf16.msra.mxu2 %v4499_v22  ;;  %2701 = vperm.xlu2 %5624, %v6216_v14   ;;  %v4891_v22 = vor.u32 %v5478_v15, %v4890_v13  ;;  %v4899_v24 = vor.u32 %v5479_v20, %v4898_v19  ;;  %v4903_v28 = vor.u32 %v5463_v3, %v4900_v21  ;;  %v4250_v15 = vld [vmem:[%s8333_s3 + $0x130] sm:$0xf]  ;;  %v5302_v19 = vld [vmem:[%s8333_s3 + $0x134] sm:$0xf]  ;;  %v4258_v21 = vld [vmem:[%s8333_s3 + $0x138] sm:$0xf] }
  0x88   : > { %2266 = vmatpush.bf16.msra.mxu3 %v4503_v26  ;;  %v5446_v26 = vld [vmem:[%s8333_s3 + $0x5ac] sm:$0xf0]  ;;  %v4379_v13 = vor.u32 %v5350_v4, %v4378_v2  ;;  %v4252_v20 = vld [vmem:[%s8333_s3 + $0x1b0] sm:$0xf0] }
  0x89   : > { %v4763_v35 = vor.u32 %v5446_v26, %v4762_v25  ;;  %v5794_v25 = vmov 13   ;;  %v4251_v26 = vor.u32 %v5318_v18, %v4250_v15  ;;  %v4788_v15 = vld [vmem:[%s8333_s3 + $0x5c8] sm:$0xf0] }
  0x8a   : > { %2225 = vmatpush.bf16.msra.mxu0 %v4363_v33  ;;  %2239 = vmatpush.bf16.msra.mxu1 %v4367_v37  ;;  %v5431_v33 = vld [vmem:[%s8333_s3 + $0x53c] sm:$0xf]  ;;  %v4771_v37 = vor.u32 %v5447_v31, %v4770_v30  ;;  %v4255_v30 = vor.u32 %v5302_v19, %v4252_v20  ;;  %v4650_v19 = vld [vmem:[%s8333_s3 + $0x440] sm:$0xf] }
  0x8b   : > { %2253 = vmatpush.bf16.msra.mxu2 %v4371_v38  ;;  %v4634_v38 = vld [vmem:[%s8333_s3 + $0x430] sm:$0xf]  ;;  %v4775_v41 = vor.u32 %v5431_v33, %v4772_v34  ;;  %v4124_v33 = vld [vmem:[%s8333_s3 + $0xb0] sm:$0xf0]  ;;  %v4130_v34 = vld [vmem:[%s8333_s3 + $0x38] sm:$0xf] }
  0x8c   : > { %2267 = vmatpush.bf16.msra.mxu3 %v4375_v42  ;;  %v4636_v42 = vld [vmem:[%s8333_s3 + $0x4b0] sm:$0xf0]  ;;  %5630 = vset.pattern.permute.xlu1 %v5791_v45  ;;  %v5416_v20 = vld [vmem:[%s8333_s3 + $0x4bc] sm:$0xf0] }
  0x8d   : > { %2737 = vperm.xlu1 %5630, %v6216_v14   ;;  %v4639_v50 = vor.u32 %v5398_v40, %v4636_v42  ;;  %v5512_v40 = vld [vmem:[%s8333_s3 + $0x7bc] sm:$0xf0] }
  0x8e   : > { %2226 = vmatpush.bf16.msra.mxu0 %v4235_v49  ;;  %2240 = vmatpush.bf16.msra.mxu1 %v4239_v54  ;;  %v4635_v49 = vor.u32 %v5414_v39, %v4634_v38  ;;  %v5382_v54 = vld [vmem:[%s8333_s3 + $0x3ac] sm:$0xf0]  ;;  %v4132_v38 = vld [vmem:[%s8333_s3 + $0xb8] sm:$0xf0]  ;;  %v5034_v39 = vld [vmem:[%s8333_s3 + $0x740] sm:$0xf] }
  0x8f   : > { %2254 = vmatpush.bf16.msra.mxu2 %v4243_v55  ;;  %5626 = vset.pattern.permute.xlu2 %v5789_v32  ;;  %v5366_v32 = vld [vmem:[%s8333_s3 + $0x334] sm:$0xf]  ;;  %v4647_v55 = vor.u32 %v5399_v47, %v4644_v48  ;;  %v4507_v63 = vor.u32 %v5382_v54, %v4506_v52  ;;  %v5795_v47 = vmov 12   ;;  %v4127_v48 = vor.u32 %v5270_v29, %v4124_v33  ;;  %v4522_v29 = vld [vmem:[%s8333_s3 + $0x340] sm:$0xf] }
  0x90   : > { %2268 = vmatpush.bf16.msra.mxu3 %v4247_v60  ;;  %2713 = vperm.xlu2 %5626, %v6216_v14   ;;  %v5792_v60 = vmov 10   ;;  %v5035_v54 = vor.u32 %v5512_v40, %v5034_v39  ;;  %v4524_v33 = vld [vmem:[%s8333_s3 + $0x3c0] sm:$0xf0] }
  0x91   : > { %5632 = vset.pattern.permute.xlu0 %v5792_v60 }
  0x92   : > { %2227 = vmatpush.bf16.msra.mxu0 %v4107_v0  ;;  %2241 = vmatpush.bf16.msra.mxu1 %v4111_v5  ;;  %v4511_v0 = vor.u32 %v5366_v32, %v4508_v56  ;;  %v5334_v5 = vld [vmem:[%s8333_s3 + $0x234] sm:$0xf]  ;;  %v4906_v56 = vld [vmem:[%s8333_s3 + $0x640] sm:$0xf] }
  0x93   : > { %2255 = vmatpush.bf16.msra.mxu2 %v4115_v6  ;;  %2749 = vperm.xlu0 %5632, %v6216_v14   ;;  %v4519_v6 = vor.u32 %v5367_v61, %v4516_v62  ;;  %v4383_v16 = vor.u32 %v5334_v5, %v4380_v7  ;;  %v4908_v62 = vld [vmem:[%s8333_s3 + $0x6c0] sm:$0xf0]  ;;  %v4907_v2 = vor.u32 %v5480_v57, %v4906_v56 }
  0x94   : > { %2269 = vmatpush.bf16.msra.mxu3 %v4119_v9  ;;  %v5351_v9 = vld [vmem:[%s8333_s3 + $0x2b4] sm:$0xf0]  ;;  %v4911_v4 = vor.u32 %v5464_v58, %v4908_v62  ;;  %v5432_v7 = vld [vmem:[%s8333_s3 + $0x544] sm:$0xf]  ;;  %v5320_v58 = vld [vmem:[%s8333_s3 + $0x1bc] sm:$0xf0] }
  0x95   : > { %2228 = vmatmul.bf16.vlgmr.msra.gmra.mxu0 %v6160_v53  ;;  %2242 = vmatmul.bf16.vlgmr.msra.gmra.mxu1 %v6160_v53  ;;  %v4268_v62 = vld [vmem:[%s8333_s3 + $0x1c0] sm:$0xf0] }
  0x96   : > { %2276 = vmatpush.bf16.msrb.mxu0 %v5019_v10  ;;  %2290 = vmatpush.bf16.msrb.mxu1 %v5023_v11  ;;  %v5335_v10 = vld [vmem:[%s8333_s3 + $0x23c] sm:$0xf] }
  0x97   : > { %2304 = vmatpush.bf16.msrb.mxu2 %v5027_v12  ;;  %2270 = vmatmul.bf16.vlgmr.msra.gmra.mxu3 %v6160_v53  ;;  %v4388_v11 = vld [vmem:[%s8333_s3 + $0x2b8] sm:$0xf0]  ;;  %v5793_v12 = vmov 11  }
  0x98   : > { %2318 = vmatpush.bf16.msrb.mxu3 %v5031_v17  ;;  %2256 = vmatmul.bf16.vlgmr.msra.gmra.mxu2 %v6160_v53  ;;  %v4387_v17 = vor.u32 %v5351_v9, %v4386_v8  ;;  %v4391_v3 = vor.u32 %v5335_v10, %v4388_v11  ;;  %v4780_v9 = vld [vmem:[%s8333_s3 + $0x5c0] sm:$0xf0]  ;;  %v4786_v10 = vld [vmem:[%s8333_s3 + $0x548] sm:$0xf] }
  0x99   : > { %5633 = vset.pattern.permute.xlu1 %v5793_v12  ;;  %5629 = vset.pattern.permute.xlu2 %v5791_v45  ;;  %v5513_v45 = vld [vmem:[%s8333_s3 + $0x7c4] sm:$0xf0] }
  0x9a   : > { %2277 = vmatpush.bf16.msrb.mxu0 %v4891_v22  ;;  %2291 = vmatpush.bf16.msrb.mxu1 %v4895_v23  ;;  %v5319_v22 = vld [vmem:[%s8333_s3 + $0x1b4] sm:$0xf0]  ;;  %v5303_v23 = vld [vmem:[%s8333_s3 + $0x13c] sm:$0xf]  ;;  %v5449_v11 = vld [vmem:[%s8333_s3 + $0x5c4] sm:$0xf0] }
  0x9b   : > { %2305 = vmatpush.bf16.msrb.mxu2 %v4899_v24  ;;  %2757 = vperm.xlu1 %5633, %v6151_v46   ;;  %v4260_v24 = vld [vmem:[%s8333_s3 + $0x1b8] sm:$0xf0]  ;;  %v4259_v31 = vor.u32 %v5319_v22, %v4258_v21  ;;  %v4787_v18 = vor.u32 %v5449_v11, %v4786_v10  ;;  %v4652_v21 = vld [vmem:[%s8333_s3 + $0x4c0] sm:$0xf0]  ;;  %v4658_v22 = vld [vmem:[%s8333_s3 + $0x448] sm:$0xf] }
  0x9c   : > { %2319 = vmatpush.bf16.msrb.mxu3 %v4903_v28  ;;  %2733 = vperm.xlu2 %5629, %v6151_v46   ;;  %v5286_v28 = vld [vmem:[%s8333_s3 + $0xac] sm:$0xf0]  ;;  %v4140_v10 = vld [vmem:[%s8333_s3 + $0xc0] sm:$0xf0]  ;;  %v4146_v11 = vld [vmem:[%s8333_s3 + $0x48] sm:$0xf] }
  0x9d   : > { %5637 = vset.pattern.permute.xlu0 %v5794_v25  ;;  %v4123_v42 = vor.u32 %v5286_v28, %v4122_v27 }
  0x9e   : > { %2278 = vmatpush.bf16.msrb.mxu0 %v4763_v35  ;;  %2292 = vmatpush.bf16.msrb.mxu1 %v4767_v36  ;;  %v4263_v35 = vor.u32 %v5303_v23, %v4260_v24  ;;  %v5287_v36 = vld [vmem:[%s8333_s3 + $0xb4] sm:$0xf0]  ;;  %v5417_v23 = vld [vmem:[%s8333_s3 + $0x4c4] sm:$0xf0]  ;;  %v5401_v24 = vld [vmem:[%s8333_s3 + $0x44c] sm:$0xf] }
  0x9f   : > { %2306 = vmatpush.bf16.msrb.mxu2 %v4771_v37  ;;  %2781 = vperm.xlu0 %5637, %v6151_v46   ;;  %v5271_v37 = vld [vmem:[%s8333_s3 + $0x3c] sm:$0xf]  ;;  %v4659_v28 = vor.u32 %v5417_v23, %v4658_v22  ;;  %v5515_v22 = vld [vmem:[%s8333_s3 + $0x7d4] sm:$0xf0]  ;;  %v5799_v23 = vmov 16  }
  0xa0   : > { %2320 = vmatpush.bf16.msrb.mxu3 %v4775_v41  ;;  %v5496_v41 = vld [vmem:[%s8333_s3 + $0x744] sm:$0xf]  ;;  %v4135_v52 = vor.u32 %v5271_v37, %v4132_v38  ;;  %v5369_v37 = vld [vmem:[%s8333_s3 + $0x34c] sm:$0xf] }
  0xa1   : > { %v5039_v32 = vor.u32 %v5496_v41, %v5036_v43  ;;  %v4532_v38 = vld [vmem:[%s8333_s3 + $0x3c8] sm:$0xf0]  ;;  %v5352_v43 = vld [vmem:[%s8333_s3 + $0x2bc] sm:$0xf0] }
  0xa2   : > { %2279 = vmatpush.bf16.msrb.mxu0 %v4635_v49  ;;  %2293 = vmatpush.bf16.msrb.mxu1 %v4639_v50  ;;  %v4131_v49 = vor.u32 %v5287_v36, %v4130_v34  ;;  %v5497_v50 = vld [vmem:[%s8333_s3 + $0x74c] sm:$0xf]  ;;  %v4530_v34 = vld [vmem:[%s8333_s3 + $0x348] sm:$0xf]  ;;  %v5796_v36 = vmov 15  }
  0xa3   : > { %2307 = vmatpush.bf16.msrb.mxu2 %v4643_v51  ;;  %5635 = vset.pattern.permute.xlu1 %v5795_v47  ;;  %v5044_v51 = vld [vmem:[%s8333_s3 + $0x7c8] sm:$0xf0] }
  0xa4   : > { %2321 = vmatpush.bf16.msrb.mxu3 %v4647_v55  ;;  %2769 = vperm.xlu1 %5635, %v6151_v46   ;;  %v5043_v55 = vor.u32 %v5513_v45, %v5042_v44  ;;  %v5047_v61 = vor.u32 %v5497_v50, %v5044_v51  ;;  %v5336_v44 = vld [vmem:[%s8333_s3 + $0x244] sm:$0xf]  ;;  %v5337_v50 = vld [vmem:[%s8333_s3 + $0x24c] sm:$0xf] }
  0xa5   : > { %5631 = vset.pattern.permute.xlu2 %v5792_v60  ;;  %v5465_v60 = vld [vmem:[%s8333_s3 + $0x64c] sm:$0xf]  ;;  %v4396_v45 = vld [vmem:[%s8333_s3 + $0x2c0] sm:$0xf0] }
  0xa6   : > { %2280 = vmatpush.bf16.msrb.mxu0 %v4507_v63  ;;  %2294 = vmatpush.bf16.msrb.mxu1 %v4511_v0  ;;  %v4914_v63 = vld [vmem:[%s8333_s3 + $0x648] sm:$0xf]  ;;  %v4404_v51 = vld [vmem:[%s8333_s3 + $0x2c8] sm:$0xf0]  ;;  %v4399_v56 = vor.u32 %v5336_v44, %v4396_v45  ;;  %v4794_v44 = vld [vmem:[%s8333_s3 + $0x550] sm:$0xf] }
  0xa7   : > { %2308 = vmatpush.bf16.msrb.mxu2 %v4515_v1  ;;  %v5481_v0 = vld [vmem:[%s8333_s3 + $0x6c4] sm:$0xf0]  ;;  %2745 = vperm.xlu2 %5631, %v6151_v46   ;;  %v4916_v1 = vld [vmem:[%s8333_s3 + $0x6c8] sm:$0xf0]  ;;  %v4778_v46 = vld [vmem:[%s8333_s3 + $0x540] sm:$0xf] }
  0xa8   : > { %2322 = vmatpush.bf16.msrb.mxu3 %v4519_v6  ;;  %v4915_v5 = vor.u32 %v5481_v0, %v4914_v63  ;;  %v5448_v6 = vld [vmem:[%s8333_s3 + $0x5bc] sm:$0xf0]  ;;  %v4919_v8 = vor.u32 %v5465_v60, %v4916_v1  ;;  %5642 = vset.pattern.permute.xlu0 %v5796_v36  ;;  %v4407_v63 = vor.u32 %v5337_v50, %v4404_v51  ;;  %v4274_v0 = vld [vmem:[%s8333_s3 + $0x148] sm:$0xf]  ;;  %v5305_v1 = vld [vmem:[%s8333_s3 + $0x14c] sm:$0xf] }
  0xa9   : > { %2809 = vperm.xlu0 %5642, %v6216_v14   ;;  %v5321_v60 = vld [vmem:[%s8333_s3 + $0x1c4] sm:$0xf0]  ;;  %v7045_v51 = vld [vmem:[%s8334_s4] sm:$0xff] }
  0xaa   : > { %2281 = vmatpush.bf16.msrb.mxu0 %v4379_v13  ;;  %2295 = vmatpush.bf16.msrb.mxu1 %v4383_v16  ;;  %v5433_v13 = vld [vmem:[%s8333_s3 + $0x54c] sm:$0xf]  ;;  %v4779_v16 = vor.u32 %v5448_v6, %v4778_v46  ;;  %v4138_v46 = vld [vmem:[%s8333_s3 + $0x40] sm:$0xf]  ;;  %v5272_v6 = vld [vmem:[%s8333_s3 + $0x44] sm:$0xf] }
  0xab   : > { %2309 = vmatpush.bf16.msrb.mxu2 %v4387_v17  ;;  %v4783_v17 = vor.u32 %v5432_v7, %v4780_v9  ;;  %v6959_v7 = vld [vmem:[#allocation3] sm:$0xff]  ;;  %v4275_v9 = vor.u32 %v5321_v60, %v4274_v0 }
  0xac   : > { %2323 = vmatpush.bf16.msrb.mxu3 %v4391_v3  ;;  %v5400_v3 = vld [vmem:[%s8333_s3 + $0x444] sm:$0xf]  ;;  %5638 = vset.pattern.permute.xlu1 %v5794_v25  ;;  %v4660_v25 = vld [vmem:[%s8333_s3 + $0x4c8] sm:$0xf0]  ;;  %v4666_v0 = vld [vmem:[%s8333_s3 + $0x450] sm:$0xf] }
  0xad   : > { %2785 = vperm.xlu1 %5638, %v6216_v14   ;;  %v4655_v27 = vor.u32 %v5400_v3, %v4652_v21  ;;  %v5058_v21 = vld [vmem:[%s8333_s3 + $0x758] sm:$0xf] }
  0xae   : > { %2282 = vmatpush.bf16.msrb.mxu0 %v4251_v26  ;;  %2296 = vmatpush.bf16.msrb.mxu1 %v4255_v30  ;;  %v4651_v26 = vor.u32 %v5416_v20, %v4650_v19  ;;  %v5384_v30 = vld [vmem:[%s8333_s3 + $0x3bc] sm:$0xf0]  ;;  %v5514_v19 = vld [vmem:[%s8333_s3 + $0x7cc] sm:$0xf0]  ;;  %v5498_v20 = vld [vmem:[%s8333_s3 + $0x754] sm:$0xf] }
  0xaf   : > { %2310 = vmatpush.bf16.msrb.mxu2 %v4259_v31  ;;  %5634 = vset.pattern.permute.xlu2 %v5793_v12  ;;  %v5368_v12 = vld [vmem:[%s8333_s3 + $0x344] sm:$0xf]  ;;  %v4663_v31 = vor.u32 %v5401_v24, %v4660_v25  ;;  %v4523_v39 = vor.u32 %v5384_v30, %v4522_v29  ;;  %v4143_v24 = vor.u32 %v5272_v6, %v4140_v10  ;;  %v5800_v6 = vmov 17   ;;  %v4674_v10 = vld [vmem:[%s8333_s3 + $0x458] sm:$0xf] }
  0xb0   : > { %2324 = vmatpush.bf16.msrb.mxu3 %v4263_v35  ;;  %2761 = vperm.xlu2 %5634, %v6216_v14   ;;  %v5385_v35 = vld [vmem:[%s8333_s3 + $0x3c4] sm:$0xf0]  ;;  %v4527_v40 = vor.u32 %v5368_v12, %v4524_v33  ;;  %v4535_v14 = vor.u32 %v5369_v37, %v4532_v38  ;;  %v4922_v33 = vld [vmem:[%s8333_s3 + $0x650] sm:$0xf]  ;;  %v4924_v38 = vld [vmem:[%s8333_s3 + $0x6d0] sm:$0xf0] }
  0xb1   : > { %v4531_v41 = vor.u32 %v5385_v35, %v4530_v34  ;;  %v5482_v34 = vld [vmem:[%s8333_s3 + $0x6cc] sm:$0xf0]  ;;  %v5466_v35 = vld [vmem:[%s8333_s3 + $0x654] sm:$0xf] }
  0xb2   : > { %2283 = vmatpush.bf16.msrb.mxu0 %v4123_v42  ;;  %2297 = vmatpush.bf16.msrb.mxu1 %v4127_v48  ;;  %v4394_v42 = vld [vmem:[%s8333_s3 + $0x240] sm:$0xf]  ;;  %v4402_v48 = vld [vmem:[%s8333_s3 + $0x248] sm:$0xf] }
  0xb3   : > { %2311 = vmatpush.bf16.msrb.mxu2 %v4131_v49  ;;  %v5353_v49 = vld [vmem:[%s8333_s3 + $0x2c4] sm:$0xf0] }
  0xb4   : > { %2325 = vmatpush.bf16.msrb.mxu3 %v4135_v52  ;;  %v5797_v52 = vmov 14   ;;  %v4403_v57 = vor.u32 %v5353_v49, %v4402_v48  ;;  %v5450_v48 = vld [vmem:[%s8333_s3 + $0x5cc] sm:$0xf0]  ;;  %v5434_v49 = vld [vmem:[%s8333_s3 + $0x554] sm:$0xf] }
  0xb5   : > { %2284 = vmatmul.bf16.vlgmr.msrb.gmra.mxu0 %v6160_v53  ;;  %2298 = vmatmul.bf16.vlgmr.msrb.gmra.mxu1 %v6160_v53 }
  0xb6   : > { %2332 = vmatpush.bf16.msra.mxu0 %v5035_v54  ;;  %2346 = vmatpush.bf16.msra.mxu1 %v5039_v32  ;;  %v4395_v54 = vor.u32 %v5352_v43, %v4394_v42  ;;  %v6920_v32 = vld [vmem:[#allocation3 + $0x8] sm:$0xff]  ;;  %v4923_v43 = vor.u32 %v5482_v34, %v4922_v33  ;;  %v760_v33 = vperm.slane %v7045_v51, 2 }
  0xb7   : > { %2360 = vmatpush.bf16.msra.mxu2 %v5043_v55  ;;  %2326 = vmatmul.bf16.vlgmr.msrb.gmra.mxu3 %v6160_v53  ;;  %v4266_v55 = vld [vmem:[%s8333_s3 + $0x140] sm:$0xf]  ;;  %v4932_v42 = vld [vmem:[%s8333_s3 + $0x6d8] sm:$0xf0] }
  0xb8   : > { %2374 = vmatpush.bf16.msra.mxu3 %v5047_v61  ;;  %2312 = vmatmul.bf16.vlgmr.msrb.gmra.mxu2 %v6160_v53  ;;  %v4791_v53 = vor.u32 %v5433_v13, %v4788_v15  ;;  %v5304_v61 = vld [vmem:[%s8333_s3 + $0x144] sm:$0xf]  ;;  %v5289_v15 = vld [vmem:[%s8333_s3 + $0xc4] sm:$0xf0] }
  0xb9   : > { %5640 = vset.pattern.permute.xlu1 %v5797_v52  ;;  %5636 = vset.pattern.permute.xlu2 %v5795_v47  ;;  %v5288_v47 = vld [vmem:[%s8333_s3 + $0xbc] sm:$0xf0]  ;;  %v4147_v25 = vor.u32 %v5289_v15, %v4146_v11  ;;  %v7040_v50 = vpop.permute.xlu2 %2649  ;;  %v5419_v11 = vld [vmem:[%s8333_s3 + $0x4d4] sm:$0xf0]  ;;  %v5403_v15 = vld [vmem:[%s8333_s3 + $0x45c] sm:$0xf] }
  0xba   : > { %2333 = vmatpush.bf16.msra.mxu0 %v4907_v2  ;;  %2347 = vmatpush.bf16.msra.mxu1 %v4911_v4  ;;  %v4276_v2 = vld [vmem:[%s8333_s3 + $0x1c8] sm:$0xf0]  ;;  %v5798_v4 = vmov 18   ;;  %v4139_v3 = vor.u32 %v5288_v47, %v4138_v46  ;;  %v5402_v46 = vld [vmem:[%s8333_s3 + $0x454] sm:$0xf] }
  0xbb   : > { %2361 = vmatpush.bf16.msra.mxu2 %v4915_v5  ;;  %2797 = vperm.xlu1 %5640, %v6920_v32   ;;  %v4267_v5 = vor.u32 %v5320_v58, %v4266_v55  ;;  %v4279_v13 = vor.u32 %v5305_v1, %v4276_v2  ;;  %v4796_v55 = vld [vmem:[%s8333_s3 + $0x5d0] sm:$0xf0]  ;;  %v5435_v58 = vld [vmem:[%s8333_s3 + $0x55c] sm:$0xf]  ;;  %v759_v2 = vperm.slane %v7045_v51, 1 }
  0xbc   : > { %2375 = vmatpush.bf16.msra.mxu3 %v4919_v8  ;;  %2773 = vperm.xlu2 %5636, %v6920_v32   ;;  %v4271_v8 = vor.u32 %v5304_v61, %v4268_v62  ;;  %v4804_v61 = vld [vmem:[%s8333_s3 + $0x5d8] sm:$0xf0]  ;;  %v4795_v62 = vor.u32 %v5450_v48, %v4794_v44  ;;  %v4799_v60 = vor.u32 %v5434_v49, %v4796_v55  ;;  %v5355_v48 = vld [vmem:[%s8333_s3 + $0x2d4] sm:$0xf0] }
  0xbd   : > { %5647 = vset.pattern.permute.xlu0 %v5798_v4  ;;  %v4807_v47 = vor.u32 %v5435_v58, %v4804_v61  ;;  %v5339_v61 = vld [vmem:[%s8333_s3 + $0x25c] sm:$0xf] }
  0xbe   : > { %2334 = vmatpush.bf16.msra.mxu0 %v4779_v16  ;;  %2348 = vmatpush.bf16.msra.mxu1 %v4783_v17  ;;  %v5273_v16 = vld [vmem:[%s8333_s3 + $0x4c] sm:$0xf]  ;;  %v7003_v30 = vpop.permute.xlu1 %2637 }
  0xbf   : > { %2362 = vmatpush.bf16.msra.mxu2 %v4787_v18  ;;  %2841 = vperm.xlu0 %5647, %v6959_v7   ;;  %v4148_v17 = vld [vmem:[%s8333_s3 + $0xc8] sm:$0xf0]  ;;  %v5050_v18 = vld [vmem:[%s8333_s3 + $0x750] sm:$0xf] }
  0xc0   : > { %2376 = vmatpush.bf16.msra.mxu3 %v4791_v53  ;;  %v5052_v53 = vld [vmem:[%s8333_s3 + $0x7d0] sm:$0xf0]  ;;  %v5051_v29 = vor.u32 %v5514_v19, %v5050_v18 }
  0xc1   : > { %v5055_v12 = vor.u32 %v5498_v20, %v5052_v53  ;;  %v4538_v20 = vld [vmem:[%s8333_s3 + $0x350] sm:$0xf] }
  0xc2   : > { %2335 = vmatpush.bf16.msra.mxu0 %v4651_v26  ;;  %2349 = vmatpush.bf16.msra.mxu1 %v4655_v27  ;;  %v5499_v26 = vld [vmem:[%s8333_s3 + $0x75c] sm:$0xf]  ;;  %v7130_v34 = vpop.permute.xlu2 %2653 }
  0xc3   : > { %2363 = vmatpush.bf16.msra.mxu2 %v4659_v28  ;;  %5643 = vset.pattern.permute.xlu1 %v5799_v23  ;;  %v5060_v27 = vld [vmem:[%s8333_s3 + $0x7d8] sm:$0xf0]  ;;  %v4151_v28 = vor.u32 %v5273_v16, %v4148_v17 }
  0xc4   : > { %2377 = vmatpush.bf16.msra.mxu3 %v4663_v31  ;;  %2817 = vperm.xlu1 %5643, %v6959_v7   ;;  %v5059_v31 = vor.u32 %v5515_v22, %v5058_v21  ;;  %v5063_v37 = vor.u32 %v5499_v26, %v5060_v27  ;;  %v4676_v16 = vld [vmem:[%s8333_s3 + $0x4d8] sm:$0xf0]  ;;  %v4675_v21 = vor.u32 %v5419_v11, %v4674_v10  ;;  %v5370_v22 = vld [vmem:[%s8333_s3 + $0x354] sm:$0xf]  ;;  %v4546_v26 = vld [vmem:[%s8333_s3 + $0x358] sm:$0xf] }
  0xc5   : > { %5639 = vset.pattern.permute.xlu2 %v5797_v52  ;;  %v7048_v52 = vld [vmem:[%s5909_s23] sm:$0xff]  ;;  %v5387_v27 = vld [vmem:[%s8333_s3 + $0x3d4] sm:$0xf0]  ;;  %v5306_v10 = vld [vmem:[%s8333_s3 + $0x154] sm:$0xf] }
  0xc6   : > { %2336 = vmatpush.bf16.msra.mxu0 %v4523_v39  ;;  %2350 = vmatpush.bf16.msra.mxu1 %v4527_v40  ;;  %v4930_v39 = vld [vmem:[%s8333_s3 + $0x658] sm:$0xf]  ;;  %v4284_v11 = vld [vmem:[%s8333_s3 + $0x1d0] sm:$0xf0] }
  0xc7   : > { %2364 = vmatpush.bf16.msra.mxu2 %v4531_v41  ;;  %v5483_v40 = vld [vmem:[%s8333_s3 + $0x6d4] sm:$0xf0]  ;;  %2793 = vperm.xlu2 %5639, %v6959_v7   ;;  %v5467_v41 = vld [vmem:[%s8333_s3 + $0x65c] sm:$0xf] }
  0xc8   : > { %2378 = vmatpush.bf16.msra.mxu3 %v4535_v14  ;;  %v4927_v14 = vor.u32 %v5466_v35, %v4924_v38  ;;  %v4931_v45 = vor.u32 %v5483_v40, %v4930_v39  ;;  %v2625_v35 = vpop.permute.xlu0 %2624  ;;  %v4410_v38 = vld [vmem:[%s8333_s3 + $0x250] sm:$0xf]  ;;  %v4547_v40 = vor.u32 %v5387_v27, %v4546_v26  ;;  %v4156_v27 = vld [vmem:[%s8333_s3 + $0xd0] sm:$0xf0] }
  0xca   : > { %2337 = vmatpush.bf16.msra.mxu0 %v4395_v54  ;;  %2351 = vmatpush.bf16.msra.mxu1 %v4399_v56  ;;  %v4935_v54 = vor.u32 %v5467_v41, %v4932_v42  ;;  %v4802_v56 = vld [vmem:[%s8333_s3 + $0x558] sm:$0xf]  ;;  %v5354_v41 = vld [vmem:[%s8333_s3 + $0x2cc] sm:$0xf0]  ;;  %v5338_v42 = vld [vmem:[%s8333_s3 + $0x254] sm:$0xf] }
  0xcb   : > { %2365 = vmatpush.bf16.msra.mxu2 %v4403_v57  ;;  %v5451_v57 = vld [vmem:[%s8333_s3 + $0x5d4] sm:$0xf0] }
  0xcc   : > { %2379 = vmatpush.bf16.msra.mxu3 %v4407_v63  ;;  %v758_v63 = vperm.slane %v7045_v51, 0  ;;  %v4803_v1 = vor.u32 %v5451_v57, %v4802_v56  ;;  %5645 = vset.pattern.permute.xlu1 %v5800_v6 }
  0xcd   : > { %2829 = vperm.xlu1 %5645, %v6959_v7  }
  0xce   : > { %2338 = vmatpush.bf16.msra.mxu0 %v4267_v5  ;;  %2352 = vmatpush.bf16.msra.mxu1 %v4271_v8  ;;  %v5418_v5 = vld [vmem:[%s8333_s3 + $0x4cc] sm:$0xf0]  ;;  %v7081_v8 = vpop.permute.xlu1 %2641 }
  0xcf   : > { %2366 = vmatpush.bf16.msra.mxu2 %v4275_v9  ;;  %v4668_v9 = vld [vmem:[%s8333_s3 + $0x4d0] sm:$0xf0]  ;;  %5641 = vset.pattern.permute.xlu2 %v5796_v36  ;;  %v4667_v19 = vor.u32 %v5418_v5, %v4666_v0  ;;  %v5386_v36 = vld [vmem:[%s8333_s3 + $0x3cc] sm:$0xf0]  ;;  %v5801_v0 = vmov 20  }
  0xd0   : > { %2380 = vmatpush.bf16.msra.mxu3 %v4279_v13  ;;  %2805 = vperm.xlu2 %5641, %v6959_v7   ;;  %v4671_v53 = vor.u32 %v5402_v46, %v4668_v9  ;;  %v5322_v5 = vld [vmem:[%s8333_s3 + $0x1cc] sm:$0xf0] }
  0xd1   : > { %5652 = vset.pattern.permute.xlu0 %v5801_v0 }
  0xd2   : > { %2339 = vmatpush.bf16.msra.mxu0 %v4139_v3  ;;  %2353 = vmatpush.bf16.msra.mxu1 %v4143_v24  ;;  %v2117_v13 = vpop.f32.mrf.mxu0  ;;  %v2131_v18 = vpop.f32.mrf.mxu1  ;;  %v4540_v24 = vld [vmem:[%s8333_s3 + $0x3d0] sm:$0xf0] }
  0xd3   : > { %2367 = vmatpush.bf16.msra.mxu2 %v4147_v25  ;;  %v2118_v17 = vadd.f32 %v2117_v13, %v758_v63  ;;  %v2132_v3 = vadd.f32 %v2131_v18, %v759_v2  ;;  %v4679_v25 = vor.u32 %v5403_v15, %v4676_v16  ;;  %v4543_v39 = vor.u32 %v5370_v22, %v4540_v24  ;;  %v4290_v16 = vld [vmem:[%s8333_s3 + $0x158] sm:$0xf]  ;;  %v5274_v22 = vld [vmem:[%s8333_s3 + $0x54] sm:$0xf] }
  0xd4   : > { %2381 = vmatpush.bf16.msra.mxu3 %v4151_v28  ;;  %v5371_v28 = vld [vmem:[%s8333_s3 + $0x35c] sm:$0xf]  ;;  %v761_v13 = vperm.slane %v7045_v51, 3  ;;  %2869 = vperm.xlu0 %5652, %v6920_v32  }
  0xd5   : > { %2340 = vmatmul.bf16.vlgmr.msra.gmra.mxu0 %v7048_v52  ;;  %2354 = vmatmul.bf16.vlgmr.msra.gmra.mxu1 %v7048_v52 }
  0xd6   : > { %2388 = vmatpush.bf16.msrb.mxu0 %v5051_v29  ;;  %2402 = vmatpush.bf16.msrb.mxu1 %v5055_v12  ;;  %v2556_v29 = vmax.f32 %v2118_v17, 0.0  ;;  %v2557_v12 = vmax.f32 %v2132_v3, 0.0  ;;  %v7150_v49 = vpop.permute.xlu1 %2665  ;;  %v5307_v3 = vld [vmem:[%s8333_s3 + $0x15c] sm:$0xf] }
  0xd7   : > { %2416 = vmatpush.bf16.msrb.mxu2 %v5059_v31  ;;  %2382 = vmatmul.bf16.vlgmr.msra.gmra.mxu3 %v7048_v52  ;;  %v4548_v31 = vld [vmem:[%s8333_s3 + $0x3d8] sm:$0xf0] }
  0xd8   : > { %2430 = vmatpush.bf16.msrb.mxu3 %v5063_v37  ;;  %2368 = vmatmul.bf16.vlgmr.msra.gmra.mxu2 %v7048_v52  ;;  %v4539_v37 = vor.u32 %v5386_v36, %v4538_v20  ;;  %v4551_v44 = vor.u32 %v5371_v28, %v4548_v31  ;;  %v2644_v55 = vmul.f32 %v7003_v30, %v2557_v12  ;;  %v5290_v36 = vld [vmem:[%s8333_s3 + $0xcc] sm:$0xf0]  ;;  %v4162_v28 = vld [vmem:[%s8333_s3 + $0x58] sm:$0xf]  ;;  %v2630_v12 = vpop.permute.xlu0 %2629 }
  0xd9   : > { %5648 = vset.pattern.permute.xlu1 %v5798_v4  ;;  %v4411_v4 = vor.u32 %v5354_v41, %v4410_v38  ;;  %5644 = vset.pattern.permute.xlu2 %v5799_v23  ;;  %v4164_v38 = vld [vmem:[%s8333_s3 + $0xd8] sm:$0xf0] }
  0xda   : > { %2389 = vmatpush.bf16.msrb.mxu0 %v4923_v43  ;;  %2403 = vmatpush.bf16.msrb.mxu1 %v4927_v14  ;;  %v4412_v43 = vld [vmem:[%s8333_s3 + $0x2d0] sm:$0xf0]  ;;  %v7155_v57 = vpop.f32.mrf.mxu3  ;;  %v2119_v58 = vpop.f32.mrf.mxu0 }
  0xdb   : > { %2417 = vmatpush.bf16.msrb.mxu2 %v4931_v45  ;;  %v2145_v14 = vpop.f32.mrf.mxu2  ;;  %v4418_v45 = vld [vmem:[%s8333_s3 + $0x258] sm:$0xf]  ;;  %v2120_v30 = vadd.f32 %v2119_v58, %v758_v63  ;;  %2845 = vperm.xlu1 %5648, %v6920_v32   ;;  %v4415_v9 = vor.u32 %v5338_v42, %v4412_v43 }
  0xdc   : > { %2431 = vmatpush.bf16.msrb.mxu3 %v4935_v54  ;;  %v2632_v54 = vmul.f32 %v2625_v35, %v2556_v29  ;;  %v2146_v56 = vadd.f32 %v2145_v14, %v760_v33  ;;  %v4419_v63 = vor.u32 %v5355_v48, %v4418_v45  ;;  %2821 = vperm.xlu2 %5644, %v6920_v32   ;;  %v5291_v29 = vld [vmem:[%s8333_s3 + $0xd4] sm:$0xf0]  ;;  %v5500_v14 = vld [vmem:[%s8333_s3 + $0x764] sm:$0xf]  ;;  %v5802_v48 = vmov 19  }
  0xdd   : > { %v5068_v45 = vld [vmem:[%s8333_s3 + $0x7e0] sm:$0xf0] }
  0xde   : > { %2390 = vmatpush.bf16.msrb.mxu0 %v4795_v62  ;;  %2404 = vmatpush.bf16.msrb.mxu1 %v4799_v60  ;;  %v4420_v62 = vld [vmem:[%s8333_s3 + $0x2d8] sm:$0xf0]  ;;  %v2133_v60 = vpop.f32.mrf.mxu1  ;;  %v2558_v46 = vmax.f32 %v2146_v56, 0.0  ;;  %v2646_v17 = vadd.f32 %v2644_v55, %v2632_v54  ;;  %v5074_v54 = vld [vmem:[%s8333_s3 + $0x768] sm:$0xf]  ;;  %v7251_v56 = vpop.permute.xlu1 %2677 }
  0xdf   : > { %2418 = vmatpush.bf16.msrb.mxu2 %v4803_v1  ;;  %v4282_v1 = vld [vmem:[%s8333_s3 + $0x150] sm:$0xf]  ;;  %v4423_v15 = vor.u32 %v5339_v61, %v4420_v62  ;;  %v5517_v55 = vld [vmem:[%s8333_s3 + $0x7e4] sm:$0xf0]  ;;  %v4159_v61 = vor.u32 %v5274_v22, %v4156_v27  ;;  %v4163_v62 = vor.u32 %v5291_v29, %v4162_v28  ;;  %v4812_v27 = vld [vmem:[%s8333_s3 + $0x5e0] sm:$0xf0] }
  0xe0   : > { %2432 = vmatpush.bf16.msrb.mxu3 %v4807_v47  ;;  %v2134_v47 = vadd.f32 %v2133_v60, %v759_v2  ;;  %v5323_v2 = vld [vmem:[%s8333_s3 + $0x1d4] sm:$0xf0]  ;;  %v2656_v18 = vmul.f32 %v7040_v50, %v2558_v46  ;;  %v4283_v23 = vor.u32 %v5322_v5, %v4282_v1  ;;  %v4154_v50 = vld [vmem:[%s8333_s3 + $0x50] sm:$0xf]  ;;  %v5076_v60 = vld [vmem:[%s8333_s3 + $0x7e8] sm:$0xf0]  ;;  %v5071_v46 = vor.u32 %v5500_v14, %v5068_v45 }
  0xe1   : > { %v4291_v26 = vor.u32 %v5323_v2, %v4290_v16  ;;  %v5803_v16 = vmov 23   ;;  %v4940_v2 = vld [vmem:[%s8333_s3 + $0x6e0] sm:$0xf0]  ;;  %v4818_v28 = vld [vmem:[%s8333_s3 + $0x568] sm:$0xf] }
  0xe2   : > { %2391 = vmatpush.bf16.msrb.mxu0 %v4667_v19  ;;  %2405 = vmatpush.bf16.msrb.mxu1 %v4671_v53  ;;  %v2588_v19 = vmax.f32 %v2120_v30, 0.0  ;;  %v2589_v20 = vmax.f32 %v2134_v47, 0.0  ;;  %v4292_v53 = vld [vmem:[%s8333_s3 + $0x1d8] sm:$0xf0]  ;;  %v7210_v24 = vadd.f32 %v2656_v18, %v2646_v17  ;;  %v2161_v43 = vpop.f32.mrf.mxu3  ;;  %v5501_v30 = vld [vmem:[%s8333_s3 + $0x76c] sm:$0xf] }
  0xe3   : > { %2419 = vmatpush.bf16.msrb.mxu2 %v4675_v21  ;;  %v7198_v21 = vpop.permute.xlu2 %2673  ;;  %v4295_v31 = vor.u32 %v5307_v3, %v4292_v53  ;;  %v2147_v35 = vpop.f32.mrf.mxu2  ;;  %5650 = vset.pattern.permute.xlu1 %v5802_v48  ;;  %v4946_v17 = vld [vmem:[%s8333_s3 + $0x668] sm:$0xf]  ;;  %v4948_v3 = vld [vmem:[%s8333_s3 + $0x6e8] sm:$0xf0]  ;;  %v5420_v14 = vld [vmem:[%s8333_s3 + $0x4dc] sm:$0xf0] }
  0xe4   : > { %2433 = vmatpush.bf16.msrb.mxu3 %v4679_v25  ;;  %v4287_v25 = vor.u32 %v5306_v10, %v4284_v11  ;;  %v2645_v41 = vmul.f32 %v7081_v8, %v2589_v20  ;;  %v2148_v42 = vadd.f32 %v2147_v35, %v760_v33  ;;  %v2162_v8 = vadd.f32 %v2161_v43, %v761_v13  ;;  %v4938_v10 = vld [vmem:[%s8333_s3 + $0x660] sm:$0xf]  ;;  %v5485_v18 = vld [vmem:[%s8333_s3 + $0x6e4] sm:$0xf0]  ;;  %v5469_v20 = vld [vmem:[%s8333_s3 + $0x66c] sm:$0xf] }
  0xe5   : > { %v4155_v33 = vor.u32 %v5290_v36, %v4154_v50  ;;  %2857 = vperm.xlu1 %5650, %v6920_v32   ;;  %v5484_v11 = vld [vmem:[%s8333_s3 + $0x6dc] sm:$0xf0]  ;;  %5646 = vset.pattern.permute.xlu2 %v5800_v6  ;;  %v4947_v22 = vor.u32 %v5485_v18, %v4946_v17  ;;  %v5453_v29 = vld [vmem:[%s8333_s3 + $0x5e4] sm:$0xf0]  ;;  %v5404_v45 = vld [vmem:[%s8333_s3 + $0x464] sm:$0xf] }
  0xe6   : > { %2392 = vmatpush.bf16.msrb.mxu0 %v4539_v37  ;;  %2406 = vmatpush.bf16.msrb.mxu1 %v4543_v39  ;;  %v5275_v37 = vld [vmem:[%s8333_s3 + $0x5c] sm:$0xf]  ;;  %v5066_v39 = vld [vmem:[%s8333_s3 + $0x760] sm:$0xf]  ;;  %v2590_v58 = vmax.f32 %v2148_v42, 0.0  ;;  %v4939_v50 = vor.u32 %v5484_v11, %v4938_v10  ;;  %v4819_v43 = vor.u32 %v5453_v29, %v4818_v28 }
  0xe7   : > { %2420 = vmatpush.bf16.msrb.mxu2 %v4547_v40  ;;  %v2633_v40 = vmul.f32 %v2630_v12, %v2588_v19  ;;  %v4167_v1 = vor.u32 %v5275_v37, %v4164_v38  ;;  %5657 = vset.pattern.permute.xlu0 %v5803_v16  ;;  %v5437_v12 = vld [vmem:[%s8333_s3 + $0x56c] sm:$0xf]  ;;  %v762_v38 = vperm.slane %v7045_v51, 4  ;;  %v5372_v10 = vld [vmem:[%s8333_s3 + $0x364] sm:$0xf] }
  0xe8   : > { %2434 = vmatpush.bf16.msrb.mxu3 %v4551_v44  ;;  %v5516_v44 = vld [vmem:[%s8333_s3 + $0x7dc] sm:$0xf0]  ;;  %2833 = vperm.xlu2 %5646, %v6920_v32   ;;  %v4556_v11 = vld [vmem:[%s8333_s3 + $0x3e0] sm:$0xf0]  ;;  %v4562_v17 = vld [vmem:[%s8333_s3 + $0x368] sm:$0xf] }
  0xe9   : > { %v5067_v5 = vor.u32 %v5516_v44, %v5066_v39  ;;  %v2647_v47 = vadd.f32 %v2645_v41, %v2633_v40  ;;  %v4682_v39 = vld [vmem:[%s8333_s3 + $0x460] sm:$0xf]  ;;  %v7328_v40 = vpop.permute.xlu1 %2697  ;;  %v2662_v41 = vpop.permute.xlu0 %2661  ;;  %v763_v44 = vperm.slane %v7045_v51, 5  ;;  %v5389_v18 = vld [vmem:[%s8333_s3 + $0x3e4] sm:$0xf0]  ;;  %2901 = vperm.xlu0 %5657, %v6959_v7  }
  0xea   : > { %2393 = vmatpush.bf16.msrb.mxu0 %v4411_v4  ;;  %2407 = vmatpush.bf16.msrb.mxu1 %v4415_v9  ;;  %v2591_v4 = vmax.f32 %v2162_v8, 0.0  ;;  %v2657_v9 = vmul.f32 %v7130_v34, %v2590_v58  ;;  %v5079_v34 = vor.u32 %v5501_v30, %v5076_v60  ;;  %v5804_v8 = vmov 21   ;;  %v5421_v58 = vld [vmem:[%s8333_s3 + $0x4e4] sm:$0xf0]  ;;  %v4692_v30 = vld [vmem:[%s8333_s3 + $0x4e8] sm:$0xf0] }
  0xeb   : > { %2421 = vmatpush.bf16.msrb.mxu2 %v4419_v63  ;;  %v5075_v63 = vor.u32 %v5517_v55, %v5074_v54  ;;  %v7289_v53 = vpop.permute.xlu2 %2685  ;;  %v4684_v54 = vld [vmem:[%s8333_s3 + $0x4e0] sm:$0xf0]  ;;  %v4690_v55 = vld [vmem:[%s8333_s3 + $0x468] sm:$0xf] }
  0xec   : > { %2435 = vmatpush.bf16.msrb.mxu3 %v4423_v15  ;;  %v5468_v15 = vld [vmem:[%s8333_s3 + $0x664] sm:$0xf]  ;;  %v2659_v6 = vadd.f32 %v2657_v9, %v2647_v47  ;;  %v2669_v19 = vmul.f32 %v7150_v49, %v2591_v4  ;;  %v5388_v47 = vld [vmem:[%s8333_s3 + $0x3dc] sm:$0xf0]  ;;  %v4687_v9 = vor.u32 %v5404_v45, %v4684_v54  ;;  %v4436_v45 = vld [vmem:[%s8333_s3 + $0x2e8] sm:$0xf0] }
  0xed   : > { %v4943_v36 = vor.u32 %v5468_v15, %v4940_v2  ;;  %5653 = vset.pattern.permute.xlu1 %v5804_v8 }
  0xee   : > { %2394 = vmatpush.bf16.msrb.mxu0 %v4283_v23  ;;  %2408 = vmatpush.bf16.msrb.mxu1 %v4287_v25  ;;  %v2160_v23 = vadd.f32 %v7155_v57, %v761_v13  ;;  %v7294_v49 = vadd.f32 %v2669_v19, %v2659_v6  ;;  %v4810_v25 = vld [vmem:[%s8333_s3 + $0x560] sm:$0xf]  ;;  %v5436_v57 = vld [vmem:[%s8333_s3 + $0x564] sm:$0xf]  ;;  %v4951_v13 = vor.u32 %v5469_v20, %v4948_v3  ;;  %v5373_v20 = vld [vmem:[%s8333_s3 + $0x36c] sm:$0xf] }
  0xef   : > { %2422 = vmatpush.bf16.msrb.mxu2 %v4291_v26  ;;  %v5452_v26 = vld [vmem:[%s8333_s3 + $0x5dc] sm:$0xf0]  ;;  %v4815_v42 = vor.u32 %v5436_v57, %v4812_v27  ;;  %2877 = vperm.xlu1 %5653, %v6959_v7   ;;  %v4564_v3 = vld [vmem:[%s8333_s3 + $0x3e8] sm:$0xf0]  ;;  %v4559_v57 = vor.u32 %v5372_v10, %v4556_v11 }
  0xf0   : > { %2436 = vmatpush.bf16.msrb.mxu3 %v4295_v31  ;;  %v4820_v31 = vld [vmem:[%s8333_s3 + $0x5e8] sm:$0xf0]  ;;  %v2559_v35 = vmax.f32 %v2160_v23, 0.0  ;;  %v4811_v37 = vor.u32 %v5452_v26, %v4810_v25  ;;  %5649 = vset.pattern.permute.xlu2 %v5802_v48  ;;  %v764_v23 = vperm.slane %v7045_v51, 6  ;;  %v4426_v25 = vld [vmem:[%s8333_s3 + $0x260] sm:$0xf]  ;;  %v4567_v28 = vor.u32 %v5373_v20, %v4564_v3 }
  0xf1   : > { %2853 = vperm.xlu2 %5649, %v6959_v7   ;;  %v5356_v26 = vld [vmem:[%s8333_s3 + $0x2dc] sm:$0xf0]  ;;  %v5309_v11 = vld [vmem:[%s8333_s3 + $0x16c] sm:$0xf]  ;;  %v5276_v20 = vld [vmem:[%s8333_s3 + $0x64] sm:$0xf] }
  0xf2   : > { %2395 = vmatpush.bf16.msrb.mxu0 %v4155_v33  ;;  %2409 = vmatpush.bf16.msrb.mxu1 %v4159_v61  ;;  %v4823_v33 = vor.u32 %v5437_v12, %v4820_v31  ;;  %v2173_v61 = vpop.f32.mrf.mxu0  ;;  %v2668_v60 = vmul.f32 %v2662_v41, %v2559_v35  ;;  %v4428_v12 = vld [vmem:[%s8333_s3 + $0x2e0] sm:$0xf0]  ;;  %v4434_v31 = vld [vmem:[%s8333_s3 + $0x268] sm:$0xf] }
  0xf3   : > { %2423 = vmatpush.bf16.msrb.mxu2 %v4163_v62  ;;  %v5405_v62 = vld [vmem:[%s8333_s3 + $0x46c] sm:$0xf]  ;;  %v2174_v4 = vadd.f32 %v2173_v61, %v762_v38  ;;  %v7372_v15 = vpop.permute.xlu2 %2701  ;;  %v5357_v35 = vld [vmem:[%s8333_s3 + $0x2e4] sm:$0xf0]  ;;  %v4298_v61 = vld [vmem:[%s8333_s3 + $0x160] sm:$0xf] }
  0xf4   : > { %2437 = vmatpush.bf16.msrb.mxu3 %v4167_v1  ;;  %v2187_v1 = vpop.f32.mrf.mxu1  ;;  %v4695_v2 = vor.u32 %v5405_v62, %v4692_v30  ;;  %v5324_v62 = vld [vmem:[%s8333_s3 + $0x1dc] sm:$0xf0] }
  0xf5   : > { %2396 = vmatmul.bf16.vlgmr.msrb.gmra.mxu0 %v7048_v52  ;;  %2410 = vmatmul.bf16.vlgmr.msrb.gmra.mxu1 %v7048_v52  ;;  %v2188_v48 = vadd.f32 %v2187_v1, %v763_v44  ;;  %v5308_v1 = vld [vmem:[%s8333_s3 + $0x164] sm:$0xf] }
  0xf6   : > { %2444 = vmatpush.bf16.msra.mxu0 %v5067_v5  ;;  %2458 = vmatpush.bf16.msra.mxu1 %v5071_v46  ;;  %v4683_v5 = vor.u32 %v5420_v14, %v4682_v39  ;;  %v4554_v46 = vld [vmem:[%s8333_s3 + $0x360] sm:$0xf]  ;;  %v5805_v39 = vmov 22   ;;  %v5341_v14 = vld [vmem:[%s8333_s3 + $0x26c] sm:$0xf] }
  0xf7   : > { %2472 = vmatpush.bf16.msra.mxu2 %v5075_v63  ;;  %2438 = vmatmul.bf16.vlgmr.msrb.gmra.mxu3 %v7048_v52  ;;  %v4691_v63 = vor.u32 %v5421_v58, %v4690_v55  ;;  %v2561_v6 = vmax.f32 %v2188_v48, 0.0  ;;  %v4555_v19 = vor.u32 %v5388_v47, %v4554_v46  ;;  %v4439_v48 = vor.u32 %v5341_v14, %v4436_v45 }
  0xf8   : > { %2486 = vmatpush.bf16.msra.mxu3 %v5079_v34  ;;  %2424 = vmatmul.bf16.vlgmr.msrb.gmra.mxu2 %v7048_v52  ;;  %v2560_v34 = vmax.f32 %v2174_v4, 0.0  ;;  %v4435_v4 = vor.u32 %v5357_v35, %v4434_v31  ;;  %v5518_v31 = vld [vmem:[%s8333_s3 + $0x7ec] sm:$0xf0]  ;;  %v5502_v35 = vld [vmem:[%s8333_s3 + $0x774] sm:$0xf] }
  0xf9   : > { %v2692_v27 = vmul.f32 %v7289_v53, %v2561_v6  ;;  %5655 = vset.pattern.permute.xlu1 %v5805_v39  ;;  %5651 = vset.pattern.permute.xlu2 %v5801_v0  ;;  %v4299_v0 = vor.u32 %v5324_v62, %v4298_v61  ;;  %v2690_v6 = vpop.permute.xlu0 %2689 }
  0xfa   : > { %2445 = vmatpush.bf16.msra.mxu0 %v4939_v50  ;;  %2459 = vmatpush.bf16.msra.mxu1 %v4943_v36  ;;  %v2670_v50 = vadd.f32 %v2668_v60, %v7210_v24  ;;  %v2680_v36 = vmul.f32 %v7198_v21, %v2560_v34  ;;  %v5340_v24 = vld [vmem:[%s8333_s3 + $0x264] sm:$0xf]  ;;  %v2175_v41 = vpop.f32.mrf.mxu0  ;;  %v4308_v34 = vld [vmem:[%s8333_s3 + $0x1e8] sm:$0xf0] }
  0xfb   : > { %2473 = vmatpush.bf16.msra.mxu2 %v4947_v22  ;;  %v765_v22 = vperm.slane %v7045_v51, 7  ;;  %v2201_v29 = vpop.f32.mrf.mxu2  ;;  %2889 = vperm.xlu1 %5655, %v6959_v7   ;;  %v2176_v54 = vadd.f32 %v2175_v41, %v762_v38  ;;  %v4431_v60 = vor.u32 %v5340_v24, %v4428_v12  ;;  %v5277_v24 = vld [vmem:[%s8333_s3 + $0x6c] sm:$0xf]  ;;  %v5092_v51 = vld [vmem:[%s8333_s3 + $0x7f8] sm:$0xf0] }
  0xfc   : > { %2487 = vmatpush.bf16.msra.mxu3 %v4951_v13  ;;  %v4563_v13 = vor.u32 %v5389_v18, %v4562_v17  ;;  %v2682_v21 = vadd.f32 %v2680_v36, %v2670_v50  ;;  %v2202_v53 = vadd.f32 %v2201_v29, %v764_v23  ;;  %v2189_v58 = vpop.f32.mrf.mxu1  ;;  %2865 = vperm.xlu2 %5651, %v6959_v7   ;;  %v4172_v50 = vld [vmem:[%s8333_s3 + $0xe0] sm:$0xf0]  ;;  %v4178_v36 = vld [vmem:[%s8333_s3 + $0x68] sm:$0xf] }
  0xfd   : > { %v2190_v38 = vadd.f32 %v2189_v58, %v763_v44  ;;  %v2592_v46 = vmax.f32 %v2176_v54, 0.0  ;;  %v5325_v44 = vld [vmem:[%s8333_s3 + $0x1e4] sm:$0xf0]  ;;  %v4175_v45 = vor.u32 %v5276_v20, %v4172_v50  ;;  %v5455_v20 = vld [vmem:[%s8333_s3 + $0x5f4] sm:$0xf0] }
  0xfe   : > { %2446 = vmatpush.bf16.msra.mxu0 %v4811_v37  ;;  %2460 = vmatpush.bf16.msra.mxu1 %v4815_v42  ;;  %v2710_v37 = vpop.permute.xlu1 %2709  ;;  %v2215_v42 = vpop.f32.mrf.mxu3  ;;  %v2562_v30 = vmax.f32 %v2202_v53, 0.0 }
  0xff   : > { %2474 = vmatpush.bf16.msra.mxu2 %v4819_v43  ;;  %v4427_v43 = vor.u32 %v5356_v26, %v4426_v25  ;;  %v2216_v55 = vadd.f32 %v2215_v42, %v765_v22  ;;  %v2593_v10 = vmax.f32 %v2190_v38, 0.0  ;;  %v2681_v17 = vmul.f32 %v7251_v56, %v2592_v46  ;;  %v5293_v25 = vld [vmem:[%s8333_s3 + $0xe4] sm:$0xf0]  ;;  %v5090_v42 = vld [vmem:[%s8333_s3 + $0x778] sm:$0xf] }
 0x100   : > { %2488 = vmatpush.bf16.msra.mxu3 %v4823_v33  ;;  %v2694_v33 = vadd.f32 %v2692_v27, %v2682_v21  ;;  %v4311_v26 = vor.u32 %v5309_v11, %v4308_v34  ;;  %v4180_v21 = vld [vmem:[%s8333_s3 + $0xe8] sm:$0xf0]  ;;  %v5082_v27 = vld [vmem:[%s8333_s3 + $0x770] sm:$0xf]  ;;  %v5470_v38 = vld [vmem:[%s8333_s3 + $0x674] sm:$0xf] }
 0x101   : > { %v2563_v47 = vmax.f32 %v2216_v55, 0.0  ;;  %v2693_v29 = vmul.f32 %v2690_v6, %v2593_v10  ;;  %v4183_v54 = vor.u32 %v5277_v24, %v4180_v21  ;;  %v5083_v55 = vor.u32 %v5518_v31, %v5082_v27  ;;  %v4826_v11 = vld [vmem:[%s8333_s3 + $0x570] sm:$0xf]  ;;  %v7604_v31 = vld [vmem:[#allocation3 + $0x8] sm:$0xff] }
 0x102   : > { %2447 = vmatpush.bf16.msra.mxu0 %v4683_v5  ;;  %2461 = vmatpush.bf16.msra.mxu1 %v4687_v9  ;;  %v4300_v5 = vld [vmem:[%s8333_s3 + $0x1e0] sm:$0xf0]  ;;  %v4306_v9 = vld [vmem:[%s8333_s3 + $0x168] sm:$0xf]  ;;  %v5422_v24 = vld [vmem:[%s8333_s3 + $0x4ec] sm:$0xf0] }
 0x103   : > { %2475 = vmatpush.bf16.msra.mxu2 %v4691_v63  ;;  %v2704_v63 = vmul.f32 %v7328_v40, %v2562_v30  ;;  %v2716_v18 = vmul.f32 %v2710_v37, %v2563_v47  ;;  %v4170_v40 = vld [vmem:[%s8333_s3 + $0x60] sm:$0xf]  ;;  %v4303_v56 = vor.u32 %v5308_v1, %v4300_v5  ;;  %v4307_v3 = vor.u32 %v5325_v44, %v4306_v9  ;;  %v5084_v37 = vld [vmem:[%s8333_s3 + $0x7f0] sm:$0xf0]  ;;  %v5471_v44 = vld [vmem:[%s8333_s3 + $0x67c] sm:$0xf] }
 0x104   : > { %2489 = vmatpush.bf16.msra.mxu3 %v4695_v2  ;;  %v7452_v2 = vpop.permute.xlu2 %2713  ;;  %5658 = vset.pattern.permute.xlu1 %v5803_v16  ;;  %v5503_v16 = vld [vmem:[%s8333_s3 + $0x77c] sm:$0xf]  ;;  %v5087_v58 = vor.u32 %v5502_v35, %v5084_v37  ;;  %v5806_v5 = vmov 25   ;;  %v4956_v47 = vld [vmem:[%s8333_s3 + $0x6f0] sm:$0xf0]  ;;  %v5807_v21 = vmov 24  }
 0x105   : > { %v2706_v7 = vadd.f32 %v2704_v63, %v2694_v33  ;;  %v4179_v33 = vor.u32 %v5293_v25, %v4178_v36  ;;  %2905 = vperm.xlu1 %5658, %v6920_v32   ;;  %5654 = vset.pattern.permute.xlu2 %v5804_v8  ;;  %v5487_v8 = vld [vmem:[%s8333_s3 + $0x6f4] sm:$0xf0]  ;;  %v4964_v63 = vld [vmem:[%s8333_s3 + $0x6f8] sm:$0xf0]  ;;  %v4959_v34 = vor.u32 %v5470_v38, %v4956_v47 }
 0x106   : > { %2448 = vmatpush.bf16.msra.mxu0 %v4555_v19  ;;  %2462 = vmatpush.bf16.msra.mxu1 %v4559_v57  ;;  %v5292_v19 = vld [vmem:[%s8333_s3 + $0xdc] sm:$0xf0]  ;;  %v2683_v57 = vadd.f32 %v2681_v17, %v7294_v49  ;;  %v2217_v49 = vpop.f32.mrf.mxu3  ;;  %v7497_v53 = vpop.permute.xlu1 %2725  ;;  %v5454_v17 = vld [vmem:[%s8333_s3 + $0x5ec] sm:$0xf0]  ;;  %v4967_v6 = vor.u32 %v5471_v44, %v4964_v63  ;;  %v5407_v37 = vld [vmem:[%s8333_s3 + $0x47c] sm:$0xf] }
 0x107   : > { %2476 = vmatpush.bf16.msra.mxu2 %v4563_v13  ;;  %v2203_v13 = vpop.f32.mrf.mxu2  ;;  %v4171_v41 = vor.u32 %v5292_v19, %v4170_v40  ;;  %5662 = vset.pattern.permute.xlu0 %v5806_v5  ;;  %v4828_v40 = vld [vmem:[%s8333_s3 + $0x5f0] sm:$0xf0]  ;;  %v4834_v19 = vld [vmem:[%s8333_s3 + $0x578] sm:$0xf]  ;;  %v4827_v50 = vor.u32 %v5454_v17, %v4826_v11  ;;  %v4580_v38 = vld [vmem:[%s8333_s3 + $0x3f8] sm:$0xf0] }
 0x108   : > { %2490 = vmatpush.bf16.msra.mxu3 %v4567_v28  ;;  %v7484_v28 = vadd.f32 %v2716_v18, %v2706_v7  ;;  %v2204_v12 = vadd.f32 %v2203_v13, %v764_v23  ;;  %v2218_v23 = vadd.f32 %v2217_v49, %v765_v22  ;;  %v2695_v61 = vadd.f32 %v2693_v29, %v2683_v57  ;;  %v5438_v18 = vld [vmem:[%s8333_s3 + $0x574] sm:$0xf]  ;;  %v5439_v7 = vld [vmem:[%s8333_s3 + $0x57c] sm:$0xf]  ;;  %v4698_v13 = vld [vmem:[%s8333_s3 + $0x470] sm:$0xf] }
 0x109   : > { %2881 = vperm.xlu2 %5654, %v6920_v32   ;;  %v4835_v57 = vor.u32 %v5455_v20, %v4834_v19  ;;  %v4700_v29 = vld [vmem:[%s8333_s3 + $0x4f0] sm:$0xf0]  ;;  %v5423_v49 = vld [vmem:[%s8333_s3 + $0x4f4] sm:$0xf0]  ;;  %2929 = vperm.xlu0 %5662, %v7604_v31   ;;  %v5808_v20 = vmov 26  }
 0x10a   : > { %2449 = vmatpush.bf16.msra.mxu0 %v4427_v43  ;;  %2463 = vmatpush.bf16.msra.mxu1 %v4431_v60  ;;  %v5519_v43 = vld [vmem:[%s8333_s3 + $0x7f4] sm:$0xf0]  ;;  %v2594_v14 = vmax.f32 %v2204_v12, 0.0  ;;  %v2595_v22 = vmax.f32 %v2218_v23, 0.0  ;;  %v4954_v60 = vld [vmem:[%s8333_s3 + $0x670] sm:$0xf] }
 0x10b   : > { %2477 = vmatpush.bf16.msra.mxu2 %v4435_v4  ;;  %v5091_v30 = vor.u32 %v5519_v43, %v5090_v42  ;;  %v5486_v4 = vld [vmem:[%s8333_s3 + $0x6ec] sm:$0xf0]  ;;  %v4706_v12 = vld [vmem:[%s8333_s3 + $0x478] sm:$0xf]  ;;  %v4708_v23 = vld [vmem:[%s8333_s3 + $0x4f8] sm:$0xf0] }
 0x10c   : > { %2491 = vmatpush.bf16.msra.mxu3 %v4439_v48  ;;  %v2705_v62 = vmul.f32 %v7372_v15, %v2594_v14  ;;  %v7526_v1 = vpop.permute.xlu2 %2733  ;;  %v5095_v15 = vor.u32 %v5503_v16, %v5092_v51  ;;  %v2717_v46 = vmul.f32 %v7452_v2, %v2595_v22  ;;  %v4962_v48 = vld [vmem:[%s8333_s3 + $0x678] sm:$0xf]  ;;  %v4955_v10 = vor.u32 %v5486_v4, %v4954_v60  ;;  %v2722_v51 = vpop.permute.xlu0 %2721  ;;  %v5390_v22 = vld [vmem:[%s8333_s3 + $0x3ec] sm:$0xf0]  ;;  %v5375_v4 = vld [vmem:[%s8333_s3 + $0x37c] sm:$0xf] }
 0x10d   : > { %v4963_v2 = vor.u32 %v5487_v8, %v4962_v48  ;;  %5660 = vset.pattern.permute.xlu1 %v5807_v21  ;;  %v4699_v14 = vor.u32 %v5422_v24, %v4698_v13  ;;  %v4707_v16 = vor.u32 %v5423_v49, %v4706_v12  ;;  %v4442_v8 = vld [vmem:[%s8333_s3 + $0x270] sm:$0xf]  ;;  %v4583_v17 = vor.u32 %v5375_v4, %v4580_v38  ;;  %v5359_v19 = vld [vmem:[%s8333_s3 + $0x2f4] sm:$0xf0]  ;;  %v5310_v49 = vld [vmem:[%s8333_s3 + $0x174] sm:$0xf] }
 0x10e   : > { %2450 = vmatpush.bf16.msra.mxu0 %v4299_v0  ;;  %2464 = vmatpush.bf16.msra.mxu1 %v4303_v56  ;;  %v2707_v9 = vadd.f32 %v2705_v62, %v2695_v61  ;;  %v7560_v0 = vld [vmem:[%s8334_s4 + $0x8] sm:$0xff]  ;;  %v4836_v56 = vld [vmem:[%s8333_s3 + $0x5f8] sm:$0xf0]  ;;  %v4711_v61 = vor.u32 %v5407_v37, %v4708_v23  ;;  %v4578_v62 = vld [vmem:[%s8333_s3 + $0x378] sm:$0xf] }
 0x10f   : > { %2478 = vmatpush.bf16.msra.mxu2 %v4307_v3  ;;  %v7580_v3 = vpop.permute.xlu1 %2737  ;;  %v766_v36 = vperm.slane %v7560_v0, 0  ;;  %v767_v25 = vperm.slane %v7560_v0, 1  ;;  %v4839_v27 = vor.u32 %v5439_v7, %v4836_v56  ;;  %2917 = vperm.xlu1 %5660, %v7604_v31   ;;  %v769_v48 = vperm.slane %v7560_v0, 3  ;;  %v5326_v12 = vld [vmem:[%s8333_s3 + $0x1ec] sm:$0xf0] }
 0x110   : > { %2492 = vmatpush.bf16.msra.mxu3 %v4311_v26  ;;  %v7549_v32 = vadd.f32 %v2717_v46, %v2707_v9  ;;  %v4831_v26 = vor.u32 %v5438_v18, %v4828_v40  ;;  %v5358_v9 = vld [vmem:[%s8333_s3 + $0x2ec] sm:$0xf0]  ;;  %v4450_v40 = vld [vmem:[%s8333_s3 + $0x278] sm:$0xf] }
 0x111   : > { %5656 = vset.pattern.permute.xlu2 %v5805_v39  ;;  %v4443_v56 = vor.u32 %v5358_v9, %v4442_v8  ;;  %v4451_v23 = vor.u32 %v5359_v19, %v4450_v40  ;;  %v5294_v4 = vld [vmem:[%s8333_s3 + $0xec] sm:$0xf0] }
 0x112   : > { %2451 = vmatpush.bf16.msra.mxu0 %v4171_v41  ;;  %2465 = vmatpush.bf16.msra.mxu1 %v4175_v45  ;;  %v2229_v35 = vpop.f32.mrf.mxu0  ;;  %v2243_v43 = vpop.f32.mrf.mxu1  ;;  %v4570_v45 = vld [vmem:[%s8333_s3 + $0x370] sm:$0xf] }
 0x113   : > { %2479 = vmatpush.bf16.msra.mxu2 %v4179_v33  ;;  %v2230_v42 = vadd.f32 %v2229_v35, %v766_v36  ;;  %2893 = vperm.xlu2 %5656, %v7604_v31   ;;  %v2244_v33 = vadd.f32 %v2243_v43, %v767_v25  ;;  %v4571_v47 = vor.u32 %v5390_v22, %v4570_v45  ;;  %v4322_v43 = vld [vmem:[%s8333_s3 + $0x178] sm:$0xf]  ;;  %v5311_v22 = vld [vmem:[%s8333_s3 + $0x17c] sm:$0xf] }
 0x114   : > { %2493 = vmatpush.bf16.msra.mxu3 %v4183_v54  ;;  %v7614_v41 = vpop.permute.xlu2 %2745  ;;  %v5374_v54 = vld [vmem:[%s8333_s3 + $0x374] sm:$0xf]  ;;  %v2750_v40 = vpop.permute.xlu0 %2749 }
 0x115   : > { %2452 = vmatmul.bf16.vlgmr.msra.gmra.mxu0 %v7048_v52  ;;  %2466 = vmatmul.bf16.vlgmr.msra.gmra.mxu1 %v7048_v52  ;;  %v2565_v60 = vmax.f32 %v2244_v33, 0.0 }
 0x116   : > { %2500 = vmatpush.bf16.msrb.mxu0 %v5083_v55  ;;  %2514 = vmatpush.bf16.msrb.mxu1 %v5087_v58  ;;  %v4572_v55 = vld [vmem:[%s8333_s3 + $0x3f0] sm:$0xf0]  ;;  %v2564_v58 = vmax.f32 %v2230_v42, 0.0 }
 0x117   : > { %2528 = vmatpush.bf16.msrb.mxu2 %v5091_v30  ;;  %2494 = vmatmul.bf16.vlgmr.msra.gmra.mxu3 %v7048_v52  ;;  %v5391_v30 = vld [vmem:[%s8333_s3 + $0x3f4] sm:$0xf0]  ;;  %v4575_v44 = vor.u32 %v5374_v54, %v4572_v55  ;;  %v2758_v11 = vpop.permute.xlu1 %2757  ;;  %v4316_v42 = vld [vmem:[%s8333_s3 + $0x1f0] sm:$0xf0]  ;;  %v4324_v54 = vld [vmem:[%s8333_s3 + $0x1f8] sm:$0xf0] }
 0x118   : > { %2542 = vmatpush.bf16.msrb.mxu3 %v5095_v15  ;;  %2480 = vmatmul.bf16.vlgmr.msra.gmra.mxu2 %v7048_v52  ;;  %v5406_v52 = vld [vmem:[%s8333_s3 + $0x474] sm:$0xf]  ;;  %v768_v15 = vperm.slane %v7560_v0, 2  ;;  %v2728_v46 = vmul.f32 %v2722_v51, %v2564_v58  ;;  %v4579_v63 = vor.u32 %v5391_v30, %v4578_v62  ;;  %v5809_v55 = vmov 28  }
 0x119   : > { %v4703_v39 = vor.u32 %v5406_v52, %v4700_v29  ;;  %5663 = vset.pattern.permute.xlu1 %v5808_v20  ;;  %v4314_v29 = vld [vmem:[%s8333_s3 + $0x170] sm:$0xf]  ;;  %5667 = vset.pattern.permute.xlu0 %v5809_v55  ;;  %v4319_v62 = vor.u32 %v5310_v49, %v4316_v42  ;;  %v4327_v8 = vor.u32 %v5311_v22, %v4324_v54 }
 0x11a   : > { %2501 = vmatpush.bf16.msrb.mxu0 %v4955_v10  ;;  %2515 = vmatpush.bf16.msrb.mxu1 %v4959_v34  ;;  %v5342_v10 = vld [vmem:[%s8333_s3 + $0x274] sm:$0xf]  ;;  %v2740_v34 = vmul.f32 %v7526_v1, %v2565_v60  ;;  %v2231_v1 = vpop.f32.mrf.mxu0  ;;  %v2271_v7 = vpop.f32.mrf.mxu3  ;;  %v4186_v60 = vld [vmem:[%s8333_s3 + $0x70] sm:$0xf] }
 0x11b   : > { %2529 = vmatpush.bf16.msrb.mxu2 %v4963_v2  ;;  %v2730_v2 = vadd.f32 %v2728_v46, %v7484_v28  ;;  %v2257_v18 = vpop.f32.mrf.mxu2  ;;  %v2232_v13 = vadd.f32 %v2231_v1, %v766_v36  ;;  %v2245_v24 = vpop.f32.mrf.mxu1  ;;  %v2272_v52 = vadd.f32 %v2271_v7, %v769_v48  ;;  %5659 = vset.pattern.permute.xlu2 %v5807_v21 }
 0x11c   : > { %2543 = vmatpush.bf16.msrb.mxu3 %v4967_v6  ;;  %v4444_v6 = vld [vmem:[%s8333_s3 + $0x2f0] sm:$0xf0]  ;;  %v2258_v28 = vadd.f32 %v2257_v18, %v768_v15  ;;  %v2246_v35 = vadd.f32 %v2245_v24, %v767_v25  ;;  %v5811_v24 = vmov 30  }
 0x11d   : > { %v4447_v37 = vor.u32 %v5342_v10, %v4444_v6  ;;  %v2596_v45 = vmax.f32 %v2232_v13, 0.0  ;;  %v2567_v33 = vmax.f32 %v2272_v52, 0.0  ;;  %v5295_v10 = vld [vmem:[%s8333_s3 + $0xf4] sm:$0xf0]  ;;  %v4187_v6 = vor.u32 %v5294_v4, %v4186_v60 }
 0x11e   : > { %2502 = vmatpush.bf16.msrb.mxu0 %v4827_v50  ;;  %2516 = vmatpush.bf16.msrb.mxu1 %v4831_v26  ;;  %v5343_v50 = vld [vmem:[%s8333_s3 + $0x27c] sm:$0xf]  ;;  %v2566_v36 = vmax.f32 %v2258_v28, 0.0  ;;  %v2597_v25 = vmax.f32 %v2246_v35, 0.0 }
 0x11f   : > { %2530 = vmatpush.bf16.msrb.mxu2 %v4835_v57  ;;  %v4452_v26 = vld [vmem:[%s8333_s3 + $0x2f8] sm:$0xf0]  ;;  %v7677_v57 = vld [vmem:[#allocation3] sm:$0xff]  ;;  %v2729_v58 = vmul.f32 %v7497_v53, %v2596_v45  ;;  %v2764_v21 = vmul.f32 %v2758_v11, %v2567_v33  ;;  %v7725_v38 = vpop.permute.xlu1 %2769 }
 0x120   : > { %2544 = vmatpush.bf16.msrb.mxu3 %v4839_v27  ;;  %2937 = vperm.xlu1 %5663, %v7677_v57   ;;  %v2742_v27 = vadd.f32 %v2740_v34, %v2730_v2  ;;  %v2752_v51 = vmul.f32 %v7614_v41, %v2566_v36  ;;  %v5278_v53 = vld [vmem:[%s8333_s3 + $0x74] sm:$0xf]  ;;  %v5279_v34 = vld [vmem:[%s8333_s3 + $0x7c] sm:$0xf] }
 0x121   : > { %2913 = vperm.xlu2 %5659, %v7677_v57   ;;  %2961 = vperm.xlu0 %5667, %v7677_v57   ;;  %v2731_v46 = vadd.f32 %v2729_v58, %v7549_v32  ;;  %v4196_v2 = vld [vmem:[%s8333_s3 + $0xf8] sm:$0xf0] }
 0x122   : > { %2503 = vmatpush.bf16.msrb.mxu0 %v4699_v14  ;;  %2517 = vmatpush.bf16.msrb.mxu1 %v4703_v39  ;;  %v2762_v14 = vpop.permute.xlu2 %2761  ;;  %v4455_v39 = vor.u32 %v5343_v50, %v4452_v26  ;;  %v2754_v41 = vadd.f32 %v2752_v51, %v2742_v27  ;;  %v5693_v27 = vld [vmem:[%s5909_s23] sm:$0xff] }
 0x123   : > { %2531 = vmatpush.bf16.msrb.mxu2 %v4707_v16  ;;  %v5327_v16 = vld [vmem:[%s8333_s3 + $0x1f4] sm:$0xf0]  ;;  %v2259_v9 = vpop.f32.mrf.mxu2 }
 0x124   : > { %2545 = vmatpush.bf16.msrb.mxu3 %v4711_v61  ;;  %v4315_v61 = vor.u32 %v5326_v12, %v4314_v29  ;;  %v4323_v30 = vor.u32 %v5327_v16, %v4322_v43  ;;  %v7738_v11 = vadd.f32 %v2764_v21, %v2754_v41  ;;  %v2260_v32 = vadd.f32 %v2259_v9, %v768_v15 }
 0x125   : > { %v771_v12 = vperm.slane %v7560_v0, 5  ;;  %v773_v16 = vperm.slane %v7560_v0, 7 }
 0x126   : > { %2504 = vmatpush.bf16.msrb.mxu0 %v4571_v47  ;;  %2518 = vmatpush.bf16.msrb.mxu1 %v4575_v44  ;;  %v2741_v47 = vmul.f32 %v7580_v3, %v2597_v25  ;;  %v4188_v44 = vld [vmem:[%s8333_s3 + $0xf0] sm:$0xf0]  ;;  %v2273_v3 = vpop.f32.mrf.mxu3  ;;  %v2598_v15 = vmax.f32 %v2260_v32, 0.0 }
 0x127   : > { %2532 = vmatpush.bf16.msrb.mxu2 %v4579_v63  ;;  %v4194_v63 = vld [vmem:[%s8333_s3 + $0x78] sm:$0xf]  ;;  %v2274_v18 = vadd.f32 %v2273_v3, %v769_v48  ;;  %v4191_v28 = vor.u32 %v5278_v53, %v4188_v44  ;;  %v2786_v29 = vpop.permute.xlu1 %2785 }
 0x128   : > { %2546 = vmatpush.bf16.msrb.mxu3 %v4583_v17  ;;  %v5810_v17 = vmov 27   ;;  %v2743_v19 = vadd.f32 %v2741_v47, %v2731_v46  ;;  %v4195_v1 = vor.u32 %v5295_v10, %v4194_v63  ;;  %v2753_v50 = vmul.f32 %v2750_v40, %v2598_v15  ;;  %v7778_v15 = vld [vmem:[%s8334_s4 + $0x10] sm:$0xff] }
 0x129   : > { %5665 = vset.pattern.permute.xlu1 %v5810_v17  ;;  %v2599_v7 = vmax.f32 %v2274_v18, 0.0  ;;  %5661 = vset.pattern.permute.xlu2 %v5806_v5  ;;  %v770_v5 = vperm.slane %v7560_v0, 4 }
 0x12a   : > { %2505 = vmatpush.bf16.msrb.mxu0 %v4443_v56  ;;  %2519 = vmatpush.bf16.msrb.mxu1 %v4447_v37  ;;  %v4199_v56 = vor.u32 %v5279_v34, %v4196_v2  ;;  %v2774_v26 = vpop.permute.xlu2 %2773  ;;  %v2755_v48 = vadd.f32 %v2753_v50, %v2743_v19 }
 0x12b   : > { %2533 = vmatpush.bf16.msrb.mxu2 %v4451_v23  ;;  %2949 = vperm.xlu1 %5665, %v7677_v57   ;;  %v2765_v13 = vmul.f32 %v2762_v14, %v2599_v7  ;;  %v772_v14 = vperm.slane %v7560_v0, 6 }
 0x12c   : > { %2547 = vmatpush.bf16.msrb.mxu3 %v4455_v39  ;;  %2925 = vperm.xlu2 %5661, %v7677_v57   ;;  %v2782_v39 = vpop.permute.xlu0 %2781 }
 0x12d   : > { %5672 = vset.pattern.permute.xlu0 %v5811_v24  ;;  %v2767_v52 = vadd.f32 %v2765_v13, %v2755_v48 }
 0x12e   : > { %2506 = vmatpush.bf16.msrb.mxu0 %v4315_v61  ;;  %2520 = vmatpush.bf16.msrb.mxu1 %v4319_v62 }
 0x12f   : > { %2534 = vmatpush.bf16.msrb.mxu2 %v4323_v30  ;;  %2989 = vperm.xlu0 %5672, %v7604_v31   ;;  %v2798_v45 = vpop.permute.xlu1 %2797 }
 0x130   : > { %2548 = vmatpush.bf16.msrb.mxu3 %v4327_v8 }
 0x132   : > { %2507 = vmatpush.bf16.msrb.mxu0 %v4187_v6  ;;  %2521 = vmatpush.bf16.msrb.mxu1 %v4191_v28  ;;  %v2285_v49 = vpop.f32.mrf.mxu0  ;;  %v2794_v36 = vpop.permute.xlu2 %2793  ;;  %v774_v28 = vperm.slane %v7778_v15, 0 }
 0x133   : > { %2535 = vmatpush.bf16.msrb.mxu2 %v4195_v1  ;;  %5668 = vset.pattern.permute.xlu1 %v5809_v55  ;;  %v2286_v35 = vadd.f32 %v2285_v49, %v770_v5  ;;  %v2299_v37 = vpop.f32.mrf.mxu1 }
 0x134   : > { %2549 = vmatpush.bf16.msrb.mxu3 %v4199_v56  ;;  %2965 = vperm.xlu1 %5668, %v7604_v31   ;;  %v2300_v23 = vadd.f32 %v2299_v37, %v771_v12 }
 0x135   : > { %2508 = vmatmul.bf16.vlgmr.msrb.gmra.mxu0 %v5693_v27  ;;  %2522 = vmatmul.bf16.vlgmr.msrb.gmra.mxu1 %v5693_v27  ;;  %v2568_v42 = vmax.f32 %v2286_v35, 0.0 }
 0x136   : > { %2536 = vmatmul.bf16.vlgmr.msrb.gmra.mxu2 %v5693_v27  ;;  %5664 = vset.pattern.permute.xlu2 %v5808_v20  ;;  %v2569_v43 = vmax.f32 %v2300_v23, 0.0  ;;  %v5812_v20 = vmov 29  }
 0x137   : > { %2550 = vmatmul.bf16.vlgmr.msrb.gmra.mxu3 %v5693_v27  ;;  %2941 = vperm.xlu2 %5664, %v7604_v31   ;;  %v2776_v33 = vmul.f32 %v7725_v38, %v2568_v42  ;;  %v2818_v44 = vpop.permute.xlu1 %2817 }
 0x138   : > { %5677 = vset.pattern.permute.xlu0 %v5783_v59  ;;  %v2788_v22 = vmul.f32 %v2782_v39, %v2569_v43 }
 0x139   : > { %v2778_v25 = vadd.f32 %v2776_v33, %v7738_v11  ;;  %v5813_v11 = vmov 31  }
 0x13a   : > { %v2287_v55 = vpop.f32.mrf.mxu0  ;;  %v2327_v58 = vpop.f32.mrf.mxu3 }
 0x13b   : > { %v2313_v51 = vpop.f32.mrf.mxu2  ;;  %v2288_v21 = vadd.f32 %v2287_v55, %v770_v5  ;;  %v2301_v61 = vpop.f32.mrf.mxu1  ;;  %v2328_v41 = vadd.f32 %v2327_v58, %v773_v16  ;;  %v2790_v53 = vadd.f32 %v2788_v22, %v2778_v25  ;;  %v775_v55 = vperm.slane %v7778_v15, 1 }
 0x13c   : > { %5670 = vset.pattern.permute.xlu1 %v5812_v20  ;;  %v2314_v54 = vadd.f32 %v2313_v51, %v772_v14  ;;  %v2302_v0 = vadd.f32 %v2301_v61, %v771_v12  ;;  %v2806_v30 = vpop.permute.xlu2 %2805  ;;  %v776_v58 = vperm.slane %v7778_v15, 2  ;;  %v5527_v61 = vld [vmem:[%s8337_s8 + $0x38] sm:$0xff] }
 0x13d   : > { %2977 = vperm.xlu1 %5670, %v7604_v31   ;;  %v2600_v60 = vmax.f32 %v2288_v21, 0.0  ;;  %v2571_v4 = vmax.f32 %v2328_v41, 0.0  ;;  %3113 = vmatpush.bf16.msra.mxu0 %v5527_v61 }
 0x13e   : > { %v2570_v62 = vmax.f32 %v2314_v54, 0.0  ;;  %v2601_v46 = vmax.f32 %v2302_v0, 0.0 }
 0x13f   : > { %5666 = vset.pattern.permute.xlu2 %v5810_v17  ;;  %v2777_v47 = vmul.f32 %v2774_v26, %v2600_v60  ;;  %v2812_v8 = vmul.f32 %v2806_v30, %v2571_v4  ;;  %v7773_v19 = vpop.permute.xlu1 %2829  ;;  %v777_v30 = vperm.slane %v7778_v15, 3 }
 0x140   : > { %2953 = vperm.xlu2 %5666, %v7604_v31   ;;  %v2800_v38 = vmul.f32 %v2794_v36, %v2570_v62  ;;  %v2789_v10 = vmul.f32 %v2786_v29, %v2601_v46  ;;  %v2810_v29 = vpop.permute.xlu0 %2809  ;;  %v5526_v46 = vld [vmem:[%s8337_s8 + $0x30] sm:$0xff] }
 0x141   : > { %v2779_v63 = vadd.f32 %v2777_v47, %v2767_v52  ;;  %3114 = vmatpush.bf16.msra.mxu0 %v5526_v46 }
 0x142   : > { %v2802_v9 = vadd.f32 %v2800_v38, %v2790_v53  ;;  %v2329_v1 = vpop.f32.mrf.mxu3  ;;  %v778_v38 = vperm.slane %v7778_v15, 4 }
 0x143   : > { %v2315_v32 = vpop.f32.mrf.mxu2  ;;  %v2791_v2 = vadd.f32 %v2789_v10, %v2779_v63  ;;  %v2330_v56 = vadd.f32 %v2329_v1, %v773_v16 }
 0x144   : > { %v2814_v3 = vadd.f32 %v2812_v8, %v2802_v9  ;;  %v2316_v34 = vadd.f32 %v2315_v32, %v772_v14  ;;  %v2822_v40 = vpop.permute.xlu2 %2821  ;;  %v5525_v32 = vld [vmem:[%s8337_s8 + $0x28] sm:$0xff] }
 0x145   : > { %5673 = vset.pattern.permute.xlu1 %v5813_v11  ;;  %v2603_v52 = vmax.f32 %v2330_v56, 0.0  ;;  %3115 = vmatpush.bf16.msra.mxu0 %v5525_v32 }
 0x146   : > { %2997 = vperm.xlu1 %5673, %v7677_v57   ;;  %v2602_v17 = vmax.f32 %v2316_v34, 0.0 }
 0x147   : > { %v2813_v12 = vmul.f32 %v2810_v29, %v2603_v52  ;;  %v781_v29 = vperm.slane %v7778_v15, 7 }
 0x148   : > { %5669 = vset.pattern.permute.xlu2 %v5812_v20  ;;  %v2801_v18 = vmul.f32 %v2798_v45, %v2602_v17  ;;  %v2842_v53 = vpop.permute.xlu0 %2841 }
 0x149   : > { %2973 = vperm.xlu2 %5669, %v7677_v57  }
 0x14a   : > { %v2803_v6 = vadd.f32 %v2801_v18, %v2791_v2  ;;  %v779_v2 = vperm.slane %v7778_v15, 5 }
 0x14c   : > { %v7784_v26 = vpop.permute.xlu2 %2833  ;;  %v2815_v35 = vadd.f32 %v2813_v12, %v2803_v6 }
 0x14d   : > { %v7786_v48 = vpop.permute.xlu1 %2845 }
 0x14e   : > { %5675 = vset.pattern.permute.xlu1 %v5783_v59 }
 0x150   : > { %v2870_v56 = vpop.permute.xlu0 %2869 }
 0x151   : > { %5671 = vset.pattern.permute.xlu2 %v5811_v24 }
 0x152   : > { %2985 = vperm.xlu2 %5671, %v7677_v57   ;;  %v2341_v7 = vpop.f32.mrf.mxu0  ;;  %v2355_v33 = vpop.f32.mrf.mxu1 }
 0x153   : > { %v2342_v50 = vadd.f32 %v2341_v7, %v774_v28  ;;  %v2356_v62 = vadd.f32 %v2355_v33, %v775_v55 }
 0x154   : > { %v2854_v36 = vpop.permute.xlu2 %2853 }
 0x155   : > { %v2572_v13 = vmax.f32 %v2342_v50, 0.0  ;;  %v2573_v47 = vmax.f32 %v2356_v62, 0.0 }
 0x157   : > { %v2824_v27 = vmul.f32 %v2818_v44, %v2572_v13  ;;  %v7789_v23 = vpop.permute.xlu1 %2857  ;;  %v2836_v17 = vmul.f32 %v7773_v19, %v2573_v47  ;;  %v5524_v13 = vld [vmem:[%s8337_s8 + $0x20] sm:$0xff] }
 0x158   : > { %3116 = vmatpush.bf16.msra.mxu0 %v5524_v13 }
 0x159   : > { %v2826_v24 = vadd.f32 %v2824_v27, %v2814_v3 }
 0x15a   : > { %5674 = vset.pattern.permute.xlu2 %v5813_v11  ;;  %v2343_v5 = vpop.f32.mrf.mxu0  ;;  %v2383_v20 = vpop.f32.mrf.mxu3 }
 0x15b   : > { %3001 = vperm.xlu2 %5674, %v7604_v31   ;;  %v2344_v49 = vadd.f32 %v2343_v5, %v774_v28  ;;  %v2369_v39 = vpop.f32.mrf.mxu2  ;;  %v2357_v51 = vpop.f32.mrf.mxu1  ;;  %v2384_v9 = vadd.f32 %v2383_v20, %v777_v30  ;;  %v2838_v1 = vadd.f32 %v2836_v17, %v2826_v24  ;;  %v7837_v5 = vld [vmem:[%s8334_s4 + $0x18] sm:$0xff] }
 0x15c   : > { %v7794_v43 = vpop.permute.xlu2 %2865  ;;  %v2370_v0 = vadd.f32 %v2369_v39, %v776_v58  ;;  %v2358_v3 = vadd.f32 %v2357_v51, %v775_v55  ;;  %v782_v51 = vperm.slane %v7837_v5, 0  ;;  %v783_v47 = vperm.slane %v7837_v5, 1  ;;  %v2902_v32 = vpop.permute.xlu0 %2901 }
 0x15d   : > { %v2604_v57 = vmax.f32 %v2344_v49, 0.0  ;;  %v2575_v18 = vmax.f32 %v2384_v9, 0.0 }
 0x15e   : > { %v2574_v8 = vmax.f32 %v2370_v0, 0.0  ;;  %v2605_v52 = vmax.f32 %v2358_v3, 0.0  ;;  %v784_v3 = vperm.slane %v7837_v5, 2 }
 0x15f   : > { %v2825_v37 = vmul.f32 %v2822_v40, %v2604_v57  ;;  %v780_v40 = vperm.slane %v7778_v15, 6  ;;  %v2860_v49 = vmul.f32 %v2854_v36, %v2575_v18 }
 0x160   : > { %v2848_v6 = vmul.f32 %v2842_v53, %v2574_v8 }
 0x161   : > { %v7792_v42 = vadd.f32 %v2825_v37, %v2815_v35  ;;  %v7796_v14 = vpop.permute.xlu1 %2877 }
 0x162   : > { %v2385_v21 = vpop.f32.mrf.mxu3  ;;  %v2850_v12 = vadd.f32 %v2848_v6, %v2838_v1 }
 0x163   : > { %5676 = vset.pattern.permute.xlu2 %v5783_v59  ;;  %v2371_v22 = vpop.f32.mrf.mxu2  ;;  %v2386_v35 = vadd.f32 %v2385_v21, %v777_v30 }
 0x164   : > { %v7798_v45 = vpop.permute.xlu2 %2881  ;;  %v2372_v34 = vadd.f32 %v2371_v22, %v776_v58  ;;  %v5523_v22 = vld [vmem:[%s8337_s8 + $0x18] sm:$0xff]  ;;  %v2862_v58 = vadd.f32 %v2860_v49, %v2850_v12 }
 0x165   : > { %3117 = vmatpush.bf16.msra.mxu0 %v5523_v22  ;;  %v2607_v0 = vmax.f32 %v2386_v35, 0.0 }
 0x166   : > { %v2606_v27 = vmax.f32 %v2372_v34, 0.0  ;;  %v3009_v34 = vld [vmem:[#allocation2 + $0x8] sm:$0xff] }
 0x167   : > { %v2861_v17 = vmul.f32 %v7789_v23, %v2607_v0 }
 0x168   : > { %v2849_v55 = vmul.f32 %v7786_v48, %v2606_v27 }
 0x16d   : > { %v7800_v31 = vpop.permute.xlu1 %2889  ;;  %v7802_v16 = vpop.permute.xlu2 %2893 }
 0x172   : > { %v2397_v59 = vpop.f32.mrf.mxu0  ;;  %v2411_v60 = vpop.f32.mrf.mxu1 }
 0x173   : > { %v2398_v11 = vadd.f32 %v2397_v59, %v778_v38  ;;  %v2412_v24 = vadd.f32 %v2411_v60, %v779_v2  ;;  %v2837_v59 = vmul.f32 %v7784_v26, %v2605_v52  ;;  %v5522_v26 = vld [vmem:[%s8337_s8 + $0x10] sm:$0xff] }
 0x174   : > { %3118 = vmatpush.bf16.msra.mxu0 %v5522_v26 }
 0x175   : > { %v2576_v7 = vmax.f32 %v2398_v11, 0.0  ;;  %v2577_v61 = vmax.f32 %v2412_v24, 0.0  ;;  %v5520_v24 = vld [vmem:[%s8337_s8] sm:$0xff] }
 0x177   : > { %v7804_v25 = vpop.permute.xlu1 %2905  ;;  %v2872_v39 = vmul.f32 %v7794_v43, %v2576_v7  ;;  %v2839_v43 = vadd.f32 %v2837_v59, %v7792_v42  ;;  %v5678_v42 = vld [vmem:[%s8335_s5] ss:$0 sm:$0xff] }
 0x178   : > { %v3015_v6 = vmul.f32 %v5678_v42, %v3009_v34 }
 0x179   : > { %v2874_v60 = vadd.f32 %v2872_v39, %v2862_v58  ;;  %v2851_v48 = vadd.f32 %v2849_v55, %v2839_v43 }
 0x17a   : > { %v2439_v44 = vpop.f32.mrf.mxu3  ;;  %v2399_v63 = vpop.f32.mrf.mxu0 }
 0x17b   : > { %v7806_v54 = vpop.permute.xlu2 %2913  ;;  %v2425_v4 = vpop.f32.mrf.mxu2  ;;  %v2400_v37 = vadd.f32 %v2399_v63, %v778_v38  ;;  %v2440_v62 = vadd.f32 %v2439_v44, %v781_v29  ;;  %v2884_v44 = vmul.f32 %v7796_v14, %v2577_v61  ;;  %v5521_v14 = vld [vmem:[%s8337_s8 + $0x8] sm:$0xff]  ;;  %v2863_v13 = vadd.f32 %v2861_v17, %v2851_v48 }
 0x17c   : > { %v2413_v50 = vpop.f32.mrf.mxu1  ;;  %v2426_v57 = vadd.f32 %v2425_v4, %v780_v40  ;;  %3119 = vmatpush.bf16.msra.mxu0 %v5521_v14  ;;  %v2930_v0 = vpop.permute.xlu0 %2929  ;;  %v789_v14 = vperm.slane %v7837_v5, 7 }
 0x17d   : > { %v2608_v30 = vmax.f32 %v2400_v37, 0.0  ;;  %v2414_v38 = vadd.f32 %v2413_v50, %v779_v2  ;;  %v2579_v63 = vmax.f32 %v2440_v62, 0.0  ;;  %v3008_v2 = vld [vmem:[#allocation2] sm:$0xff]  ;;  %v2886_v1 = vadd.f32 %v2884_v44, %v2874_v60 }
 0x17e   : > { %v2578_v21 = vmax.f32 %v2426_v57, 0.0 }
 0x17f   : > { %v2873_v18 = vmul.f32 %v2870_v56, %v2608_v30  ;;  %v2908_v23 = vmul.f32 %v2902_v32, %v2579_v63 }
 0x180   : > { %v2896_v11 = vmul.f32 %v7800_v31, %v2578_v21  ;;  %v2609_v31 = vmax.f32 %v2414_v38, 0.0  ;;  %3120 = vmatpush.bf16.msra.mxu0 %v5520_v24 }
 0x181   : > { %v7813_v41 = vpop.permute.xlu1 %2917  ;;  %v2875_v57 = vadd.f32 %v2873_v18, %v2863_v13 }
 0x182   : > { %v2441_v20 = vpop.f32.mrf.mxu3  ;;  %v2898_v12 = vadd.f32 %v2896_v11, %v2886_v1  ;;  %v2885_v22 = vmul.f32 %v7798_v45, %v2609_v31  ;;  %v786_v45 = vperm.slane %v7837_v5, 4 }
 0x183   : > { %v2427_v19 = vpop.f32.mrf.mxu2  ;;  %v2442_v35 = vadd.f32 %v2441_v20, %v781_v29 }
 0x184   : > { %v2428_v46 = vadd.f32 %v2427_v19, %v780_v40  ;;  %v3014_v40 = vmul.f32 %v5678_v42, %v3008_v2  ;;  %v785_v19 = vperm.slane %v7837_v5, 3  ;;  %3018 = vadd.xlane.f32.xlu2 %v3015_v6  ;;  %v2910_v61 = vadd.f32 %v2908_v23, %v2898_v12 }
 0x185   : > { %v2887_v30 = vadd.f32 %v2885_v22, %v2875_v57  ;;  %v2611_v15 = vmax.f32 %v2442_v35, 0.0 }
 0x186   : > { %v7820_v10 = vpop.permute.xlu2 %2925  ;;  %v2610_v52 = vmax.f32 %v2428_v46, 0.0  ;;  %3016 = vadd.xlane.f32.xlu1 %v3014_v40 }
 0x187   : > { %v2909_v46 = vmul.f32 %v7804_v25, %v2611_v15 }
 0x188   : > { %v2897_v59 = vmul.f32 %v7802_v16, %v2610_v52  ;;  %v787_v16 = vperm.slane %v7837_v5, 5 }
 0x191   : > { %v7846_v36 = vpop.permute.xlu2 %2941 }
 0x192   : > { %v7828_v28 = vpop.permute.xlu1 %2937  ;;  %v2453_v33 = vpop.f32.mrf.mxu0 }
 0x193   : > { %v2454_v4 = vadd.f32 %v2453_v33, %v782_v51  ;;  %v2467_v53 = vpop.f32.mrf.mxu1 }
 0x194   : > { %v2468_v56 = vadd.f32 %v2467_v53, %v783_v47 }
 0x195   : > { %v2580_v7 = vmax.f32 %v2454_v4, 0.0 }
 0x196   : > { %v2581_v21 = vmax.f32 %v2468_v56, 0.0 }
 0x197   : > { %v2920_v33 = vmul.f32 %v7806_v54, %v2580_v7  ;;  %v788_v7 = vperm.slane %v7837_v5, 6 }
 0x198   : > { %v2932_v4 = vmul.f32 %v7820_v10, %v2581_v21 }
 0x199   : > { %v2922_v20 = vadd.f32 %v2920_v33, %v2910_v61 }
 0x19a   : > { %v2495_v50 = vpop.f32.mrf.mxu3  ;;  %v2455_v27 = vpop.f32.mrf.mxu0 }
 0x19b   : > { %v2481_v8 = vpop.f32.mrf.mxu2  ;;  %v2954_v37 = vpop.permute.xlu2 %2953  ;;  %v2456_v39 = vadd.f32 %v2455_v27, %v782_v51  ;;  %v2496_v43 = vadd.f32 %v2495_v50, %v785_v19  ;;  %v2899_v51 = vadd.f32 %v2897_v59, %v2887_v30  ;;  %v2934_v42 = vadd.f32 %v2932_v4, %v2922_v20 }
 0x19c   : > { %v2482_v49 = vadd.f32 %v2481_v8, %v784_v3  ;;  %v2469_v55 = vpop.f32.mrf.mxu1 }
 0x19d   : > { %v7855_v9 = vpop.permute.xlu1 %2949  ;;  %v2612_v60 = vmax.f32 %v2456_v39, 0.0  ;;  %v2470_v54 = vadd.f32 %v2469_v55, %v783_v47  ;;  %v2583_v26 = vmax.f32 %v2496_v43, 0.0  ;;  %v2911_v11 = vadd.f32 %v2909_v46, %v2899_v51 }
 0x19e   : > { %v2582_v62 = vmax.f32 %v2482_v49, 0.0 }
 0x19f   : > { %v2921_v44 = vmul.f32 %v7813_v41, %v2612_v60  ;;  %v2613_v63 = vmax.f32 %v2470_v54, 0.0  ;;  %v2956_v10 = vmul.f32 %v7855_v9, %v2583_v26 }
 0x1a0   : > { %v2944_v53 = vmul.f32 %v7828_v28, %v2582_v62 }
 0x1a1   : > { %v2923_v1 = vadd.f32 %v2921_v44, %v2911_v11  ;;  %v2933_v25 = vmul.f32 %v2930_v0, %v2613_v63 }
 0x1a2   : > { %v2497_v38 = vpop.f32.mrf.mxu3  ;;  %v2946_v17 = vadd.f32 %v2944_v53, %v2934_v42 }
 0x1a3   : > { %v2483_v29 = vpop.f32.mrf.mxu2  ;;  %v2974_v8 = vpop.permute.xlu2 %2973  ;;  %v2498_v32 = vadd.f32 %v2497_v38, %v785_v19  ;;  %v2935_v19 = vadd.f32 %v2933_v25, %v2923_v1 }
 0x1a4   : > { %v2484_v48 = vadd.f32 %v2483_v29, %v784_v3  ;;  %v2962_v3 = vpop.permute.xlu0 %2961  ;;  %v2958_v13 = vadd.f32 %v2956_v10, %v2946_v17  ;;  %v5680_v17 = vld [vmem:[#allocation10] ss:$0 sm:$0xff] }
 0x1a5   : > { %v2615_v50 = vmax.f32 %v2498_v32, 0.0  ;;  %v7892_v32 = vld [vmem:[#allocation4 + $0x8] sm:$0xff] }
 0x1a6   : > { %v7876_v58 = vpop.permute.xlu1 %2965  ;;  %v2614_v18 = vmax.f32 %v2484_v48, 0.0  ;;  %3297 = vmatpush.msrb.mxu0 %v7892_v32  ;;  %5552 = vmatpush.msra.mxu1 %v7892_v32  ;;  %vm3130_vm6 = vcmp.gt.f32.partialorder %v7892_v32, 0.0 }
 0x1a7   : > { %v2957_v49 = vmul.f32 %v2954_v37, %v2615_v50  ;;  %v5679_v37 = vld [vmem:[%s8336_s6] ss:$0 sm:$0xff]  ;;  %5553 = vmatpush.msra.mxu2 %v7892_v32  ;;  %5554 = vmatpush.msra.mxu3 %v7892_v32 }
 0x1a8   : > { %v2945_v31 = vmul.f32 %v7846_v36, %v2614_v18 }
 0x1aa   : > { %v2947_v39 = vadd.f32 %v2945_v31, %v2935_v19 }
 0x1ac   : > { %v2986_v33 = vpop.permute.xlu2 %2985  ;;  %v2959_v30 = vadd.f32 %v2957_v49, %v2947_v39  ;;  %v2990_v4 = vpop.permute.xlu0 %2989 }
 0x1af   : > { %v2978_v6 = vpop.permute.xlu1 %2977 }
 0x1b2   : > { %v2509_v47 = vpop.f32.mrf.mxu0  ;;  %v2523_v2 = vpop.f32.mrf.mxu1 }
 0x1b3   : > { %v2510_v34 = vadd.f32 %v2509_v47, %v786_v45  ;;  %v2524_v28 = vadd.f32 %v2523_v2, %v787_v16 }
 0x1b5   : > { %v2584_v40 = vmax.f32 %v2510_v34, 0.0  ;;  %v2585_v52 = vmax.f32 %v2524_v28, 0.0 }
 0x1b7   : > { %v2968_v41 = vmul.f32 %v2962_v3, %v2584_v40  ;;  %v2980_v22 = vmul.f32 %v2974_v8, %v2585_v52 }
 0x1b8   : > { %v2998_v21 = vpop.permute.xlu1 %2997 }
 0x1b9   : > { %v2537_v27 = vpop.f32.mrf.mxu2  ;;  %v2970_v9 = vadd.f32 %v2968_v41, %v2958_v13  ;;  %v3127_v41 = vld [vmem:[#allocation4] sm:$0xff] }
 0x1ba   : > { %v2538_v12 = vadd.f32 %v2537_v27, %v788_v7  ;;  %v2551_v23 = vpop.f32.mrf.mxu3  ;;  %v2511_v56 = vpop.f32.mrf.mxu0  ;;  %3298 = vmatpush.msrb.mxu0 %v3127_v41  ;;  %5555 = vmatpush.msra.mxu1 %v3127_v41  ;;  %vm3129_vm7 = vcmp.gt.f32.partialorder %v3127_v41, 0.0 }
 0x1bb   : > { %v2552_v24 = vadd.f32 %v2551_v23, %v789_v14  ;;  %v2512_v57 = vadd.f32 %v2511_v56, %v786_v45  ;;  %v2525_v35 = vpop.f32.mrf.mxu1  ;;  %v2982_v36 = vadd.f32 %v2980_v22, %v2970_v9  ;;  %5556 = vmatpush.msra.mxu2 %v3127_v41  ;;  %5557 = vmatpush.msra.mxu3 %v3127_v41 }
 0x1bc   : > { %v2586_v59 = vmax.f32 %v2538_v12, 0.0  ;;  %v2526_v55 = vadd.f32 %v2525_v35, %v787_v16 }
 0x1bd   : > { %v2587_v5 = vmax.f32 %v2552_v24, 0.0  ;;  %v2616_v61 = vmax.f32 %v2512_v57, 0.0  ;;  %v3153_v57 = vld [vmem:[#allocation5] sm:$0x1] }
 0x1be   : > { %v2992_v62 = vmul.f32 %v2986_v33, %v2586_v59  ;;  %v2617_v15 = vmax.f32 %v2526_v55, 0.0 }
 0x1bf   : > { %v2969_v43 = vmul.f32 %v7876_v58, %v2616_v61  ;;  %v3004_v0 = vmul.f32 %v2998_v21, %v2587_v5  ;;  %v3002_v58 = vpop.permute.xlu2 %3001 }
 0x1c0   : > { %v2994_v29 = vadd.f32 %v2992_v62, %v2982_v36  ;;  %v2981_v53 = vmul.f32 %v2978_v6, %v2617_v15 }
 0x1c1   : > { %v2539_v20 = vpop.f32.mrf.mxu2  ;;  %v2971_v60 = vadd.f32 %v2969_v43, %v2959_v30 }
 0x1c2   : > { %v3006_v54 = vadd.f32 %v3004_v0, %v2994_v29  ;;  %v2540_v51 = vadd.f32 %v2539_v20, %v788_v7  ;;  %v2553_v45 = vpop.f32.mrf.mxu3  ;;  %v5681_v20 = vld [vmem:[%s8338_s9] ss:$0 sm:$0xff] }
 0x1c3   : > { %v2554_v16 = vadd.f32 %v2553_v45, %v789_v14  ;;  %v2983_v46 = vadd.f32 %v2981_v53, %v2971_v60 }
 0x1c4   : > { %v2618_v26 = vmax.f32 %v2540_v51, 0.0  ;;  %v3024_v48 = vmul.f32 %v5679_v37, %v3006_v54 }
 0x1c5   : > { %v2619_v38 = vmax.f32 %v2554_v16, 0.0 }
 0x1c6   : > { %v2993_v8 = vmul.f32 %v2990_v4, %v2618_v26  ;;  %3026 = vadd.xlane.f32.xlu0 %v3024_v48 }
 0x1c7   : > { %v3005_v42 = vmul.f32 %v3002_v58, %v2619_v38 }
 0x1c8   : > { %v2995_v44 = vadd.f32 %v2993_v8, %v2983_v46 }
 0x1ca   : > { %v3007_v63 = vadd.f32 %v3005_v42, %v2995_v44 }
 0x1cc   : > { %v3025_v47 = vmul.f32 %v5679_v37, %v3007_v63  ;;  %v3044_v11 = vpack.c.bf16 %v3007_v63, %v3006_v54 }
 0x1ce   : > { %3028 = vadd.xlane.f32.xlu2 %v3025_v47  ;;  %3121 = vmatmul.bf16.vlgmr.msra.gmra.mxu0 %v3044_v11 }
 0x1f7   : > { %v3019_v34 = vpop.xlane.xlu2 %3018 }
 0x1f9   : > { %v3017_v2 = vpop.xlane.xlu1 %3016 }
 0x239   : > { %v3027_v10 = vpop.xlane.xlu0 %3026 }
 0x23a   : > { %v3030_v18 = vadd.f32 %v3027_v10, %v3017_v2 }
 0x23c   : > { %v3036_v28 = vadd.f32 %v5680_v17, %v3030_v18 }
 0x23e   : > { %vm3038_vm4 = vcmp.gt.f32.partialorder %v3036_v28, 0.0  ;;  %v3040_v6 = vmul.f32 0.01, %v3036_v28 }
 0x240   : > { %v3042_v3 = vsel %vm3038_vm4, %v3036_v28, %v3040_v6 }
 0x241   : > { %v3029_v40 = vpop.xlane.xlu2 %3028  ;;  %3133 = vperm.xlu1 %5675, %v3042_v3  }
 0x242   : > { %v3031_v1 = vadd.f32 %v3029_v40, %v3019_v34  ;;  %v3175_v34 = vld [vmem:[#allocation6] sm:$0x1] }
 0x244   : > { %v3037_v25 = vadd.f32 %v5680_v17, %v3031_v1 }
 0x246   : > { %vm3039_vm5 = vcmp.gt.f32.partialorder %v3037_v25, 0.0  ;;  %v3041_v7 = vmul.f32 0.01, %v3037_v25 }
 0x248   : > { %v3043_v50 = vsel %vm3039_vm5, %v3037_v25, %v3041_v7 }
 0x249   : > { %3138 = vperm.xlu2 %5676, %v3043_v50  }
 0x24b   : > { %v3122_v37 = vpop.f32.mrf.mxu0 }
 0x24c   : > { %v3123_v60 = vadd.f32 %v5681_v20, %v3122_v37 }
 0x253   : > { %v3124_v45 = vpop.f32.mrf.mxu0 }
 0x254   : > { %v3125_v16 = vadd.f32 %v5681_v20, %v3124_v45 }
 0x2a3   : > { %v3139_v14 = vpop.permute.xlu2 %3138 }
 0x2a4   : > { %v3142_v13 = vsel %vm3130_vm6, %v3139_v14, -1e+30 }
 0x2a5   : > { %v3145_v27 = vsel %vm3143_vm8, %v3142_v13, -inf }
 0x2b3   : > { %v3134_v31 = vpop.permute.xlu1 %3133 }
 0x2b4   : > { %v3141_v52 = vsel %vm3129_vm7, %v3134_v31, -1e+30 }
 0x2b5   : > { %v3144_v19 = vsel %vm3143_vm8, %v3141_v52, -inf }
 0x2b6   : > { %v3146_v9 = vmax.f32 %v3144_v19, %v3145_v27 }
 0x2b8   : > { %v3147_v12 = vrot.slane %v3146_v9, 4 }
 0x2ba   : > { %v3148_v23 = vmax.f32 %v3146_v9, %v3147_v12  ;;  %v3348_v12 = vld [vmem:[#allocation7] sm:$0xff] }
 0x2bc   : > { %v3149_v56 = vrot.slane %v3148_v23, 2 }
 0x2be   : > { %v3150_v49 = vmax.f32 %v3148_v23, %v3149_v56 }
 0x2c0   : > { %v3151_v24 = vrot.slane %v3150_v49, 1 }
 0x2c2   : > { %v3152_v35 = vmax.f32 %v3150_v49, %v3151_v24  ;;  %v3349_v24 = vld [vmem:[#allocation7 + $0x8] sm:$0xff] }
 0x2c4   : > { %v3154_v33 = vmax.f32 %v3153_v57, %v3152_v35 }
 0x2c6   : > { %v3159_v39 = vperm.slane %v3154_v33, 0  ;;  %3415 = vst.msk [vmem:[#allocation5] sm:$0x1] %vm490_vm3, %v3154_v33  ;;  %v3155_v22 = vsub.f32 %v3153_v57, %v3154_v33 }
 0x2c8   : > { %v3161_v59 = vmul.f32 %v3159_v39, %v3127_v41  ;;  %v3162_v5 = vmul.f32 %v3159_v39, %v7892_v32  ;;  %v3156_v38 = vmul.f32 1.442695, %v3155_v22  ;;  %v3350_v39 = vld [vmem:[#allocation7 + $0x10] sm:$0xff] }
 0x2ca   : > { %v3163_v55 = vsel %vm3143_vm8, %v3161_v59, 0.0  ;;  %v3166_v61 = vsel %vm3143_vm8, %v3162_v5, 0.0  ;;  %v3351_v5 = vld [vmem:[#allocation7 + $0x18] sm:$0xff] }
 0x2cb   : > { %3164 = vadd.xlane.f32.xlu0 %v3163_v55 }
 0x2d3   : > { %3167 = vadd.xlane.f32.xlu0 %v3166_v61 }
 0x33e   : > { %v3165_v21 = vpop.xlane.xlu0 %3164 }
 0x33f   : > { %v3169_v36 = vsub.f32 %v3042_v3, %v3165_v21 }
 0x341   : > { %v3171_v62 = vmul.f32 1.442695, %v3169_v36 }
 0x343   : > { %5682 = vpow2.f32 %v3171_v62  ;;  %v3352_v62 = vld [vmem:[#allocation7 + $0x20] sm:$0xff] }
 0x346   : > { %v3168_v43 = vpop.xlane.xlu0 %3167 }
 0x347   : > { %v3170_v0 = vsub.f32 %v3043_v50, %v3168_v43 }
 0x349   : > { %v5683_v30 = vpop.eup %5682  ;;  %v3173_v15 = vmul.f32 1.442695, %v3170_v0 }
 0x34a   : > { %3179 = vperm.xlu0 %5677, %v5683_v30  }
 0x34b   : > { %5684 = vpow2.f32 %v3173_v15  ;;  %v3353_v15 = vld [vmem:[#allocation7 + $0x28] sm:$0xff] }
 0x34c   : > { %5686 = vpow2.f32 %v3156_v38 }
 0x351   : > { %v5685_v29 = vpop.eup %5684 }
 0x352   : > { %3184 = vperm.xlu1 %5675, %v5685_v29   ;;  %v5687_v11 = vpop.eup %5686 }
 0x353   : > { %v3176_v17 = vmul.f32 %v5687_v11, %v3175_v34  ;;  %v7927_v9 = vperm.slane %v5687_v11, 0 }
 0x355   : > { %v3367_v23 = vmul.f32 %v7927_v9, %v3348_v12  ;;  %v3368_v57 = vmul.f32 %v7927_v9, %v3349_v24  ;;  %v3369_v22 = vmul.f32 %v7927_v9, %v3350_v39  ;;  %v3370_v61 = vmul.f32 %v7927_v9, %v3351_v5 }
 0x356   : > { %v3371_v43 = vmul.f32 %v7927_v9, %v3352_v62  ;;  %v3372_v29 = vmul.f32 %v7927_v9, %v3353_v15 }
 0x3bc   : > { %v3180_v54 = vpop.permute.xlu0 %3179 }
 0x3bd   : > { %v3201_v51 = vmul.f32 %v3180_v54, %v3123_v60  ;;  %v3187_v4 = vmul.f32 %v3180_v54, %v3127_v41  ;;  %v3354_v60 = vld [vmem:[#allocation7 + $0x30] sm:$0xff] }
 0x3be   : > { %v3373_v54 = vmul.f32 %v7927_v9, %v3354_v60 }
 0x3bf   : > { %3203 = vxpose.xlu2.b32.start [1/2] (short) %v3201_v51, 128  ;;  %v3189_v58 = vsel %vm3143_vm8, %v3187_v4, 0.0 }
 0x3c4   : > { %v3185_v53 = vpop.permute.xlu1 %3184 }
 0x3c5   : > { %v3188_v26 = vmul.f32 %v3185_v53, %v7892_v32  ;;  %v3202_v48 = vmul.f32 %v3185_v53, %v3125_v16  ;;  %v3355_v16 = vld [vmem:[#allocation7 + $0x38] sm:$0xff] }
 0x3c6   : > { %v3374_v4 = vmul.f32 %v7927_v9, %v3355_v16 }
 0x3c7   : > { %v3190_v46 = vsel %vm3143_vm8, %v3188_v26, 0.0  ;;  %3204 = vxpose.xlu2.b32.end [2/2] (short) %v3202_v48, 128  ;;  %v3356_v48 = vld [vmem:[#allocation7 + $0x40] sm:$0xff] }
 0x3c8   : > { %v3191_v8 = vadd.f32 %v3190_v46, %v3189_v58  ;;  %v3375_v38 = vmul.f32 %v7927_v9, %v3356_v48 }
 0x3ca   : > { %v3192_v42 = vrot.slane %v3191_v8, 4 }
 0x3cc   : > { %v3193_v44 = vadd.f32 %v3192_v42, %v3191_v8  ;;  %v3357_v8 = vld [vmem:[#allocation7 + $0x48] sm:$0xff] }
 0x3cd   : > { %v3376_v42 = vmul.f32 %v7927_v9, %v3357_v8 }
 0x3ce   : > { %v3194_v63 = vrot.slane %v3193_v44, 2 }
 0x3d0   : > { %v3195_v47 = vadd.f32 %v3194_v63, %v3193_v44 }
 0x3d2   : > { %v3196_v2 = vrot.slane %v3195_v47, 1 }
 0x3d4   : > { %v3197_v10 = vadd.f32 %v3196_v2, %v3195_v47  ;;  %v3358_v47 = vld [vmem:[#allocation7 + $0x50] sm:$0xff] }
 0x3d5   : > { %v3377_v11 = vmul.f32 %v7927_v9, %v3358_v47 }
 0x3d6   : > { %v3198_v18 = vadd.f32 %v3197_v10, %v3176_v17  ;;  %v3359_v17 = vld [vmem:[#allocation7 + $0x58] sm:$0xff] }
 0x3d7   : > { %v3378_v10 = vmul.f32 %v7927_v9, %v3359_v17 }
 0x3d8   : > { %3200 = vst.msk [vmem:[#allocation6] sm:$0x1] %vm490_vm3, %v3198_v18 }
 0x458   : > { %v3219_v32 = vpop.trf.xlu2 }
 0x459   : > { %5128 = vmatmul.msk.f32.vlgmr.msrb.gmra.mxu0 %vm3143_vm8, %v3219_v32 }
 0x460   : > { %v3220_v28 = vpop.trf.xlu2 }
 0x461   : > { %5129 = vmatmul.msk.f32.vlgmr.msra.gmra.mxu1 %vm3143_vm8, %v3220_v28  ;;  %v3360_v28 = vld [vmem:[#allocation7 + $0x60] sm:$0xff] }
 0x468   : > { %v3221_v6 = vpop.trf.xlu2 }
 0x469   : > { %5130 = vmatmul.msk.f32.gmra.mxu1 %vm3143_vm8, %v3221_v6  ;;  %v3379_v6 = vmul.f32 %v7927_v9, %v3360_v28 }
 0x470   : > { %v3222_v3 = vpop.trf.xlu2 }
 0x471   : > { %5131 = vmatmul.msk.f32.gmra.mxu1 %vm3143_vm8, %v3222_v3 }
 0x478   : > { %v3223_v40 = vpop.trf.xlu2 }
 0x479   : > { %5132 = vmatmul.msk.f32.gmra.mxu1 %vm3143_vm8, %v3223_v40 }
 0x480   : > { %v3224_v1 = vpop.trf.xlu2 }
 0x481   : > { %5133 = vmatmul.msk.f32.gmra.mxu1 %vm3143_vm8, %v3224_v1  ;;  %v3361_v1 = vld [vmem:[#allocation7 + $0x68] sm:$0xff] }
 0x488   : > { %v3225_v25 = vpop.trf.xlu2 }
 0x489   : > { %5134 = vmatmul.msk.f32.vlgmr.msra.gmra.mxu2 %vm3143_vm8, %v3225_v25  ;;  %v3380_v25 = vmul.f32 %v7927_v9, %v3361_v1 }
 0x490   : > { %v3226_v7 = vpop.trf.xlu2 }
 0x491   : > { %5135 = vmatmul.msk.f32.gmra.mxu2 %vm3143_vm8, %v3226_v7 }
 0x498   : > { %v3227_v50 = vpop.trf.xlu2 }
 0x499   : > { %5136 = vmatmul.msk.f32.gmra.mxu2 %vm3143_vm8, %v3227_v50 }
 0x4a0   : > { %v3228_v41 = vpop.trf.xlu2 }
 0x4a1   : > { %5137 = vmatmul.msk.f32.gmra.mxu2 %vm3143_vm8, %v3228_v41  ;;  %v3362_v41 = vld [vmem:[#allocation7 + $0x70] sm:$0xff] }
 0x4a8   : > { %v3229_v14 = vpop.trf.xlu2 }
 0x4a9   : > { %5138 = vmatmul.msk.f32.gmra.mxu2 %vm3143_vm8, %v3229_v14  ;;  %v3381_v14 = vmul.f32 %v7927_v9, %v3362_v41 }
 0x4b0   : > { %v3230_v13 = vpop.trf.xlu2 }
 0x4b1   : > { %5139 = vmatmul.msk.f32.vlgmr.msra.gmra.mxu3 %vm3143_vm8, %v3230_v13 }
 0x4b8   : > { %v3231_v31 = vpop.trf.xlu2 }
 0x4b9   : > { %5140 = vmatmul.msk.f32.gmra.mxu3 %vm3143_vm8, %v3231_v31 }
 0x4c0   : > { %v3232_v52 = vpop.trf.xlu2 }
 0x4c1   : > { %5141 = vmatmul.msk.f32.gmra.mxu3 %vm3143_vm8, %v3232_v52  ;;  %v3363_v52 = vld [vmem:[#allocation7 + $0x78] sm:$0xff] }
 0x4c8   : > { %v3233_v27 = vpop.trf.xlu2 }
 0x4c9   : > { %5142 = vmatmul.msk.f32.gmra.mxu3 %vm3143_vm8, %v3233_v27  ;;  %v3382_v27 = vmul.f32 %v7927_v9, %v3363_v52 }
 0x4d0   : > { %v3234_v19 = vpop.trf.xlu2 }
 0x4d1   : > { %5143 = vmatmul.msk.f32.gmra.mxu3 %vm3143_vm8, %v3234_v19 }
 0x4d6   : > { %v3300_v56 = vpop.f32.mrf.mxu0 }
 0x4d7   : > { %v3383_v49 = vadd.f32 %v3367_v23, %v3300_v56 }
 0x4d9   : > { %3399 = vst.msk [vmem:[#allocation7] sm:$0xff] %vm3143_vm8, %v3383_v49 }
 0x4de   : > { %v3303_v35 = vpop.f32.mrf.mxu1 }
 0x4df   : > { %v3384_v33 = vadd.f32 %v3368_v57, %v3303_v35 }
 0x4e1   : > { %3400 = vst.msk [vmem:[#allocation7 + $0x8] sm:$0xff] %vm3143_vm8, %v3384_v33 }
 0x4e6   : > { %v3306_v59 = vpop.f32.mrf.mxu1 }
 0x4e7   : > { %v3385_v55 = vadd.f32 %v3369_v22, %v3306_v59 }
 0x4e9   : > { %3401 = vst.msk [vmem:[#allocation7 + $0x10] sm:$0xff] %vm3143_vm8, %v3385_v55 }
 0x4ee   : > { %v3309_v21 = vpop.f32.mrf.mxu1 }
 0x4ef   : > { %v3386_v36 = vadd.f32 %v3370_v61, %v3309_v21 }
 0x4f1   : > { %3402 = vst.msk [vmem:[#allocation7 + $0x18] sm:$0xff] %vm3143_vm8, %v3386_v36 }
 0x4f6   : > { %v3312_v0 = vpop.f32.mrf.mxu1 }
 0x4f7   : > { %v3387_v30 = vadd.f32 %v3371_v43, %v3312_v0 }
 0x4f9   : > { %3403 = vst.msk [vmem:[#allocation7 + $0x20] sm:$0xff] %vm3143_vm8, %v3387_v30 }
 0x4fe   : > { %v3315_v37 = vpop.f32.mrf.mxu1 }
 0x4ff   : > { %v3388_v20 = vadd.f32 %v3372_v29, %v3315_v37 }
 0x501   : > { %3404 = vst.msk [vmem:[#allocation7 + $0x28] sm:$0xff] %vm3143_vm8, %v3388_v20 }
 0x50c   : > { %v3318_v51 = vpop.f32.mrf.mxu2 }
 0x50d   : > { %v3389_v45 = vadd.f32 %v3373_v54, %v3318_v51 }
 0x50f   : > { %3405 = vst.msk [vmem:[#allocation7 + $0x30] sm:$0xff] %vm3143_vm8, %v3389_v45 }
 0x514   : > { %v3321_v53 = vpop.f32.mrf.mxu2 }
 0x515   : > { %v3390_v26 = vadd.f32 %v3374_v4, %v3321_v53 }
 0x517   : > { %3406 = vst.msk [vmem:[#allocation7 + $0x38] sm:$0xff] %vm3143_vm8, %v3390_v26 }
 0x51c   : > { %v3324_v58 = vpop.f32.mrf.mxu2 }
 0x51d   : > { %v3391_v46 = vadd.f32 %v3375_v38, %v3324_v58 }
 0x51f   : > { %3407 = vst.msk [vmem:[#allocation7 + $0x40] sm:$0xff] %vm3143_vm8, %v3391_v46 }
 0x524   : > { %v3327_v44 = vpop.f32.mrf.mxu2 }
 0x525   : > { %v3392_v63 = vadd.f32 %v3376_v42, %v3327_v44 }
 0x527   : > { %3408 = vst.msk [vmem:[#allocation7 + $0x48] sm:$0xff] %vm3143_vm8, %v3392_v63 }
 0x52c   : > { %v3330_v34 = vpop.f32.mrf.mxu2 }
 0x52d   : > { %v3393_v2 = vadd.f32 %v3377_v11, %v3330_v34 }
 0x52f   : > { %3409 = vst.msk [vmem:[#allocation7 + $0x50] sm:$0xff] %vm3143_vm8, %v3393_v2 }
 0x534   : > { %v3333_v18 = vpop.f32.mrf.mxu3 }
 0x535   : > { %v3394_v32 = vadd.f32 %v3378_v10, %v3333_v18 }
 0x537   : > { %3410 = vst.msk [vmem:[#allocation7 + $0x58] sm:$0xff] %vm3143_vm8, %v3394_v32 }
 0x53c   : > { %v3336_v3 = vpop.f32.mrf.mxu3 }
 0x53d   : > { %v3395_v40 = vadd.f32 %v3379_v6, %v3336_v3 }
 0x53f   : > { %3411 = vst.msk [vmem:[#allocation7 + $0x60] sm:$0xff] %vm3143_vm8, %v3395_v40 }
 0x544   : > { %v3339_v7 = vpop.f32.mrf.mxu3 }
 0x545   : > { %v3396_v50 = vadd.f32 %v3380_v25, %v3339_v7 }
 0x547   : > { %3412 = vst.msk [vmem:[#allocation7 + $0x68] sm:$0xff] %vm3143_vm8, %v3396_v50 }
 0x54c   : > { %v3342_v13 = vpop.f32.mrf.mxu3 }
 0x54d   : > { %v3397_v31 = vadd.f32 %v3381_v14, %v3342_v13 }
 0x54f   : > { %3413 = vst.msk [vmem:[#allocation7 + $0x70] sm:$0xff] %vm3143_vm8, %v3397_v31 }
 0x553   : > { %3419 = sbr.rel (%p5144_p6) target bundleno = 1750 (0x6d6), region = 87 }
 0x554   : > { %v3345_v19 = vpop.f32.mrf.mxu3 }
 0x555   : > { %v3398_v12 = vadd.f32 %v3382_v27, %v3345_v19 }
 0x557   : > { %3414 = vst.msk [vmem:[#allocation7 + $0x78] sm:$0xff] %vm3143_vm8, %v3398_v12 }
 0x558   : > { %v3420_v23 = vld [vmem:[#allocation6] sm:$0x1]  ;;  %v3423_v24 = vld [vmem:[#allocation7] sm:$0xff]  ;;  %v3424_v57 = vld [vmem:[#allocation7 + $0x8] sm:$0xff] }
 0x559   : > { %v3421_v56 = vadd.f32 1e-08, %v3420_v23  ;;  %v3425_v9 = vld [vmem:[#allocation7 + $0x10] sm:$0xff]  ;;  %v3426_v36 = vld [vmem:[#allocation7 + $0x18] sm:$0xff]  ;;  %v3427_v60 = vld [vmem:[#allocation7 + $0x20] sm:$0xff] }
 0x55a   : > { %v3428_v26 = vld [vmem:[#allocation7 + $0x28] sm:$0xff]  ;;  %v3429_v44 = vld [vmem:[#allocation7 + $0x30] sm:$0xff]  ;;  %v3430_v10 = vld [vmem:[#allocation7 + $0x38] sm:$0xff] }
 0x55b   : > { %5694 = vrcp.f32 %v3421_v56  ;;  %v3431_v1 = vld [vmem:[#allocation7 + $0x40] sm:$0xff]  ;;  %v3432_v31 = vld [vmem:[#allocation7 + $0x48] sm:$0xff] }
 0x561   : > { %v5695_v49 = vpop.eup %5694 }
 0x562   : > { %v7963_v35 = vperm.slane %v5695_v49, 0  ;;  %v3433_v49 = vld [vmem:[#allocation7 + $0x50] sm:$0xff] }
 0x564   : > { %v3442_v33 = vmul.f32 %v7963_v35, %v3423_v24  ;;  %v3443_v39 = vmul.f32 %v7963_v35, %v3424_v57  ;;  %v3444_v61 = vmul.f32 %v7963_v35, %v3425_v9  ;;  %v3445_v0 = vmul.f32 %v7963_v35, %v3426_v36 }
 0x565   : > { %v3446_v51 = vmul.f32 %v7963_v35, %v3427_v60  ;;  %v3447_v38 = vmul.f32 %v7963_v35, %v3428_v26  ;;  %v3448_v47 = vmul.f32 %v7963_v35, %v3429_v44  ;;  %v3449_v32 = vmul.f32 %v7963_v35, %v3430_v10  ;;  %v3436_v60 = vld [vmem:[#allocation7 + $0x68] sm:$0xff]  ;;  %v3598_v44 = vld [vmem:[%s8339_s10 + $0x150] sm:$0xff] }
 0x566   : > { %v3474_v22 = vmin.f32 %v3442_v33, 0.0  ;;  %v3475_v59 = vmin.f32 %v3443_v39, 0.0  ;;  %v3476_v21 = vmin.f32 %v3444_v61, 0.0  ;;  %vm3458_vm9 = vcmp.gt.f32.partialorder %v3442_v33, 0.0 }
 0x567   : > { %v3477_v37 = vmin.f32 %v3445_v0, 0.0  ;;  %vm3459_vm10 = vcmp.gt.f32.partialorder %v3443_v39, 0.0  ;;  %v3478_v4 = vmin.f32 %v3446_v51, 0.0  ;;  %vm3460_vm11 = vcmp.gt.f32.partialorder %v3444_v61, 0.0 }
 0x568   : > { %v3490_v55 = vmul.f32 1.442695, %v3474_v22  ;;  %v3492_v5 = vmul.f32 1.442695, %v3475_v59  ;;  %v3494_v43 = vmul.f32 1.442695, %v3476_v21  ;;  %v3450_v7 = vmul.f32 %v7963_v35, %v3431_v1 }
 0x569   : > { %v3496_v54 = vmul.f32 1.442695, %v3477_v37  ;;  %v3498_v48 = vmul.f32 1.442695, %v3478_v4  ;;  %v3479_v8 = vmin.f32 %v3447_v38, 0.0  ;;  %vm3461_vm12 = vcmp.gt.f32.partialorder %v3445_v0, 0.0 }
 0x56a   : > { %5696 = vpow2.f32 %v3490_v55  ;;  %v3480_v2 = vmin.f32 %v3448_v47, 0.0  ;;  %vm3462_vm13 = vcmp.gt.f32.partialorder %v3446_v51, 0.0  ;;  %v3481_v3 = vmin.f32 %v3449_v32, 0.0  ;;  %v3434_v59 = vld [vmem:[#allocation7 + $0x58] sm:$0xff] }
 0x56b   : > { %5698 = vpow2.f32 %v3492_v5  ;;  %v3500_v63 = vmul.f32 1.442695, %v3479_v8  ;;  %vm3463_vm14 = vcmp.gt.f32.partialorder %v3447_v38, 0.0  ;;  %v3482_v14 = vmin.f32 %v3450_v7, 0.0 }
 0x56c   : > { %5700 = vpow2.f32 %v3494_v43  ;;  %v3502_v18 = vmul.f32 1.442695, %v3480_v2  ;;  %v3504_v25 = vmul.f32 1.442695, %v3481_v3  ;;  %vm3464_vm15 = vcmp.gt.f32.partialorder %v3448_v47, 0.0  ;;  %v3435_v43 = vld [vmem:[#allocation7 + $0x60] sm:$0xff] }
 0x56d   : > { %5702 = vpow2.f32 %v3496_v54  ;;  %v3506_v52 = vmul.f32 1.442695, %v3482_v14  ;;  %v3451_v27 = vmul.f32 %v7963_v35, %v3432_v31  ;;  %vm3465_vm0 = vcmp.gt.f32.partialorder %v3449_v32, 0.0  ;;  %v5550_v2 = vld [vmem:[%s8340_s11 + $0xb0] sm:$0xf0]  ;;  %v3596_v31 = vld [vmem:[%s8339_s10 + $0x140] sm:$0xff] }
 0x56e   : > { %5704 = vpow2.f32 %v3498_v48  ;;  %v3452_v57 = vmul.f32 %v7963_v35, %v3433_v49  ;;  %vm3466_vm1 = vcmp.gt.f32.partialorder %v3450_v7, 0.0  ;;  %v3453_v5 = vmul.f32 %v7963_v35, %v3434_v59  ;;  %v3437_v48 = vld [vmem:[#allocation7 + $0x70] sm:$0xff] }
 0x56f   : > { %5706 = vpow2.f32 %v3500_v63  ;;  %v3483_v23 = vmin.f32 %v3451_v27, 0.0  ;;  %vm3467_vm2 = vcmp.gt.f32.partialorder %v3451_v27, 0.0  ;;  %v3595_v63 = vld [vmem:[%s8339_s10 + $0x138] sm:$0xff] }
 0x570   : > { %v5697_v62 = vpop.eup %5696  ;;  %5708 = vpow2.f32 %v3502_v18  ;;  %v3484_v9 = vmin.f32 %v3452_v57, 0.0  ;;  %v3485_v36 = vmin.f32 %v3453_v5, 0.0  ;;  %vm3468_vm3 = vcmp.gt.f32.partialorder %v3452_v57, 0.0  ;;  %v5235_v18 = vld [vmem:[%s8340_s11 + $0x90] sm:$0xf] }
 0x571   : > { %v5145_v30 = vadd.f32 -1.0, %v5697_v62  ;;  %v5699_v15 = vpop.eup %5698  ;;  %5710 = vpow2.f32 %v3504_v25  ;;  %v3508_v24 = vmul.f32 1.442695, %v3483_v23  ;;  %vm3469_vm4 = vcmp.gt.f32.partialorder %v3453_v5, 0.0  ;;  %v3599_v25 = vld [vmem:[%s8339_s10 + $0x158] sm:$0xff] }
 0x572   : > { %v5146_v20 = vadd.f32 -1.0, %v5699_v15  ;;  %v5701_v16 = vpop.eup %5700  ;;  %5712 = vpow2.f32 %v3506_v52  ;;  %v3510_v55 = vmul.f32 1.442695, %v3484_v9  ;;  %v3600_v52 = vld [vmem:[%s8339_s10 + $0x160] sm:$0xff]  ;;  %v3590_v9 = vld [vmem:[%s8339_s10 + $0x110] sm:$0xff] }
 0x573   : > { %v3538_v29 = vsel %vm3458_vm9, %v3442_v33, %v5145_v30  ;;  %v5147_v53 = vadd.f32 -1.0, %v5701_v16  ;;  %v5703_v46 = vpop.eup %5702  ;;  %5714 = vpow2.f32 %v3508_v24  ;;  %v3454_v30 = vmul.f32 %v7963_v35, %v3435_v43  ;;  %v5211_v24 = vld [vmem:[%s8340_s11 + $0x60] sm:$0xf] }
 0x574   : > { %3612 = vxpose.xlu0.b32.start [1/16] (narrow) %v3538_v29, 16  ;;  %v3539_v45 = vsel %vm3459_vm10, %v3443_v39, %v5146_v20  ;;  %v5148_v42 = vadd.f32 -1.0, %v5703_v46  ;;  %v5705_v34 = vpop.eup %5704  ;;  %5716 = vpow2.f32 %v3510_v55  ;;  %v3577_v55 = vld [vmem:[%s8339_s10 + $0xa8] sm:$0xff] }
 0x575   : > { %v3540_v58 = vsel %vm3460_vm11, %v3444_v61, %v5147_v53  ;;  %v5149_v17 = vadd.f32 -1.0, %v5705_v34  ;;  %v5707_v6 = vpop.eup %5706  ;;  %v3486_v37 = vmin.f32 %v3454_v30, 0.0  ;;  %v3601_v53 = vld [vmem:[%s8339_s10 + $0x168] sm:$0xff]  ;;  %vm3470_vm5 = vcmp.gt.f32.partialorder %v3454_v30, 0.0 }
 0x576   : > { %v3541_v11 = vsel %vm3461_vm12, %v3445_v0, %v5148_v42  ;;  %v5150_v40 = vadd.f32 -1.0, %v5707_v6  ;;  %v5709_v41 = vpop.eup %5708  ;;  %v3512_v0 = vmul.f32 1.442695, %v3485_v36  ;;  %3644 = vmatpush.msra.mxu0 %v3601_v53  ;;  %v5247_v34 = vld [vmem:[%s8340_s11 + $0xa8] sm:$0xf]  ;;  %v3582_v53 = vld [vmem:[%s8339_s10 + $0xd0] sm:$0xff] }
 0x577   : > { %v3542_v28 = vsel %vm3462_vm13, %v3446_v51, %v5149_v17  ;;  %v5151_v13 = vadd.f32 -1.0, %v5709_v41  ;;  %v5711_v12 = vpop.eup %5710  ;;  %v3514_v54 = vmul.f32 1.442695, %v3486_v37  ;;  %v7979_v51 = vmul.f32 %v7963_v35, %v3436_v60  ;;  %v3592_v17 = vld [vmem:[%s8339_s10 + $0x120] sm:$0xff]  ;;  %v5199_v36 = vld [vmem:[%s8340_s11 + $0x48] sm:$0xf] }
 0x578   : > { %v3543_v50 = vsel %vm3463_vm14, %v3447_v38, %v5150_v40  ;;  %v5152_v56 = vadd.f32 -1.0, %v5711_v12  ;;  %v5713_v39 = vpop.eup %5712  ;;  %5718 = vpow2.f32 %v3512_v0  ;;  %3645 = vmatpush.msra.mxu0 %v3598_v44  ;;  %v5248_v10 = vor.u32 %v5550_v2, %v5247_v34  ;;  %v3589_v40 = vld [vmem:[%s8339_s10 + $0x108] sm:$0xff]  ;;  %v5544_v41 = vld [vmem:[%s8340_s11 + $0x80] sm:$0xf0]  ;;  %v3583_v12 = vld [vmem:[%s8339_s10 + $0xd8] sm:$0xff] }
 0x579   : > { %v3544_v19 = vsel %vm3464_vm15, %v3448_v47, %v5151_v13  ;;  %v5153_v22 = vadd.f32 -1.0, %v5713_v39  ;;  %v5715_v21 = vpop.eup %5714  ;;  %5720 = vpow2.f32 %v3514_v54  ;;  %v3487_v4 = vmin.f32 %v7979_v51, 0.0  ;;  %v3586_v13 = vld [vmem:[%s8339_s10 + $0xf0] sm:$0xff]  ;;  %v3580_v39 = vld [vmem:[%s8339_s10 + $0xc0] sm:$0xff]  ;;  %v3585_v54 = vld [vmem:[%s8339_s10 + $0xe8] sm:$0xff] }
 0x57a   : > { %v3545_v33 = vsel %vm3465_vm0, %v3449_v32, %v5152_v56  ;;  %v5154_v62 = vadd.f32 -1.0, %v5715_v21  ;;  %v5717_v29 = vpop.eup %5716  ;;  %3646 = vmatpush.msra.mxu0 %v3595_v63  ;;  %v5547_v32 = vld [vmem:[%s8340_s11 + $0x98] sm:$0xf0]  ;;  %3882 = vmatpush.bf16.msra.mxu3 %v5248_v10  ;;  %v3593_v56 = vld [vmem:[%s8339_s10 + $0x128] sm:$0xff]  ;;  %vm3471_vm6 = vcmp.gt.f32.partialorder %v7979_v51, 0.0  ;;  %v3574_v0 = vld [vmem:[%s8339_s10 + $0x90] sm:$0xff] }
 0x57b   : > { %v3546_v61 = vsel %vm3466_vm1, %v3450_v7, %v5153_v22  ;;  %v5155_v20 = vadd.f32 -1.0, %v5717_v29  ;;  %v3516_v38 = vmul.f32 1.442695, %v3487_v4  ;;  %v5236_v1 = vor.u32 %v5547_v32, %v5235_v18  ;;  %v3603_v7 = vld [vmem:[%s8339_s10 + $0x178] sm:$0xff]  ;;  %v3578_v4 = vld [vmem:[%s8339_s10 + $0xb0] sm:$0xff]  ;;  %v3572_v34 = vld [vmem:[%s8339_s10 + $0x80] sm:$0xff] }
 0x57c   : > { %3613 = vxpose.xlu0.b32.cont [2/16] (narrow) %v3539_v45, 16  ;;  %v3547_v15 = vsel %vm3467_vm2, %v3451_v27, %v5154_v62  ;;  %3647 = vmatpush.msra.mxu0 %v3592_v17  ;;  %v3597_v27 = vld [vmem:[%s8339_s10 + $0x148] sm:$0xff]  ;;  %v3591_v22 = vld [vmem:[%s8339_s10 + $0x118] sm:$0xff]  ;;  %v5538_v62 = vld [vmem:[%s8340_s11 + $0x50] sm:$0xf0] }
 0x57d   : > { %v3548_v45 = vsel %vm3468_vm3, %v3452_v57, %v5155_v20  ;;  %5722 = vpow2.f32 %v3516_v38  ;;  %3690 = vmatpush.msra.mxu2 %v3603_v7  ;;  %v5541_v57 = vld [vmem:[%s8340_s11 + $0x68] sm:$0xf0]  ;;  %v3571_v29 = vld [vmem:[%s8339_s10 + $0x78] sm:$0xff]  ;;  %v5200_v37 = vor.u32 %v5538_v62, %v5199_v36  ;;  %v3562_v63 = vld [vmem:[%s8339_s10 + $0x30] sm:$0xff] }
 0x57e   : > { %v5719_v16 = vpop.eup %5718  ;;  %3648 = vmatpush.msra.mxu0 %v3589_v40  ;;  %3883 = vmatpush.bf16.msra.mxu3 %v5236_v1  ;;  %v3581_v20 = vld [vmem:[%s8339_s10 + $0xc8] sm:$0xff]  ;;  %v3575_v38 = vld [vmem:[%s8339_s10 + $0x98] sm:$0xff]  ;;  %v3576_v10 = vld [vmem:[%s8339_s10 + $0xa0] sm:$0xff] }
 0x57f   : > { %v5156_v26 = vadd.f32 -1.0, %v5719_v16  ;;  %v5721_v8 = vpop.eup %5720  ;;  %3691 = vmatpush.msra.mxu2 %v3600_v52  ;;  %v3568_v16 = vld [vmem:[%s8339_s10 + $0x60] sm:$0xff]  ;;  %v3559_v2 = vld [vmem:[%s8339_s10 + $0x18] sm:$0xff]  ;;  %v3569_v32 = vld [vmem:[%s8339_s10 + $0x68] sm:$0xff] }
 0x580   : > { %v5157_v47 = vadd.f32 -1.0, %v5721_v8  ;;  %3649 = vmatpush.msra.mxu0 %v3586_v13  ;;  %v5175_v8 = vld [vmem:[%s8340_s11 + $0x18] sm:$0xf]  ;;  %v3556_v40 = vld [vmem:[%s8339_s10] sm:$0xff]  ;;  %v5546_v7 = vld [vmem:[%s8340_s11 + $0x94] sm:$0xf] }
 0x581   : > { %v3549_v46 = vsel %vm3469_vm4, %v3453_v5, %v5156_v26  ;;  %3692 = vmatpush.msra.mxu2 %v3597_v27  ;;  %v5212_v5 = vor.u32 %v5541_v57, %v5211_v24  ;;  %v3565_v26 = vld [vmem:[%s8339_s10 + $0x48] sm:$0xff]  ;;  %v8181_v13 = vld [vmem:[%s8331_s1] sm:$0xff]  ;;  %v5255_v24 = vld [vmem:[%s8340_s11 + $0xb0] sm:$0xf] }
 0x582   : > { %3650 = vmatpush.msra.mxu0 %v3583_v12  ;;  %v3567_v12 = vld [vmem:[%s8339_s10 + $0x58] sm:$0xff]  ;;  %v5537_v36 = vld [vmem:[%s8340_s11 + $0x4c] sm:$0xf] }
 0x583   : > { %v5723_v14 = vpop.eup %5722  ;;  %v5551_v57 = vld [vmem:[%s8340_s11 + $0xb8] sm:$0xf0]  ;;  %v5201_v62 = vld [vmem:[%s8340_s11 + $0x54] sm:$0xf0] }
 0x584   : > { %3614 = vxpose.xlu0.b32.cont [3/16] (narrow) %v3540_v58, 16  ;;  %v7986_v58 = vmul.f32 %v7963_v35, %v3437_v48  ;;  %v5158_v49 = vadd.f32 -1.0, %v5723_v14  ;;  %3651 = vmatpush.msra.mxu0 %v3580_v39  ;;  %v3570_v14 = vld [vmem:[%s8339_s10 + $0x70] sm:$0xff] }
 0x586   : > { %v3488_v42 = vmin.f32 %v7986_v58, 0.0  ;;  %v3551_v21 = vsel %vm3471_vm6, %v7979_v51, %v5158_v49  ;;  %3652 = vmatpush.msra.mxu0 %v3577_v55  ;;  %v5187_v51 = vld [vmem:[%s8340_s11 + $0x30] sm:$0xf]  ;;  %vm3472_vm7 = vcmp.gt.f32.partialorder %v7986_v58, 0.0  ;;  %v3560_v49 = vld [vmem:[%s8339_s10 + $0x20] sm:$0xff] }
 0x587   : > { %v5213_v55 = vld [vmem:[%s8340_s11 + $0x6c] sm:$0xf0] }
 0x588   : > { %v3518_v6 = vmul.f32 1.442695, %v3488_v42  ;;  %3653 = vmatpush.msra.mxu0 %v3574_v0  ;;  %v5532_v42 = vld [vmem:[%s8340_s11 + $0x20] sm:$0xf0]  ;;  %v5243_v0 = vld [vmem:[%s8340_s11 + $0x98] sm:$0xf] }
 0x589   : > { %v5176_v17 = vor.u32 %v5532_v42, %v5175_v8  ;;  %v5207_v8 = vld [vmem:[%s8340_s11 + $0x50] sm:$0xf] }
 0x58a   : > { %5724 = vpow2.f32 %v3518_v6  ;;  %3654 = vmatpush.msra.mxu0 %v3571_v29  ;;  %v5529_v6 = vld [vmem:[%s8340_s11 + $0x8] sm:$0xf0]  ;;  %v5534_v29 = vld [vmem:[%s8340_s11 + $0x34] sm:$0xf] }
 0x58c   : > { %3615 = vxpose.xlu0.b32.cont [4/16] (narrow) %v3541_v11, 16  ;;  %v3438_v11 = vld [vmem:[#allocation7 + $0x78] sm:$0xff]  ;;  %3655 = vmatpush.msra.mxu0 %v3568_v16 }
 0x58d   : > { %v8014_v3 = vmul.f32 %v7963_v35, %v3438_v11  ;;  %v5223_v35 = vld [vmem:[%s8340_s11 + $0x78] sm:$0xf]  ;;  %v5177_v16 = vld [vmem:[%s8340_s11 + $0x24] sm:$0xf0] }
 0x58e   : > { %v5224_v23 = vor.u32 %v5544_v41, %v5223_v35  ;;  %3656 = vmatpush.msra.mxu0 %v3565_v26  ;;  %v5249_v11 = vld [vmem:[%s8340_s11 + $0xb4] sm:$0xf0]  ;;  %v3566_v35 = vld [vmem:[%s8339_s10 + $0x50] sm:$0xff] }
 0x58f   : > { %vm3473_vm8 = vcmp.gt.f32.partialorder %v8014_v3, 0.0  ;;  %v5542_v26 = vld [vmem:[%s8340_s11 + $0x70] sm:$0xf0] }
 0x590   : > { %3884 = vmatpush.bf16.msra.mxu3 %v5224_v23  ;;  %v5725_v43 = vpop.eup %5724  ;;  %3657 = vmatpush.msra.mxu0 %v3562_v63 }
 0x591   : > { %v5159_v60 = vadd.f32 -1.0, %v5725_v43  ;;  %v5204_v43 = vor.u32 %v5537_v36, %v5201_v62 }
 0x592   : > { %3658 = vmatpush.msra.mxu0 %v3559_v2  ;;  %v5533_v2 = vld [vmem:[%s8340_s11 + $0x28] sm:$0xf0] }
 0x594   : > { %3616 = vxpose.xlu0.b32.cont [5/16] (narrow) %v3542_v28, 16  ;;  %v3602_v28 = vld [vmem:[%s8339_s10 + $0x170] sm:$0xff]  ;;  %3885 = vmatpush.bf16.msra.mxu3 %v5212_v5  ;;  %v5256_v5 = vor.u32 %v5551_v57, %v5255_v24 }
 0x595   : > { %3667 = vmatpush.msra.mxu1 %v3602_v28  ;;  %v5163_v28 = vld [vmem:[%s8340_s11] sm:$0xf]  ;;  %3659 = vmatpush.msra.mxu0 %v3556_v40 }
 0x596   : > { %v5164_v41 = vor.u32 %v5529_v6, %v5163_v28  ;;  %v8306_v40 = vld [vmem:[%s8342_s13] sm:$0x7] }
 0x597   : > { %3668 = vmatpush.msra.mxu1 %v3599_v25  ;;  %v3573_v25 = vld [vmem:[%s8339_s10 + $0x88] sm:$0xff] }
 0x598   : > { %3886 = vmatpush.bf16.msra.mxu3 %v5200_v37  ;;  %v5189_v37 = vld [vmem:[%s8340_s11 + $0x3c] sm:$0xf0] }
 0x599   : > { %3669 = vmatpush.msra.mxu1 %v3596_v31  ;;  %v8186_v31 = vld [vmem:[%s8331_s1 + $0x8] sm:$0xff] }
 0x59a   : > { %v8199_v23 = vpack.c.bf16 %v8186_v31, %v8181_v13 }
 0x59b   : > { %3670 = vmatpush.msra.mxu1 %v3593_v56  ;;  %v5225_v56 = vld [vmem:[%s8340_s11 + $0x84] sm:$0xf0] }
 0x59c   : > { %3617 = vxpose.xlu0.b32.cont [6/16] (narrow) %v3543_v50, 16  ;;  %v3550_v50 = vsel %vm3470_vm5, %v3454_v30, %v5157_v47  ;;  %v3584_v30 = vld [vmem:[%s8339_s10 + $0xe0] sm:$0xff]  ;;  %v5549_v47 = vld [vmem:[%s8340_s11 + $0xac] sm:$0xf] }
 0x59d   : > { %3671 = vmatpush.msra.mxu1 %v3590_v9  ;;  %v5252_v1 = vor.u32 %v5549_v47, %v5249_v11  ;;  %v3557_v9 = vld [vmem:[%s8339_s10 + $0x8] sm:$0xff]  ;;  %v5536_v47 = vld [vmem:[%s8340_s11 + $0x40] sm:$0xf0]  ;;  %v5183_v11 = vld [vmem:[%s8340_s11 + $0x20] sm:$0xf] }
 0x59f   : > { %3896 = vmatpush.bf16.msrb.mxu0 %v5252_v1 }
 0x5a4   : > { %3618 = vxpose.xlu0.b32.cont [7/16] (narrow) %v3544_v19, 16  ;;  %v3489_v19 = vmin.f32 %v8014_v3, 0.0 }
 0x5a6   : > { %v3520_v59 = vmul.f32 1.442695, %v3489_v19  ;;  %v3563_v19 = vld [vmem:[%s8339_s10 + $0x38] sm:$0xff] }
 0x5a8   : > { %5726 = vpow2.f32 %v3520_v59  ;;  %v5540_v59 = vld [vmem:[%s8340_s11 + $0x64] sm:$0xf] }
 0x5ac   : > { %3619 = vxpose.xlu0.b32.cont [8/16] (narrow) %v3545_v33, 16  ;;  %v3594_v33 = vld [vmem:[%s8339_s10 + $0x130] sm:$0xff] }
 0x5ad   : > { %3693 = vmatpush.msra.mxu2 %v3594_v33  ;;  %v3564_v33 = vld [vmem:[%s8339_s10 + $0x40] sm:$0xff] }
 0x5ae   : > { %v5727_v44 = vpop.eup %5726 }
 0x5af   : > { %3694 = vmatpush.msra.mxu2 %v3591_v22  ;;  %v5160_v18 = vadd.f32 -1.0, %v5727_v44  ;;  %v3561_v22 = vld [vmem:[%s8339_s10 + $0x28] sm:$0xff]  ;;  %v5539_v44 = vld [vmem:[%s8340_s11 + $0x58] sm:$0xf0] }
 0x5b0   : > { %v5208_v63 = vor.u32 %v5539_v44, %v5207_v8 }
 0x5b1   : > { %v3553_v52 = vsel %vm3473_vm8, %v8014_v3, %v5160_v18  ;;  %v5543_v3 = vld [vmem:[%s8340_s11 + $0x7c] sm:$0xf]  ;;  %v5530_v18 = vld [vmem:[%s8340_s11 + $0x10] sm:$0xf0] }
 0x5b2   : > { %v5228_v39 = vor.u32 %v5543_v3, %v5225_v56 }
 0x5b4   : > { %3620 = vxpose.xlu0.b32.cont [9/16] (narrow) %v3546_v61, 16  ;;  %v3587_v61 = vld [vmem:[%s8339_s10 + $0xf8] sm:$0xff] }
 0x5b5   : > { %3672 = vmatpush.msra.mxu1 %v3587_v61  ;;  %v5216_v61 = vor.u32 %v5540_v59, %v5213_v55 }
 0x5b7   : > { %3673 = vmatpush.msra.mxu1 %v3584_v30  ;;  %v5548_v30 = vld [vmem:[%s8340_s11 + $0xa0] sm:$0xf0] }
 0x5b9   : > { %3674 = vmatpush.msra.mxu1 %v3581_v20  ;;  %v5231_v20 = vld [vmem:[%s8340_s11 + $0x80] sm:$0xf] }
 0x5bb   : > { %3675 = vmatpush.msra.mxu1 %v3578_v4 }
 0x5bc   : > { %3621 = vxpose.xlu0.b32.cont [10/16] (narrow) %v3547_v15, 16  ;;  %v3588_v15 = vld [vmem:[%s8339_s10 + $0x100] sm:$0xff] }
 0x5bd   : > { %3695 = vmatpush.msra.mxu2 %v3588_v15  ;;  %3676 = vmatpush.msra.mxu1 %v3575_v38  ;;  %v5244_v15 = vor.u32 %v5548_v30, %v5243_v0  ;;  %v5528_v38 = vld [vmem:[%s8340_s11 + $0x4] sm:$0xf] }
 0x5bf   : > { %3696 = vmatpush.msra.mxu2 %v3585_v54  ;;  %3677 = vmatpush.msra.mxu1 %v3572_v34  ;;  %v5545_v54 = vld [vmem:[%s8340_s11 + $0x88] sm:$0xf0] }
 0x5c1   : > { %3697 = vmatpush.msra.mxu2 %v3582_v53  ;;  %3678 = vmatpush.msra.mxu1 %v3569_v32  ;;  %v5219_v53 = vld [vmem:[%s8340_s11 + $0x68] sm:$0xf] }
 0x5c3   : > { %3679 = vmatpush.msra.mxu1 %v3566_v35 }
 0x5c4   : > { %3622 = vxpose.xlu0.b32.cont [11/16] (narrow) %v3548_v45, 16  ;;  %v5535_v45 = vld [vmem:[%s8340_s11 + $0x38] sm:$0xf0] }
 0x5c5   : > { %v5188_v48 = vor.u32 %v5535_v45, %v5187_v51  ;;  %3680 = vmatpush.msra.mxu1 %v3563_v19  ;;  %v5232_v51 = vor.u32 %v5545_v54, %v5231_v20  ;;  %v5531_v45 = vld [vmem:[%s8340_s11 + $0x1c] sm:$0xf] }
 0x5c6   : > { %v5180_v4 = vor.u32 %v5531_v45, %v5177_v16  ;;  %v3750_v45 = vperm.slane %v8306_v40, 2 }
 0x5c7   : > { %3887 = vmatpush.bf16.msra.mxu3 %v5188_v48  ;;  %3681 = vmatpush.msra.mxu1 %v3560_v49  ;;  %v5220_v48 = vor.u32 %v5542_v26, %v5219_v53 }
 0x5c9   : > { %3682 = vmatpush.msra.mxu1 %v3557_v9 }
 0x5cb   : > { %3888 = vmatpush.bf16.msra.mxu3 %v5176_v17  ;;  %3910 = vmatpush.bf16.msrb.mxu1 %v5256_v5  ;;  %v5184_v17 = vor.u32 %v5533_v2, %v5183_v11 }
 0x5cc   : > { %3623 = vxpose.xlu0.b32.cont [12/16] (narrow) %v3549_v46, 16  ;;  %v3552_v46 = vsel %vm3472_vm7, %v7986_v58, %v5159_v60  ;;  %v3579_v58 = vld [vmem:[%s8339_s10 + $0xb8] sm:$0xff]  ;;  %v5192_v60 = vor.u32 %v5534_v29, %v5189_v37 }
 0x5cd   : > { %3698 = vmatpush.msra.mxu2 %v3579_v58  ;;  %v5195_v58 = vld [vmem:[%s8340_s11 + $0x38] sm:$0xf] }
 0x5ce   : > { %v5196_v34 = vor.u32 %v5536_v47, %v5195_v58 }
 0x5cf   : > { %3699 = vmatpush.msra.mxu2 %v3576_v10  ;;  %3889 = vmatpush.bf16.msra.mxu3 %v5164_v41  ;;  %v5171_v10 = vld [vmem:[%s8340_s11 + $0x8] sm:$0xf] }
 0x5d0   : > { %3911 = vmatpush.bf16.msrb.mxu1 %v5244_v15  ;;  %v5172_v32 = vor.u32 %v5530_v18, %v5171_v10 }
 0x5d1   : > { %3700 = vmatpush.msra.mxu2 %v3573_v25  ;;  %v8311_v25 = vld [vmem:[%s8341_s12] sm:$0x7] }
 0x5d2   : > { %3890 = vmatmul.bf16.vlgmr.msra.gmra.mxu3 %v8199_v23  ;;  %v3607_v57 = vperm.slane %v8311_v25, 1  ;;  %v3608_v11 = vperm.slane %v8311_v25, 2 }
 0x5d3   : > { %3701 = vmatpush.msra.mxu2 %v3570_v14 }
 0x5d4   : > { %3624 = vxpose.xlu0.b32.cont [13/16] (narrow) %v3550_v50, 16  ;;  %v5237_v50 = vld [vmem:[%s8340_s11 + $0x9c] sm:$0xf0]  ;;  %3912 = vmatpush.bf16.msrb.mxu1 %v5232_v51 }
 0x5d5   : > { %v5240_v27 = vor.u32 %v5546_v7, %v5237_v50  ;;  %3702 = vmatpush.msra.mxu2 %v3567_v12  ;;  %v3748_v7 = vperm.slane %v8306_v40, 0  ;;  %v3606_v50 = vperm.slane %v8311_v25, 0 }
 0x5d7   : > { %3897 = vmatpush.bf16.msrb.mxu0 %v5240_v27  ;;  %3703 = vmatpush.msra.mxu2 %v3564_v33 }
 0x5d8   : > { %3913 = vmatpush.bf16.msrb.mxu1 %v5220_v48 }
 0x5d9   : > { %3704 = vmatpush.msra.mxu2 %v3561_v22 }
 0x5db   : > { %3898 = vmatpush.bf16.msrb.mxu0 %v5228_v39  ;;  %v3749_v39 = vperm.slane %v8306_v40, 1 }
 0x5dc   : > { %3625 = vxpose.xlu0.b32.cont [14/16] (narrow) %v3551_v21, 16  ;;  %v3558_v21 = vld [vmem:[%s8339_s10 + $0x10] sm:$0xff]  ;;  %3914 = vmatpush.bf16.msrb.mxu1 %v5208_v63 }
 0x5dd   : > { %3705 = vmatpush.msra.mxu2 %v3558_v21 }
 0x5df   : > { %3899 = vmatpush.bf16.msrb.mxu0 %v5216_v61 }
 0x5e0   : > { %3915 = vmatpush.bf16.msrb.mxu1 %v5196_v34 }
 0x5e3   : > { %3900 = vmatpush.bf16.msrb.mxu0 %v5204_v43 }
 0x5e4   : > { %3626 = vxpose.xlu0.b32.cont [15/16] (narrow) %v3552_v46, 16  ;;  %v5165_v46 = vld [vmem:[%s8340_s11 + $0xc] sm:$0xf0]  ;;  %3916 = vmatpush.bf16.msrb.mxu1 %v5184_v17 }
 0x5e5   : > { %v5168_v42 = vor.u32 %v5528_v38, %v5165_v46 }
 0x5e7   : > { %3901 = vmatpush.bf16.msrb.mxu0 %v5192_v60 }
 0x5e8   : > { %3917 = vmatpush.bf16.msrb.mxu1 %v5172_v32 }
 0x5eb   : > { %3902 = vmatpush.bf16.msrb.mxu0 %v5180_v4 }
 0x5ec   : > { %3627 = vxpose.xlu0.b32.end [16/16] (narrow) %v3553_v52, 16 }
 0x5ef   : > { %3903 = vmatpush.bf16.msrb.mxu0 %v5168_v42 }
 0x618   : > { %v3628_v28 = vpop.trf.xlu0 }
 0x619   : > { %3660 = vmatmul.f32.vlgmr.msra.gmra.mxu0 %v3628_v28  ;;  %3683 = vmatmul.f32.vlgmr.msra.gmra.mxu1 %v3628_v28 }
 0x61a   : > { %3706 = vmatmul.f32.vlgmr.msra.gmra.mxu2 %v3628_v28 }
 0x620   : > { %v3629_v6 = vpop.trf.xlu0 }
 0x621   : > { %3663 = vmatmul.f32.gmra.mxu0 %v3629_v6  ;;  %3686 = vmatmul.f32.gmra.mxu1 %v3629_v6 }
 0x622   : > { %3709 = vmatmul.f32.gmra.mxu2 %v3629_v6 }
 0x629   : > { %3904 = vmatmul.bf16.vlgmr.msrb.gmra.mxu0 %v8199_v23  ;;  %3918 = vmatmul.bf16.vlgmr.msrb.gmra.mxu1 %v8199_v23 }
 0x655   : > { %v3891_v1 = vpop.f32.mrf.mxu3 }
 0x656   : > { %v3892_v35 = vadd.f32 %v3891_v1, %v3748_v7 }
 0x65d   : > { %v3893_v27 = vpop.f32.mrf.mxu3 }
 0x65e   : > { %v3894_v12 = vadd.f32 %v3893_v27, %v3748_v7 }
 0x696   : > { %v3661_v41 = vpop.f32.mrf.mxu0  ;;  %v3684_v3 = vpop.f32.mrf.mxu1 }
 0x697   : > { %v3662_v14 = vadd.f32 %v3661_v41, %v3606_v50  ;;  %v3685_v59 = vadd.f32 %v3684_v3, %v3607_v57 }
 0x699   : > { %v3924_v52 = vadd.f32 %v3892_v35, %v3662_v14 }
 0x69b   : > { %v5257_v19 = vmul.f32 -1.442695, %v3924_v52 }
 0x69d   : > { %5728 = vpow2.f32 %v5257_v19  ;;  %v3707_v63 = vpop.f32.mrf.mxu2 }
 0x69e   : > { %v3664_v23 = vpop.f32.mrf.mxu0  ;;  %v3687_v5 = vpop.f32.mrf.mxu1  ;;  %v3708_v40 = vadd.f32 %v3707_v63, %v3608_v11 }
 0x69f   : > { %v3665_v56 = vadd.f32 %v3664_v23, %v3606_v50  ;;  %v3688_v15 = vadd.f32 %v3687_v5, %v3607_v57 }
 0x6a1   : > { %v3925_v49 = vadd.f32 %v3894_v12, %v3665_v56 }
 0x6a3   : > { %v5729_v24 = vpop.eup %5728  ;;  %v5258_v33 = vmul.f32 -1.442695, %v3925_v49 }
 0x6a4   : > { %v3932_v9 = vadd.f32 1.0, %v5729_v24 }
 0x6a5   : > { %5730 = vpow2.f32 %v5258_v33  ;;  %v3710_v19 = vpop.f32.mrf.mxu2 }
 0x6a6   : > { %5732 = vrcp.f32 %v3932_v9  ;;  %v3905_v22 = vpop.f32.mrf.mxu0  ;;  %v3919_v60 = vpop.f32.mrf.mxu1  ;;  %v3945_v51 = vand.u32 2147483648, %v3932_v9  ;;  %v3943_v16 = vand.u32 2147483647, %v3932_v9  ;;  %vm3939_vm10 = vweird.f32 %v3932_v9 }
 0x6a7   : > { %v3906_v55 = vadd.f32 %v3905_v22, %v3749_v39  ;;  %v3920_v44 = vadd.f32 %v3919_v60, %v3750_v45  ;;  %v3711_v24 = vadd.f32 %v3710_v19, %v3608_v11 }
 0x6a8   : > { %v3946_v8 = vor.u32 1.1754944e-38, %v3945_v51  ;;  %vm3944_vm12 = vcmp.eq.f32.partialorder %v3943_v16, 8.507059e+37 }
 0x6a9   : > { %v3964_v61 = vadd.f32 %v3906_v55, %v3685_v59 }
 0x6ab   : > { %v5731_v21 = vpop.eup %5730  ;;  %v5259_v36 = vmul.f32 -1.442695, %v3964_v61 }
 0x6ac   : > { %v5733_v62 = vpop.eup %5732  ;;  %v3933_v43 = vadd.f32 1.0, %v5731_v21 }
 0x6ad   : > { %5734 = vpow2.f32 %v5259_v36  ;;  %v3935_v0 = vmul.f32 %v5733_v62, %v3932_v9  ;;  %vm3940_vm9 = vweird.f32 %v5733_v62 }
 0x6ae   : > { %5736 = vrcp.f32 %v3933_v43  ;;  %v3907_v30 = vpop.f32.mrf.mxu0  ;;  %vm3941_vm11 = vmor %vm3939_vm10, %vm3940_vm9  ;;  %v3960_v2 = vand.u32 2147483648, %v3933_v43  ;;  %v3958_v10 = vand.u32 2147483647, %v3933_v43  ;;  %v3921_v32 = vpop.f32.mrf.mxu1  ;;  %vm3954_vm14 = vweird.f32 %v3933_v43 }
 0x6af   : > { %v3908_v29 = vadd.f32 %v3907_v30, %v3749_v39  ;;  %v3936_v37 = vsub.f32 1.0, %v3935_v0  ;;  %v3922_v14 = vadd.f32 %v3921_v32, %v3750_v45 }
 0x6b0   : > { %v3961_v35 = vor.u32 1.1754944e-38, %v3960_v2  ;;  %vm3959_vm0 = vcmp.eq.f32.partialorder %v3958_v10, 8.507059e+37 }
 0x6b1   : > { %v3965_v20 = vadd.f32 %v3908_v29, %v3688_v15  ;;  %v3937_v54 = vmul.f32 %v5733_v62, %v3936_v37 }
 0x6b3   : > { %v5735_v4 = vpop.eup %5734  ;;  %v5260_v53 = vmul.f32 -1.442695, %v3965_v20  ;;  %v3938_v26 = vadd.f32 %v5733_v62, %v3937_v54 }
 0x6b4   : > { %v5737_v48 = vpop.eup %5736  ;;  %v3972_v38 = vadd.f32 1.0, %v5735_v4 }
 0x6b5   : > { %5738 = vpow2.f32 %v5260_v53  ;;  %v3942_v46 = vsel %vm3941_vm11, %v5733_v62, %v3938_v26  ;;  %v3950_v42 = vmul.f32 %v5737_v48, %v3933_v43  ;;  %vm3955_vm13 = vweird.f32 %v5737_v48 }
 0x6b6   : > { %5740 = vrcp.f32 %v3972_v38  ;;  %v3947_v58 = vsel %vm3944_vm12, %v3946_v8, %v3942_v46  ;;  %vm3956_vm15 = vmor %vm3954_vm14, %vm3955_vm13  ;;  %v3985_v27 = vand.u32 2147483648, %v3972_v38  ;;  %v3983_v23 = vand.u32 2147483647, %v3972_v38 }
 0x6b7   : > { %v3951_v47 = vsub.f32 1.0, %v3950_v42  ;;  %v4004_v17 = vmul.f32 %v3947_v58, %v3920_v44  ;;  %vm3979_vm2 = vweird.f32 %v3972_v38 }
 0x6b8   : > { %v3986_v57 = vor.u32 1.1754944e-38, %v3985_v27  ;;  %vm3984_vm4 = vcmp.eq.f32.partialorder %v3983_v23, 8.507059e+37 }
 0x6b9   : > { %v3952_v34 = vmul.f32 %v5737_v48, %v3951_v47  ;;  %v4006_v41 = vadd.f32 %v4004_v17, %v3708_v40 }
 0x6bb   : > { %v5739_v18 = vpop.eup %5738  ;;  %v3953_v28 = vadd.f32 %v5737_v48, %v3952_v34 }
 0x6bc   : > { %v5741_v6 = vpop.eup %5740  ;;  %v3973_v1 = vadd.f32 1.0, %v5739_v18 }
 0x6bd   : > { %v3975_v7 = vmul.f32 %v5741_v6, %v3972_v38  ;;  %v3957_v50 = vsel %vm3956_vm15, %v5737_v48, %v3953_v28  ;;  %vm3980_vm1 = vweird.f32 %v5741_v6 }
 0x6be   : > { %5742 = vrcp.f32 %v3973_v1  ;;  %v3962_v52 = vsel %vm3959_vm0, %v3961_v35, %v3957_v50  ;;  %vm3981_vm3 = vmor %vm3979_vm2, %vm3980_vm1  ;;  %v4000_v61 = vand.u32 2147483648, %v3973_v1  ;;  %v3998_v21 = vand.u32 2147483647, %v3973_v1 }
 0x6bf   : > { %v3976_v25 = vsub.f32 1.0, %v3975_v7  ;;  %5744 = vtanh.f32 %v4006_v41  ;;  %v4005_v3 = vmul.f32 %v3962_v52, %v3922_v14  ;;  %vm3994_vm6 = vweird.f32 %v3973_v1 }
 0x6c0   : > { %v4001_v15 = vor.u32 1.1754944e-38, %v4000_v61  ;;  %vm3999_vm8 = vcmp.eq.f32.partialorder %v3998_v21, 8.507059e+37 }
 0x6c1   : > { %v3977_v12 = vmul.f32 %v5741_v6, %v3976_v25  ;;  %v4007_v22 = vadd.f32 %v4005_v3, %v3711_v24 }
 0x6c3   : > { %v3978_v56 = vadd.f32 %v5741_v6, %v3977_v12  ;;  %5746 = vtanh.f32 %v4007_v22 }
 0x6c4   : > { %v5743_v49 = vpop.eup %5742 }
 0x6c5   : > { %v3990_v33 = vmul.f32 %v5743_v49, %v3973_v1  ;;  %v3982_v39 = vsel %vm3981_vm3, %v5741_v6, %v3978_v56  ;;  %v5745_v5 = vpop.eup %5744  ;;  %vm3995_vm5 = vweird.f32 %v5743_v49 }
 0x6c6   : > { %v3987_v9 = vsel %vm3984_vm4, %v3986_v57, %v3982_v39  ;;  %vm3996_vm7 = vmor %vm3994_vm6, %vm3995_vm5 }
 0x6c7   : > { %v3991_v59 = vsub.f32 1.0, %v3990_v33  ;;  %v4010_v55 = vsub.f32 1.0, %v3987_v9  ;;  %v4014_v43 = vmul.f32 %v3987_v9, %v8181_v13 }
 0x6c9   : > { %v3992_v36 = vmul.f32 %v5743_v49, %v3991_v59  ;;  %v4012_v62 = vmul.f32 %v5745_v5, %v4010_v55  ;;  %v5747_v60 = vpop.eup %5746 }
 0x6cb   : > { %v4016_v0 = vadd.f32 %v4014_v43, %v4012_v62  ;;  %v3993_v30 = vadd.f32 %v5743_v49, %v3992_v36 }
 0x6cd   : > { %4018 = vst [vmem:[%s8343_s14] sm:$0xff] %v4016_v0  ;;  %v3997_v29 = vsel %vm3996_vm7, %v5743_v49, %v3993_v30 }
 0x6ce   : > { %v4002_v37 = vsel %vm3999_vm8, %v4001_v15, %v3997_v29 }
 0x6cf   : > { %v4011_v20 = vsub.f32 1.0, %v4002_v37  ;;  %v4015_v51 = vmul.f32 %v4002_v37, %v8186_v31 }
 0x6d1   : > { %v4013_v54 = vmul.f32 %v5747_v60, %v4011_v20 }
 0x6d3   : > { %v4017_v45 = vadd.f32 %v4015_v51, %v4013_v54 }
 0x6d5   : > { %4019 = vst [vmem:[%s8343_s14 + $0x8] sm:$0xff] %v4017_v45 }
 0x6d6 PF: > { %s34_s19 = sadd.s32 1, %s5772_s19  }
 0x6d7   : > { %p31_p7 = scmp.ge.s32.totalorder %s34_s19, 4  }
 0x6d9   :  { %33 = sbr.rel (!%p31_p7) target bundleno = 7 (0x7), region = 129 }

</bundles_post_ra>
